<compile_context>
chip_gen: v5e
topology: v5e:2x2
jax: 0.10.0
libtpu: 0.0.40
codegen_flags: <defaults>
</compile_context>

<pallas_src>
import functools

import jax
import jax.numpy as jnp
from jax import lax
from jax.experimental import pallas as pl
from jax.experimental.pallas import tpu as pltpu


KSIZE = 5
STRIDE = 2
PHASE0 = STRIDE ** 3            # total spatial downsampling of the conv stack
WEIGHT_DTYPE = jnp.bfloat16     # Toeplitz conv weights stored/streamed in bf16
                                # (set to jnp.float32 for exact-module numerics)


def conv2d_size_out(size, kernel_size=KSIZE, stride=STRIDE):
    return (size - (kernel_size - 1) - 1) // stride + 1


def _round_up(x, m):
    return (x + m - 1) // m * m


def _n_delta(m_in):
    """Coarse-grid offsets (per axis) a stride-2 'valid' 5x5 conv needs."""
    m_out = m_in // STRIDE
    return (STRIDE * (m_out - 1) + (KSIZE - 1)) // m_in + 1


# ----------------------------- Pallas kernel ------------------------------- #

def _dqn_kernel(x_ref, t1_ref, ss1_ref, t2_ref, ss2_ref, t3_ref, ss3_ref,
                wh_ref, bh_ref, o_ref, z_ref, a1_ref, a2_ref, a3_ref,
                *, work_rows, rows_pad, gw, grid_cells, batch, h3, w3):
    """Entire DQN forward on VMEM-resident data.

    Activations are [rows_pad, phases*channels] matrices on a common coarse grid
    (row = b*gh*gw + s*gw + t).  A conv layer is ONE wide matmul against the
    delta-concatenated block-Toeplitz weight, a polyphase delta-sum of shifted
    row slices over its column groups, and a fused (conv-bias + BatchNorm)
    scale/shift + ReLU epilogue.  Entries outside the true spatial range are
    garbage by construction but are provably never read into valid entries.
    """
    tail = rows_pad - work_rows
    # Zero only the padded tail rows that later full-height matmuls / shifted
    # reads actually touch (rows [0, work_rows) are always overwritten below).
    a1_ref[work_rows:, :] = jnp.zeros((tail, a1_ref.shape[1]), a1_ref.dtype)
    a2_ref[work_rows:, :] = jnp.zeros((tail, a2_ref.shape[1]), a2_ref.dtype)
    a3_ref[work_rows:, :] = jnp.zeros((tail, a3_ref.shape[1]), a3_ref.dtype)

    def conv_bn_relu(in_ref, t_ref, ss_ref, out_ref):
        d_out = ss_ref.shape[1]
        width = t_ref.shape[1]
        nd = int(round((width // d_out) ** 0.5))
        # One wide, lane-dense MXU matmul: the LHS is staged exactly once.
        z_ref[:, 0:width] = jnp.dot(
            in_ref[...].astype(t_ref.dtype), t_ref[...],
            preferred_element_type=jnp.float32)
        # Polyphase delta-sum: cheap shifted adds over Z's column groups (VPU).
        acc = None
        for k in range(nd * nd):
            dh, dw = divmod(k, nd)
            off = dh * gw + dw                                   # static shift
            term = z_ref[off:off + work_rows, k * d_out:(k + 1) * d_out]
            acc = term if acc is None else acc + term
        y = acc * ss_ref[0:1, :] + ss_ref[1:2, :]    # folded conv-bias + BN
        out_ref[0:work_rows, :] = jnp.maximum(y, 0.0)            # fused ReLU

    conv_bn_relu(x_ref, t1_ref, ss1_ref, a1_ref)     # [*, 8*8*3 ] -> [*, 4*4*16]
    conv_bn_relu(a1_ref, t2_ref, ss2_ref, a2_ref)    # [*, 4*4*16] -> [*, 2*2*32]
    conv_bn_relu(a2_ref, t3_ref, ss3_ref, a3_ref)    # [*, 2*2*32] -> [*, 32]

    # Linear head: h3*w3 independent full-height [work_rows,32]@[32,n_out]
    # matmuls accumulated once, then one row extraction per batch element.
    q = None
    for blk in range(h3 * w3):
        hh, ww = divmod(blk, w3)
        off = hh * gw + ww
        term = jnp.dot(a3_ref[off:off + work_rows, :], wh_ref[blk],
                       preferred_element_type=jnp.float32)
        q = term if q is None else q + term
    for b in range(batch):
        r = b * grid_cells
        o_ref[b:b + 1, :] = q[r:r + 1, :] + bh_ref[...]


# ------------------- one-time parameter preparation (XLA) ------------------ #

def _phase_selector(m_in, m_out, delta, k=KSIZE):
    """S[beta, r, i] = 1 iff i == m_in*delta + beta - 2*r and 0 <= i < k."""
    beta = jnp.arange(m_in)[:, None, None]
    r = jnp.arange(m_out)[None, :, None]
    i = jnp.arange(k)[None, None, :]
    return (m_in * delta + beta - STRIDE * r == i).astype(jnp.float32)


def _phase_conv_matrix(w_oihw, m_in):
    """Delta-concatenated block-Toeplitz matrix implementing a stride-2 'valid'
    conv in polyphase form: [m_in^2*c_in, n_delta^2 * m_out^2*c_out].  Rows pack
    (beta_h, beta_w, c_in); column group k = dh*nd+dw packs (r_h, r_w, c_out).
    Every entry is either 0 or exactly one conv-weight value, so the bf16 cast
    below is exactly 'round the conv weights to bf16'."""
    m_out = m_in // STRIDE
    c_out, c_in, k, _ = w_oihw.shape
    w_hwio = jnp.transpose(w_oihw, (2, 3, 1, 0)).astype(jnp.float32)
    nd = _n_delta(m_in)
    mats = []
    for dh in range(nd):
        sh = _phase_selector(m_in, m_out, dh, k)
        for dw in range(nd):
            sw = _phase_selector(m_in, m_out, dw, k)
            t = jnp.einsum("ari,bsj,ijco->abcrso", sh, sw, w_hwio)
            mats.append(t.reshape(m_in * m_in * c_in, m_out * m_out * c_out))
    return jnp.concatenate(mats, axis=1).astype(WEIGHT_DTYPE)


def _fold_bn(bias, gamma, beta, mean, var, m_out, eps=1e-5):
    scale = (gamma / jnp.sqrt(var + eps)).astype(jnp.float32)
    shift = ((bias - mean) * scale + beta).astype(jnp.float32)
    reps = m_out * m_out
    return jnp.stack([jnp.tile(scale, reps), jnp.tile(shift, reps)], axis=0)


def prepare_kernel_params(p, h, w, eps=1e-5):
    """Convert PyTorch-layout parameters into the phase-packed operands used by
    the fused kernel.  Done once per weight update, outside the per-call path."""
    h1, w1 = conv2d_size_out(h), conv2d_size_out(w)
    h2, w2 = conv2d_size_out(h1), conv2d_size_out(w1)
    h3, w3 = conv2d_size_out(h2), conv2d_size_out(w2)
    c3 = p["w3"].shape[0]
    n_out = p["w_head"].shape[0]

    # torch flattens NCHW -> (c, h, w); regroup the head weight into one
    # [c3, n_out] block per (h, w) position of the last conv output.
    wh = p["w_head"].reshape(n_out, c3, h3, w3).transpose(2, 3, 1, 0)
    wh = wh.reshape(h3 * w3, c3, n_out).astype(jnp.float32)

    return dict(
        t1=_phase_conv_matrix(p["w1"], 8),
        ss1=_fold_bn(p["b1"], p["g1"], p["be1"], p["m1"], p["v1"], 4, eps),
        t2=_phase_conv_matrix(p["w2"], 4),
        ss2=_fold_bn(p["b2"], p["g2"], p["be2"], p["m2"], p["v2"], 2, eps),
        t3=_phase_conv_matrix(p["w3"], 2),
        ss3=_fold_bn(p["b3"], p["g3"], p["be3"], p["m3"], p["v3"], 1, eps),
        wh=wh,
        bh=p["b_head"].reshape(1, n_out).astype(jnp.float32),
    )


# ------------------------------ forward pass ------------------------------- #

def dqn_forward(x_nchw, kp):
    """x_nchw: [B, 3, H, W] float32 (PyTorch layout); kp: prepare_kernel_params()."""
    b, c, h0, w0 = x_nchw.shape
    gh, gw = -(-h0 // PHASE0), -(-w0 // PHASE0)
    h1, w1 = conv2d_size_out(h0), conv2d_size_out(w0)
    h2, w2 = conv2d_size_out(h1), conv2d_size_out(w1)
    h3, w3 = conv2d_size_out(h2), conv2d_size_out(w2)
    assert min(h3, w3) >= 1, "input too small for three stride-2 5x5 convs"

    # --- static correctness invariants of the coarse-grid (polyphase) scheme ---
    # (1) A VALID stride-2 conv's valid outputs only ever read valid inputs, so
    #     garbage margin entries / cross-batch row bleed never reach valid data.
    for din, dout in ((h0, h1), (h1, h2), (h2, h3), (w0, w1), (w1, w2), (w2, w3)):
        assert STRIDE * (dout - 1) + KSIZE <= din
    # (2) The common coarse grid covers every layer's valid extent.
    assert h1 <= 4 * gh and w1 <= 4 * gw and h2 <= 2 * gh and w2 <= 2 * gw
    assert h3 <= gh and w3 <= gw

    n_rows = b * gh * gw
    work_rows = _round_up(n_rows, 8)

    # Largest coarse-grid row shift over ALL conv layers AND the head.
    nds = [_n_delta(8), _n_delta(4), _n_delta(2)]
    max_shift = max((nd - 1) * (gw + 1) for nd in nds)
    max_shift = max(max_shift, (h3 - 1) * gw + (w3 - 1))
    rows_pad = work_rows + _round_up(max_shift, 8)
    # (3) Every shifted full-height read stays inside the padded scratch.
    assert rows_pad >= n_rows + max_shift and rows_pad % 8 == 0
    assert rows_pad >= work_rows + max_shift

    # (4) Weight packing is consistent with the kernel's static unroll.
    assert kp["t1"].shape == (PHASE0 * PHASE0 * c, nds[0] ** 2 * kp["ss1"].shape[1])
    assert kp["t2"].shape == (kp["ss1"].shape[1], nds[1] ** 2 * kp["ss2"].shape[1])
    assert kp["t3"].shape == (kp["ss2"].shape[1], nds[2] ** 2 * kp["ss3"].shape[1])
    assert kp["wh"].shape[0] == h3 * w3 and kp["wh"].shape[1] == kp["ss3"].shape[1]

    # Space-to-depth by 8 (single XLA transpose): [B,3,H,W] -> [rows_pad, 8*8*3],
    # last dim packed as (phase_h, phase_w, channel); padded rows are zero.
    x = jnp.transpose(x_nchw, (0, 2, 3, 1))
    x = jnp.pad(x, ((0, 0), (0, gh * PHASE0 - h0), (0, gw * PHASE0 - w0), (0, 0)))
    x = x.reshape(b, gh, PHASE0, gw, PHASE0, c)
    x = jnp.transpose(x, (0, 1, 3, 2, 4, 5)).reshape(n_rows, PHASE0 * PHASE0 * c)
    x = jnp.pad(x, ((0, rows_pad - n_rows), (0, 0)))

    d1, d2, d3 = kp["ss1"].shape[1], kp["ss2"].shape[1], kp["ss3"].shape[1]
    zw = max(kp["t1"].shape[1], kp["t2"].shape[1], kp["t3"].shape[1])
    n_out = kp["wh"].shape[-1]

    kernel = functools.partial(
        _dqn_kernel, work_rows=work_rows, rows_pad=rows_pad, gw=gw,
        grid_cells=gh * gw, batch=b, h3=h3, w3=w3)

    operands = (x, kp["t1"], kp["ss1"], kp["t2"], kp["ss2"], kp["t3"], kp["ss3"],
                kp["wh"], kp["bh"])
    flops = 2 * rows_pad * sum(int(kp[k].shape[0]) * int(kp[k].shape[1])
                               for k in ("t1", "t2", "t3"))
    flops += 2 * work_rows * h3 * w3 * d3 * n_out
    bytes_accessed = sum(int(a.size) * a.dtype.itemsize for a in operands)
    bytes_accessed += b * n_out * 4

    vmem = pl.BlockSpec(memory_space=pltpu.MemorySpace.VMEM)
    return pl.pallas_call(
        kernel,
        out_shape=jax.ShapeDtypeStruct((b, n_out), jnp.float32),
        in_specs=[vmem] * 9,
        out_specs=vmem,
        scratch_shapes=[
            pltpu.VMEM((rows_pad, zw), jnp.float32),   # wide-matmul result Z
            pltpu.VMEM((rows_pad, d1), jnp.float32),   # layer-1 activations
            pltpu.VMEM((rows_pad, d2), jnp.float32),   # layer-2 activations
            pltpu.VMEM((rows_pad, d3), jnp.float32),   # layer-3 activations
        ],
        cost_estimate=pl.CostEstimate(flops=flops, transcendentals=0,
                                      bytes_accessed=bytes_accessed),
    )(*operands)


# ------------------------ pure-JAX reference checks ------------------------ #

def reference_forward(x, params, eps=1e-5, weight_dtype=jnp.float32):
    """Pure-JAX reference.  weight_dtype=bfloat16 reproduces the kernel's
    bf16-weight / bf16-MXU-input arithmetic (f32 accumulation) for a tight
    structural check; weight_dtype=float32 is the exact PyTorch-module math."""
    def cbr(x, w, b, g, be, m, v):
        y = lax.conv_general_dilated(
            x.astype(weight_dtype), w.astype(weight_dtype), (STRIDE, STRIDE),
            "VALID", dimension_numbers=("NCHW", "OIHW", "NCHW"),
            preferred_element_type=jnp.float32,
            precision=lax.Precision.HIGHEST) + b[None, :, None, None]
        y = (y - m[None, :, None, None]) / jnp.sqrt(v[None, :, None, None] + eps)
        y = y * g[None, :, None, None] + be[None, :, None, None]
        return jnp.maximum(y, 0.0)

    p = params
    x = cbr(x, p["w1"], p["b1"], p["g1"], p["be1"], p["m1"], p["v1"])
    x = cbr(x, p["w2"], p["b2"], p["g2"], p["be2"], p["m2"], p["v2"])
    x = cbr(x, p["w3"], p["b3"], p["g3"], p["be3"], p["m3"], p["v3"])
    flat = x.reshape(x.shape[0], -1)
    return jnp.dot(flat, p["w_head"].T,
                   precision=lax.Precision.HIGHEST) + p["b_head"]


# --------------------------------- main ------------------------------------ #

def init_params(key, h, w, outputs):
    convw = conv2d_size_out(conv2d_size_out(conv2d_size_out(w)))
    convh = conv2d_size_out(conv2d_size_out(conv2d_size_out(h)))
    linear_in = convw * convh * 32

    ks = jax.random.split(key, 16)
    n = lambda k, s: (0.1 * jax.random.normal(k, s)).astype(jnp.float32)

    def bn(k, c):
        k1, k2, k3, k4 = jax.random.split(k, 4)
        return (1.0 + 0.1 * jax.random.normal(k1, (c,)).astype(jnp.float32),
                0.1 * jax.random.normal(k2, (c,)).astype(jnp.float32),
                0.1 * jax.random.normal(k3, (c,)).astype(jnp.float32),
                1.0 + 0.1 * jnp.abs(jax.random.normal(k4, (c,))).astype(jnp.float32))

    g1, be1, m1, v1 = bn(ks[6], 16)
    g2, be2, m2, v2 = bn(ks[7], 32)
    g3, be3, m3, v3 = bn(ks[8], 32)
    return dict(
        w1=n(ks[0], (16, 3, 5, 5)),  b1=n(ks[1], (16,)),
        w2=n(ks[2], (32, 16, 5, 5)), b2=n(ks[3], (32,)),
        w3=n(ks[4], (32, 32, 5, 5)), b3=n(ks[5], (32,)),
        g1=g1, be1=be1, m1=m1, v1=v1,
        g2=g2, be2=be2, m2=m2, v2=v2,
        g3=g3, be3=be3, m3=m3, v3=v3,
        w_head=n(ks[9], (outputs, linear_in)), b_head=n(ks[10], (outputs,)),
    )


if __name__ == "__main__":
    key = jax.random.PRNGKey(0)
    k_x, k_p = jax.random.split(key)

    B, H, W, OUT = 2, 40, 40, 4      # conv stack: 40 -> 18 -> 7 -> 2 ; linear_in = 2*2*32
    x = jax.random.normal(k_x, (B, 3, H, W), dtype=jnp.float32)
    params = init_params(k_p, H, W, OUT)

    # One-time weight repacking (delta-concatenated block-Toeplitz matrices in
    # bf16, folded BN scale/shift, per-position head blocks).
    kparams = prepare_kernel_params(params, H, W)

    fwd = jax.jit(dqn_forward)
    q = jax.block_until_ready(fwd(x, kparams))
    assert q.shape == (B, OUT)
    assert bool(jnp.all(jnp.isfinite(q)))

    # Structural check: reference using the same bf16-rounded weights and bf16
    # MXU inputs with f32 accumulation (tight tolerance).
    q_struct = reference_forward(x, params, weight_dtype=WEIGHT_DTYPE)
    assert jnp.allclose(q, q_struct, rtol=2e-3, atol=2e-3), \
        "mismatch vs quantization-aware JAX reference"

    # Fidelity check vs the exact f32 PyTorch-equivalent module (bf16 weight /
    # activation rounding is the only source of difference).
    tol = 1e-3 if WEIGHT_DTYPE == jnp.float32 else 5e-2
    q_f32 = reference_forward(x, params, weight_dtype=jnp.float32)
    assert jnp.allclose(q, q_f32, rtol=tol, atol=tol), "mismatch vs f32 reference"

    print("KERNEL_OK")
</pallas_src>

<mosaic_0001>
module attributes {stable_mosaic.version = 11 : i64} {
  func.func @_dqn_kernel(%arg0: memref<72x192xf32, #tpu.memory_space<vmem>>, %arg1: memref<192x1024xbf16, #tpu.memory_space<vmem>>, %arg2: memref<2x256xf32, #tpu.memory_space<vmem>>, %arg3: memref<256x512xbf16, #tpu.memory_space<vmem>>, %arg4: memref<2x128xf32, #tpu.memory_space<vmem>>, %arg5: memref<128x288xbf16, #tpu.memory_space<vmem>>, %arg6: memref<2x32xf32, #tpu.memory_space<vmem>>, %arg7: memref<4x32x4xf32, #tpu.memory_space<vmem>>, %arg8: memref<1x4xf32, #tpu.memory_space<vmem>>, %arg9: memref<2x4xf32, #tpu.memory_space<vmem>>, %arg10: memref<72x1024xf32, #tpu.memory_space<vmem>>, %arg11: memref<72x256xf32, #tpu.memory_space<vmem>>, %arg12: memref<72x128xf32, #tpu.memory_space<vmem>>, %arg13: memref<72x32xf32, #tpu.memory_space<vmem>>) attributes {dimension_semantics = [], scalar_prefetch = 0 : i64, scratch_operands = 4 : i64, tpu.core_type = #tpu.core_type<tc>} {
    %cst = arith.constant 0.000000e+00 : f32
    %0 = vector.broadcast %cst : f32 to vector<16x256xf32>
    %c56 = arith.constant 56 : index
    %c0 = arith.constant 0 : index
    %1 = vector.load %arg11[%c56, %c0] : memref<72x256xf32, #tpu.memory_space<vmem>>, vector<16x256xf32>
    tpu.vector_store %arg11[%c56, %c0], %0 {strides = array<i32>} : memref<72x256xf32, #tpu.memory_space<vmem>>, vector<16x256xf32>,
    %cst_0 = arith.constant 0.000000e+00 : f32
    %2 = vector.broadcast %cst_0 : f32 to vector<16x128xf32>
    %c56_1 = arith.constant 56 : index
    %c0_2 = arith.constant 0 : index
    %3 = vector.load %arg12[%c56_1, %c0_2] : memref<72x128xf32, #tpu.memory_space<vmem>>, vector<16x128xf32>
    tpu.vector_store %arg12[%c56_1, %c0_2], %2 {strides = array<i32>} : memref<72x128xf32, #tpu.memory_space<vmem>>, vector<16x128xf32>,
    %cst_3 = arith.constant 0.000000e+00 : f32
    %4 = vector.broadcast %cst_3 : f32 to vector<16x32xf32>
    %c56_4 = arith.constant 56 : index
    %c0_5 = arith.constant 0 : index
    %5 = vector.load %arg13[%c56_4, %c0_5] : memref<72x32xf32, #tpu.memory_space<vmem>>, vector<16x32xf32>
    tpu.vector_store %arg13[%c56_4, %c0_5], %4 {strides = array<i32>} : memref<72x32xf32, #tpu.memory_space<vmem>>, vector<16x32xf32>,
    %c0_6 = arith.constant 0 : index
    %c0_7 = arith.constant 0 : index
    %6 = vector.load %arg0[%c0_6, %c0_7] : memref<72x192xf32, #tpu.memory_space<vmem>>, vector<72x192xf32>
    %7 = arith.truncf %6 : vector<72x192xf32> to vector<72x192xbf16>
    %c0_8 = arith.constant 0 : index
    %c0_9 = arith.constant 0 : index
    %8 = vector.load %arg1[%c0_8, %c0_9] : memref<192x1024xbf16, #tpu.memory_space<vmem>>, vector<192x1024xbf16>
    %cst_10 = arith.constant dense<0.000000e+00> : vector<72x1024xf32>
    %9 = tpu.matmul %7, %8, %cst_10 {dimension_numbers = #tpu.dot_dimension_numbers<[1], [0], [0], [1], [0, 0, 1, 1], [], []>} : vector<72x192xbf16>, vector<192x1024xbf16>, vector<72x1024xf32> -> vector<72x1024xf32>
    %c0_11 = arith.constant 0 : index
    %c0_12 = arith.constant 0 : index
    %10 = vector.load %arg10[%c0_11, %c0_12] : memref<72x1024xf32, #tpu.memory_space<vmem>>, vector<72x1024xf32>
    tpu.vector_store %arg10[%c0_11, %c0_12], %9 {strides = array<i32>} : memref<72x1024xf32, #tpu.memory_space<vmem>>, vector<72x1024xf32>,
    %c0_13 = arith.constant 0 : index
    %c0_14 = arith.constant 0 : index
    %11 = vector.load %arg10[%c0_13, %c0_14] : memref<72x1024xf32, #tpu.memory_space<vmem>>, vector<56x256xf32>
    %c1 = arith.constant 1 : index
    %c256 = arith.constant 256 : index
    %12 = vector.load %arg10[%c1, %c256] : memref<72x1024xf32, #tpu.memory_space<vmem>>, vector<56x256xf32>
    %13 = arith.addf %11, %12 : vector<56x256xf32>
    %c5 = arith.constant 5 : index
    %c512 = arith.constant 512 : index
    %14 = vector.load %arg10[%c5, %c512] : memref<72x1024xf32, #tpu.memory_space<vmem>>, vector<56x256xf32>
    %15 = arith.addf %13, %14 : vector<56x256xf32>
    %c6 = arith.constant 6 : index
    %c768 = arith.constant 768 : index
    %16 = vector.load %arg10[%c6, %c768] : memref<72x1024xf32, #tpu.memory_space<vmem>>, vector<56x256xf32>
    %17 = arith.addf %15, %16 : vector<56x256xf32>
    %c0_15 = arith.constant 0 : index
    %c0_16 = arith.constant 0 : index
    %18 = vector.load %arg2[%c0_15, %c0_16] : memref<2x256xf32, #tpu.memory_space<vmem>>, vector<1x256xf32>
    %19 = vector.broadcast %18 : vector<1x256xf32> to vector<56x256xf32>
    %20 = arith.mulf %17, %19 : vector<56x256xf32>
    %c1_17 = arith.constant 1 : index
    %c0_18 = arith.constant 0 : index
    %21 = vector.load %arg2[%c1_17, %c0_18] : memref<2x256xf32, #tpu.memory_space<vmem>>, vector<1x256xf32>
    %22 = vector.broadcast %21 : vector<1x256xf32> to vector<56x256xf32>
    %23 = arith.addf %20, %22 : vector<56x256xf32>
    %cst_19 = arith.constant 0.000000e+00 : f32
    %24 = vector.broadcast %cst_19 : f32 to vector<56x256xf32>
    %25 = arith.maximumf %23, %24 : vector<56x256xf32>
    %c0_20 = arith.constant 0 : index
    %c0_21 = arith.constant 0 : index
    %26 = vector.load %arg11[%c0_20, %c0_21] : memref<72x256xf32, #tpu.memory_space<vmem>>, vector<56x256xf32>
    tpu.vector_store %arg11[%c0_20, %c0_21], %25 {strides = array<i32>} : memref<72x256xf32, #tpu.memory_space<vmem>>, vector<56x256xf32>,
    %c0_22 = arith.constant 0 : index
    %c0_23 = arith.constant 0 : index
    %27 = vector.load %arg11[%c0_22, %c0_23] : memref<72x256xf32, #tpu.memory_space<vmem>>, vector<72x256xf32>
    %28 = arith.truncf %27 : vector<72x256xf32> to vector<72x256xbf16>
    %c0_24 = arith.constant 0 : index
    %c0_25 = arith.constant 0 : index
    %29 = vector.load %arg3[%c0_24, %c0_25] : memref<256x512xbf16, #tpu.memory_space<vmem>>, vector<256x512xbf16>
    %cst_26 = arith.constant dense<0.000000e+00> : vector<72x512xf32>
    %30 = tpu.matmul %28, %29, %cst_26 {dimension_numbers = #tpu.dot_dimension_numbers<[1], [0], [0], [1], [0, 0, 1, 1], [], []>} : vector<72x256xbf16>, vector<256x512xbf16>, vector<72x512xf32> -> vector<72x512xf32>
    %c0_27 = arith.constant 0 : index
    %c0_28 = arith.constant 0 : index
    %31 = vector.load %arg10[%c0_27, %c0_28] : memref<72x1024xf32, #tpu.memory_space<vmem>>, vector<72x512xf32>
    tpu.vector_store %arg10[%c0_27, %c0_28], %30 {strides = array<i32>} : memref<72x1024xf32, #tpu.memory_space<vmem>>, vector<72x512xf32>,
    %c0_29 = arith.constant 0 : index
    %c0_30 = arith.constant 0 : index
    %32 = vector.load %arg10[%c0_29, %c0_30] : memref<72x1024xf32, #tpu.memory_space<vmem>>, vector<56x128xf32>
    %c1_31 = arith.constant 1 : index
    %c128 = arith.constant 128 : index
    %33 = vector.load %arg10[%c1_31, %c128] : memref<72x1024xf32, #tpu.memory_space<vmem>>, vector<56x128xf32>
    %34 = arith.addf %32, %33 : vector<56x128xf32>
    %c5_32 = arith.constant 5 : index
    %c256_33 = arith.constant 256 : index
    %35 = vector.load %arg10[%c5_32, %c256_33] : memref<72x1024xf32, #tpu.memory_space<vmem>>, vector<56x128xf32>
    %36 = arith.addf %34, %35 : vector<56x128xf32>
    %c6_34 = arith.constant 6 : index
    %c384 = arith.constant 384 : index
    %37 = vector.load %arg10[%c6_34, %c384] : memref<72x1024xf32, #tpu.memory_space<vmem>>, vector<56x128xf32>
    %38 = arith.addf %36, %37 : vector<56x128xf32>
    %c0_35 = arith.constant 0 : index
    %c0_36 = arith.constant 0 : index
    %39 = vector.load %arg4[%c0_35, %c0_36] : memref<2x128xf32, #tpu.memory_space<vmem>>, vector<1x128xf32>
    %40 = vector.broadcast %39 : vector<1x128xf32> to vector<56x128xf32>
    %41 = arith.mulf %38, %40 : vector<56x128xf32>
    %c1_37 = arith.constant 1 : index
    %c0_38 = arith.constant 0 : index
    %42 = vector.load %arg4[%c1_37, %c0_38] : memref<2x128xf32, #tpu.memory_space<vmem>>, vector<1x128xf32>
    %43 = vector.broadcast %42 : vector<1x128xf32> to vector<56x128xf32>
    %44 = arith.addf %41, %43 : vector<56x128xf32>
    %cst_39 = arith.constant 0.000000e+00 : f32
    %45 = vector.broadcast %cst_39 : f32 to vector<56x128xf32>
    %46 = arith.maximumf %44, %45 : vector<56x128xf32>
    %c0_40 = arith.constant 0 : index
    %c0_41 = arith.constant 0 : index
    %47 = vector.load %arg12[%c0_40, %c0_41] : memref<72x128xf32, #tpu.memory_space<vmem>>, vector<56x128xf32>
    tpu.vector_store %arg12[%c0_40, %c0_41], %46 {strides = array<i32>} : memref<72x128xf32, #tpu.memory_space<vmem>>, vector<56x128xf32>,
    %c0_42 = arith.constant 0 : index
    %c0_43 = arith.constant 0 : index
    %48 = vector.load %arg12[%c0_42, %c0_43] : memref<72x128xf32, #tpu.memory_space<vmem>>, vector<72x128xf32>
    %49 = arith.truncf %48 : vector<72x128xf32> to vector<72x128xbf16>
    %c0_44 = arith.constant 0 : index
    %c0_45 = arith.constant 0 : index
    %50 = vector.load %arg5[%c0_44, %c0_45] : memref<128x288xbf16, #tpu.memory_space<vmem>>, vector<128x288xbf16>
    %cst_46 = arith.constant dense<0.000000e+00> : vector<72x288xf32>
    %51 = tpu.matmul %49, %50, %cst_46 {dimension_numbers = #tpu.dot_dimension_numbers<[1], [0], [0], [1], [0, 0, 1, 1], [], []>} : vector<72x128xbf16>, vector<128x288xbf16>, vector<72x288xf32> -> vector<72x288xf32>
    %c0_47 = arith.constant 0 : index
    %c0_48 = arith.constant 0 : index
    %52 = vector.load %arg10[%c0_47, %c0_48] : memref<72x1024xf32, #tpu.memory_space<vmem>>, vector<72x288xf32>
    tpu.vector_store %arg10[%c0_47, %c0_48], %51 {strides = array<i32>} : memref<72x1024xf32, #tpu.memory_space<vmem>>, vector<72x288xf32>,
    %c0_49 = arith.constant 0 : index
    %c0_50 = arith.constant 0 : index
    %53 = vector.load %arg10[%c0_49, %c0_50] : memref<72x1024xf32, #tpu.memory_space<vmem>>, vector<56x32xf32>
    %c1_51 = arith.constant 1 : index
    %c32 = arith.constant 32 : index
    %54 = vector.load %arg10[%c1_51, %c32] : memref<72x1024xf32, #tpu.memory_space<vmem>>, vector<56x32xf32>
    %55 = arith.addf %53, %54 : vector<56x32xf32>
    %c2 = arith.constant 2 : index
    %c64 = arith.constant 64 : index
    %56 = vector.load %arg10[%c2, %c64] : memref<72x1024xf32, #tpu.memory_space<vmem>>, vector<56x32xf32>
    %57 = arith.addf %55, %56 : vector<56x32xf32>
    %c5_52 = arith.constant 5 : index
    %c96 = arith.constant 96 : index
    %58 = vector.load %arg10[%c5_52, %c96] : memref<72x1024xf32, #tpu.memory_space<vmem>>, vector<56x32xf32>
    %59 = arith.addf %57, %58 : vector<56x32xf32>
    %c6_53 = arith.constant 6 : index
    %c128_54 = arith.constant 128 : index
    %60 = vector.load %arg10[%c6_53, %c128_54] : memref<72x1024xf32, #tpu.memory_space<vmem>>, vector<56x32xf32>
    %61 = arith.addf %59, %60 : vector<56x32xf32>
    %c7 = arith.constant 7 : index
    %c160 = arith.constant 160 : index
    %62 = vector.load %arg10[%c7, %c160] : memref<72x1024xf32, #tpu.memory_space<vmem>>, vector<56x32xf32>
    %63 = arith.addf %61, %62 : vector<56x32xf32>
    %c10 = arith.constant 10 : index
    %c192 = arith.constant 192 : index
    %64 = vector.load %arg10[%c10, %c192] : memref<72x1024xf32, #tpu.memory_space<vmem>>, vector<56x32xf32>
    %65 = arith.addf %63, %64 : vector<56x32xf32>
    %c11 = arith.constant 11 : index
    %c224 = arith.constant 224 : index
    %66 = vector.load %arg10[%c11, %c224] : memref<72x1024xf32, #tpu.memory_space<vmem>>, vector<56x32xf32>
    %67 = arith.addf %65, %66 : vector<56x32xf32>
    %c12 = arith.constant 12 : index
    %c256_55 = arith.constant 256 : index
    %68 = vector.load %arg10[%c12, %c256_55] : memref<72x1024xf32, #tpu.memory_space<vmem>>, vector<56x32xf32>
    %69 = arith.addf %67, %68 : vector<56x32xf32>
    %c0_56 = arith.constant 0 : index
    %c0_57 = arith.constant 0 : index
    %70 = vector.load %arg6[%c0_56, %c0_57] : memref<2x32xf32, #tpu.memory_space<vmem>>, vector<1x32xf32>
    %71 = vector.broadcast %70 : vector<1x32xf32> to vector<56x32xf32>
    %72 = arith.mulf %69, %71 : vector<56x32xf32>
    %c1_58 = arith.constant 1 : index
    %c0_59 = arith.constant 0 : index
    %73 = vector.load %arg6[%c1_58, %c0_59] : memref<2x32xf32, #tpu.memory_space<vmem>>, vector<1x32xf32>
    %74 = vector.broadcast %73 : vector<1x32xf32> to vector<56x32xf32>
    %75 = arith.addf %72, %74 : vector<56x32xf32>
    %cst_60 = arith.constant 0.000000e+00 : f32
    %76 = vector.broadcast %cst_60 : f32 to vector<56x32xf32>
    %77 = arith.maximumf %75, %76 : vector<56x32xf32>
    %c0_61 = arith.constant 0 : index
    %c0_62 = arith.constant 0 : index
    %78 = vector.load %arg13[%c0_61, %c0_62] : memref<72x32xf32, #tpu.memory_space<vmem>>, vector<56x32xf32>
    tpu.vector_store %arg13[%c0_61, %c0_62], %77 {strides = array<i32>} : memref<72x32xf32, #tpu.memory_space<vmem>>, vector<56x32xf32>,
    %c0_63 = arith.constant 0 : index
    %c0_64 = arith.constant 0 : index
    %79 = vector.load %arg13[%c0_63, %c0_64] : memref<72x32xf32, #tpu.memory_space<vmem>>, vector<56x32xf32>
    %c0_65 = arith.constant 0 : index
    %c0_66 = arith.constant 0 : index
    %c0_67 = arith.constant 0 : index
    %80 = vector.load %arg7[%c0_65, %c0_66, %c0_67] : memref<4x32x4xf32, #tpu.memory_space<vmem>>, vector<1x32x4xf32>
    %81 = vector.shape_cast %80 : vector<1x32x4xf32> to vector<32x4xf32>
    %cst_68 = arith.constant dense<0.000000e+00> : vector<56x4xf32>
    %82 = tpu.matmul %79, %81, %cst_68 {dimension_numbers = #tpu.dot_dimension_numbers<[1], [0], [0], [1], [0, 0, 1, 1], [], []>} : vector<56x32xf32>, vector<32x4xf32>, vector<56x4xf32> -> vector<56x4xf32>
    %c1_69 = arith.constant 1 : index
    %c0_70 = arith.constant 0 : index
    %83 = vector.load %arg13[%c1_69, %c0_70] : memref<72x32xf32, #tpu.memory_space<vmem>>, vector<56x32xf32>
    %c1_71 = arith.constant 1 : index
    %c0_72 = arith.constant 0 : index
    %c0_73 = arith.constant 0 : index
    %84 = vector.load %arg7[%c1_71, %c0_72, %c0_73] : memref<4x32x4xf32, #tpu.memory_space<vmem>>, vector<1x32x4xf32>
    %85 = vector.shape_cast %84 : vector<1x32x4xf32> to vector<32x4xf32>
    %cst_74 = arith.constant dense<0.000000e+00> : vector<56x4xf32>
    %86 = tpu.matmul %83, %85, %cst_74 {dimension_numbers = #tpu.dot_dimension_numbers<[1], [0], [0], [1], [0, 0, 1, 1], [], []>} : vector<56x32xf32>, vector<32x4xf32>, vector<56x4xf32> -> vector<56x4xf32>
    %87 = arith.addf %82, %86 : vector<56x4xf32>
    %c5_75 = arith.constant 5 : index
    %c0_76 = arith.constant 0 : index
    %88 = vector.load %arg13[%c5_75, %c0_76] : memref<72x32xf32, #tpu.memory_space<vmem>>, vector<56x32xf32>
    %c2_77 = arith.constant 2 : index
    %c0_78 = arith.constant 0 : index
    %c0_79 = arith.constant 0 : index
    %89 = vector.load %arg7[%c2_77, %c0_78, %c0_79] : memref<4x32x4xf32, #tpu.memory_space<vmem>>, vector<1x32x4xf32>
    %90 = vector.shape_cast %89 : vector<1x32x4xf32> to vector<32x4xf32>
    %cst_80 = arith.constant dense<0.000000e+00> : vector<56x4xf32>
    %91 = tpu.matmul %88, %90, %cst_80 {dimension_numbers = #tpu.dot_dimension_numbers<[1], [0], [0], [1], [0, 0, 1, 1], [], []>} : vector<56x32xf32>, vector<32x4xf32>, vector<56x4xf32> -> vector<56x4xf32>
    %92 = arith.addf %87, %91 : vector<56x4xf32>
    %c6_81 = arith.constant 6 : index
    %c0_82 = arith.constant 0 : index
    %93 = vector.load %arg13[%c6_81, %c0_82] : memref<72x32xf32, #tpu.memory_space<vmem>>, vector<56x32xf32>
    %c3 = arith.constant 3 : index
    %c0_83 = arith.constant 0 : index
    %c0_84 = arith.constant 0 : index
    %94 = vector.load %arg7[%c3, %c0_83, %c0_84] : memref<4x32x4xf32, #tpu.memory_space<vmem>>, vector<1x32x4xf32>
    %95 = vector.shape_cast %94 : vector<1x32x4xf32> to vector<32x4xf32>
    %cst_85 = arith.constant dense<0.000000e+00> : vector<56x4xf32>
    %96 = tpu.matmul %93, %95, %cst_85 {dimension_numbers = #tpu.dot_dimension_numbers<[1], [0], [0], [1], [0, 0, 1, 1], [], []>} : vector<56x32xf32>, vector<32x4xf32>, vector<56x4xf32> -> vector<56x4xf32>
    %97 = arith.addf %92, %96 : vector<56x4xf32>
    %98 = vector.extract_strided_slice %97 {offsets = [0, 0], sizes = [1, 4], strides = [1, 1]} : vector<56x4xf32> to vector<1x4xf32>
    %c0_86 = arith.constant 0 : index
    %c0_87 = arith.constant 0 : index
    %99 = vector.load %arg8[%c0_86, %c0_87] : memref<1x4xf32, #tpu.memory_space<vmem>>, vector<1x4xf32>
    %100 = arith.addf %98, %99 : vector<1x4xf32>
    %c0_88 = arith.constant 0 : index
    %c0_89 = arith.constant 0 : index
    %101 = vector.load %arg9[%c0_88, %c0_89] : memref<2x4xf32, #tpu.memory_space<vmem>>, vector<1x4xf32>
    tpu.vector_store %arg9[%c0_88, %c0_89], %100 {strides = array<i32>} : memref<2x4xf32, #tpu.memory_space<vmem>>, vector<1x4xf32>,
    %102 = vector.extract_strided_slice %97 {offsets = [25, 0], sizes = [1, 4], strides = [1, 1]} : vector<56x4xf32> to vector<1x4xf32>
    %c0_90 = arith.constant 0 : index
    %c0_91 = arith.constant 0 : index
    %103 = vector.load %arg8[%c0_90, %c0_91] : memref<1x4xf32, #tpu.memory_space<vmem>>, vector<1x4xf32>
    %104 = arith.addf %102, %103 : vector<1x4xf32>
    %c1_92 = arith.constant 1 : index
    %c0_93 = arith.constant 0 : index
    %105 = vector.load %arg9[%c1_92, %c0_93] : memref<2x4xf32, #tpu.memory_space<vmem>>, vector<1x4xf32>
    tpu.vector_store %arg9[%c1_92, %c0_93], %104 {strides = array<i32>} : memref<2x4xf32, #tpu.memory_space<vmem>>, vector<1x4xf32>,
    return
  }
}

</mosaic_0001>

<bundles_post_ra>
// kernel: dqn_forward.1
= control target key start
LH: loop header
LB: loop body
LE: loop exit
PB: predicated region body
PF: predicated region fallthrough
CT: control target
= control target key end

     0   :  { %vm647_vm0 = vcmask 523264   ;;  %s6665_s0 = inlined_call_operand.vmem [shape: f32[72,192], index: 0, kind: input, shape index: {}]   ;;  %s6666_s1 = inlined_call_operand.vmem [shape: bf16[192,1024], index: 1, kind: input, shape index: {}]   ;;  %s6667_s2 = inlined_call_operand.vmem [shape: f32[2,256], index: 2, kind: input, shape index: {}]   ;;  %s6668_s3 = inlined_call_operand.vmem [shape: bf16[256,512], index: 3, kind: input, shape index: {}]   ;;  %s6669_s4 = inlined_call_operand.vmem [shape: f32[2,128], index: 4, kind: input, shape index: {}]   ;;  %s6670_s5 = inlined_call_operand.vmem [shape: bf16[128,288], index: 5, kind: input, shape index: {}]   ;;  %s6671_s6 = inlined_call_operand.vmem [shape: f32[2,32], index: 6, kind: input, shape index: {}]   ;;  %s6672_s7 = inlined_call_operand.vmem [shape: f32[4,32,4], index: 7, kind: input, shape index: {}]   ;;  %s6673_s8 = inlined_call_operand.vmem [shape: f32[1,4], index: 8, kind: input, shape index: {}]   ;;  %s6674_s9 = inlined_call_operand.hbm [shape: f32[2,4], index: 9, kind: output, shape index: {}]  }
   0x1   :  { %v3748_v0 = vld [vmem:[%s6666_s1 + $0x1c0] sm:$0xf]  ;;  %v4395_v2 = vld [vmem:[%s6666_s1 + $0x1c4] sm:$0xf]  ;;  %v44_v43 = vld [vmem:[%s6665_s0 + $0x8] sm:$0xff] }
   0x2   :  { %v4399_v1 = vld [vmem:[%s6666_s1 + $0x1dc] sm:$0xf0]  ;;  %v3750_v4 = vld [vmem:[%s6666_s1 + $0x1e0] sm:$0xf0]  ;;  %v46_v44 = vld [vmem:[%s6665_s0 + $0x18] sm:$0xff] }
   0x3   :  { %v3749_v3 = vor.u32 %v4399_v1, %v3748_v0  ;;  %v4427_v5 = vld [vmem:[%s6666_s1 + $0x2c4] sm:$0xf]  ;;  %v3753_v7 = vor.u32 %v4395_v2, %v3750_v4  ;;  %v3716_v9 = vld [vmem:[%s6666_s1 + $0x180] sm:$0xf]  ;;  %v4738_v53 = vpack.c.bf16 %v46_v44, %v44_v43  ;;  %v3884_v61 = vld [vmem:[%s6666_s1 + $0x2c8] sm:$0xf] }
   0x4   :  { %v3878_v6 = vld [vmem:[%s6666_s1 + $0x2e0] sm:$0xf0]  ;;  %v4391_v10 = vld [vmem:[%s6666_s1 + $0x19c] sm:$0xf0]  ;;  %v4432_v0 = vld [vmem:[%s6666_s1 + $0x2e4] sm:$0xf0] }
   0x5   :  { %v3881_v8 = vor.u32 %v4427_v5, %v3878_v6  ;;  %v4387_v11 = vld [vmem:[%s6666_s1 + $0x184] sm:$0xf]  ;;  %663 = vmatpush.bf16.msra.mxu0 %v3749_v3  ;;  %v3717_v12 = vor.u32 %v4391_v10, %v3716_v9  ;;  %729 = vmatpush.bf16.msra.mxu2 %v3753_v7  ;;  %v3876_v18 = vld [vmem:[%s6666_s1 + $0x2c0] sm:$0xf]  ;;  %v3885_v3 = vor.u32 %v4432_v0, %v3884_v61  ;;  %v3756_v4 = vld [vmem:[%s6666_s1 + $0x1c8] sm:$0xf] }
   0x6   :  { %v3718_v13 = vld [vmem:[%s6666_s1 + $0x1a0] sm:$0xf0]  ;;  %v4431_v19 = vld [vmem:[%s6666_s1 + $0x2dc] sm:$0xf0]  ;;  %v4400_v5 = vld [vmem:[%s6666_s1 + $0x1e4] sm:$0xf0] }
   0x7   :  { %v4419_v14 = vld [vmem:[%s6666_s1 + $0x284] sm:$0xf]  ;;  %766 = vmatpush.bf16.msra.mxu3 %v3881_v8  ;;  %v3721_v16 = vor.u32 %v4387_v11, %v3718_v13  ;;  %v3684_v20 = vld [vmem:[%s6666_s1 + $0x140] sm:$0xf]  ;;  %v3877_v21 = vor.u32 %v4431_v19, %v3876_v18  ;;  %v3757_v8 = vor.u32 %v4400_v5, %v3756_v4  ;;  %v3852_v19 = vld [vmem:[%s6666_s1 + $0x288] sm:$0xf] }
   0x8   :  { %v3846_v15 = vld [vmem:[%s6666_s1 + $0x2a0] sm:$0xf0]  ;;  %v4383_v22 = vld [vmem:[%s6666_s1 + $0x15c] sm:$0xf0] }
   0x9   :  { %v3849_v17 = vor.u32 %v4419_v14, %v3846_v15  ;;  %v4379_v23 = vld [vmem:[%s6666_s1 + $0x144] sm:$0xf]  ;;  %v3844_v27 = vld [vmem:[%s6666_s1 + $0x280] sm:$0xf]  ;;  %664 = vmatpush.bf16.msra.mxu0 %v3717_v12  ;;  %700 = vmatpush.bf16.msra.mxu1 %v3877_v21  ;;  %v3685_v28 = vor.u32 %v4383_v22, %v3684_v20  ;;  %v3724_v14 = vld [vmem:[%s6666_s1 + $0x188] sm:$0xf] }
   0xa   :  { %v3686_v24 = vld [vmem:[%s6666_s1 + $0x160] sm:$0xf0]  ;;  %v4423_v29 = vld [vmem:[%s6666_s1 + $0x29c] sm:$0xf0]  ;;  %730 = vmatpush.bf16.msra.mxu2 %v3721_v16  ;;  %v4392_v15 = vld [vmem:[%s6666_s1 + $0x1a4] sm:$0xf0] }
   0xb   :  { %v4411_v25 = vld [vmem:[%s6666_s1 + $0x244] sm:$0xf]  ;;  %v3652_v30 = vld [vmem:[%s6666_s1 + $0x100] sm:$0xf]  ;;  %767 = vmatpush.bf16.msra.mxu3 %v3849_v17  ;;  %v3689_v32 = vor.u32 %v4379_v23, %v3686_v24  ;;  %v3845_v34 = vor.u32 %v4423_v29, %v3844_v27  ;;  %v4428_v17 = vld [vmem:[%s6666_s1 + $0x2cc] sm:$0xf]  ;;  %v3725_v18 = vor.u32 %v4392_v15, %v3724_v14 }
   0xc   :  { %v3814_v26 = vld [vmem:[%s6666_s1 + $0x260] sm:$0xf0]  ;;  %v4375_v31 = vld [vmem:[%s6666_s1 + $0x11c] sm:$0xf0]  ;;  %v4424_v20 = vld [vmem:[%s6666_s1 + $0x2a4] sm:$0xf0] }
   0xd   :  { %v3817_v33 = vor.u32 %v4411_v25, %v3814_v26  ;;  %v4371_v35 = vld [vmem:[%s6666_s1 + $0x104] sm:$0xf]  ;;  %v3812_v39 = vld [vmem:[%s6666_s1 + $0x240] sm:$0xf]  ;;  %665 = vmatpush.bf16.msra.mxu0 %v3685_v28  ;;  %701 = vmatpush.bf16.msra.mxu1 %v3845_v34  ;;  %v3653_v41 = vor.u32 %v4375_v31, %v3652_v30  ;;  %v45_v22 = vld [vmem:[%s6665_s0 + $0x10] sm:$0xff]  ;;  %v3853_v26 = vor.u32 %v4424_v20, %v3852_v19 }
   0xe   :  { %v3654_v36 = vld [vmem:[%s6666_s1 + $0x120] sm:$0xf0]  ;;  %v4415_v40 = vld [vmem:[%s6666_s1 + $0x25c] sm:$0xf0]  ;;  %731 = vmatpush.bf16.msra.mxu2 %v3689_v32  ;;  %v3886_v23 = vld [vmem:[%s6666_s1 + $0x2e8] sm:$0xf0] }
   0xf   :  { %v4403_v37 = vld [vmem:[%s6666_s1 + $0x204] sm:$0xf]  ;;  %v3813_v42 = vor.u32 %v4415_v40, %v3812_v39  ;;  %768 = vmatpush.bf16.msra.mxu3 %v3817_v33  ;;  %v3657_v45 = vor.u32 %v4371_v35, %v3654_v36  ;;  %v3620_v47 = vld [vmem:[%s6666_s1 + $0xc0] sm:$0xf]  ;;  %v4396_v24 = vld [vmem:[%s6666_s1 + $0x1cc] sm:$0xf] }
  0x10   :  { %v3782_v38 = vld [vmem:[%s6666_s1 + $0x220] sm:$0xf0]  ;;  %v4367_v48 = vld [vmem:[%s6666_s1 + $0xdc] sm:$0xf0]  ;;  %v3758_v25 = vld [vmem:[%s6666_s1 + $0x1e8] sm:$0xf0] }
  0x11   :  { %v3785_v46 = vor.u32 %v4403_v37, %v3782_v38  ;;  %v4363_v49 = vld [vmem:[%s6666_s1 + $0xc4] sm:$0xf]  ;;  %v3780_v51 = vld [vmem:[%s6666_s1 + $0x200] sm:$0xf]  ;;  %666 = vmatpush.bf16.msra.mxu0 %v3653_v41  ;;  %702 = vmatpush.bf16.msra.mxu1 %v3813_v42  ;;  %v3621_v54 = vor.u32 %v4367_v48, %v3620_v47 }
  0x12   :  { %v3622_v50 = vld [vmem:[%s6666_s1 + $0xe0] sm:$0xf0]  ;;  %v4407_v52 = vld [vmem:[%s6666_s1 + $0x21c] sm:$0xf0]  ;;  %732 = vmatpush.bf16.msra.mxu2 %v3657_v45 }
  0x13   :  { %769 = vmatpush.bf16.msra.mxu3 %v3785_v46  ;;  %v3625_v55 = vor.u32 %v4363_v49, %v3622_v50  ;;  %v3781_v56 = vor.u32 %v4407_v52, %v3780_v51  ;;  %v3588_v57 = vld [vmem:[%s6666_s1 + $0x80] sm:$0xf]  ;;  %v4355_v59 = vld [vmem:[%s6666_s1 + $0x84] sm:$0xf] }
  0x14   :  { %v4359_v58 = vld [vmem:[%s6666_s1 + $0x9c] sm:$0xf0]  ;;  %v3590_v60 = vld [vmem:[%s6666_s1 + $0xa0] sm:$0xf0] }
  0x15   :  { %667 = vmatpush.bf16.msra.mxu0 %v3621_v54  ;;  %v3589_v62 = vor.u32 %v4359_v58, %v3588_v57  ;;  %v3556_v63 = vld [vmem:[%s6666_s1 + $0x40] sm:$0xf]  ;;  %703 = vmatpush.bf16.msra.mxu1 %v3781_v56  ;;  %v3593_v1 = vor.u32 %v4355_v59, %v3590_v60  ;;  %v4347_v6 = vld [vmem:[%s6666_s1 + $0x44] sm:$0xf] }
  0x16   :  { %3911 = vmatmul.msk.bf16.vlgmr.msra.gmra.mxu3 %vm647_vm0, %v4738_v53  ;;  %733 = vmatpush.bf16.msra.mxu2 %v3625_v55  ;;  %v4351_v2 = vld [vmem:[%s6666_s1 + $0x5c] sm:$0xf0]  ;;  %v3558_v7 = vld [vmem:[%s6666_s1 + $0x60] sm:$0xf0] }
  0x17   :  { %v3524_v9 = vld [vmem:[%s6666_s1] sm:$0xf]  ;;  %832 = vmatpush.bf16.msrb.mxu3 %v3885_v3  ;;  %v3557_v11 = vor.u32 %v4351_v2, %v3556_v63  ;;  %v4339_v12 = vld [vmem:[%s6666_s1 + $0x4] sm:$0xf]  ;;  %v3561_v16 = vor.u32 %v4347_v6, %v3558_v7 }
  0x18   :  { %v4343_v10 = vld [vmem:[%s6666_s1 + $0x1c] sm:$0xf0]  ;;  %3906 = vmatmul.msk.bf16.vlgmr.msra.gmra.mxu1 %vm647_vm0, %v4738_v53  ;;  %v3526_v13 = vld [vmem:[%s6666_s1 + $0x20] sm:$0xf0] }
  0x19   :  { %668 = vmatpush.bf16.msra.mxu0 %v3589_v62  ;;  %795 = vmatpush.bf16.msrb.mxu1 %v3757_v8  ;;  %v43_v21 = vld [vmem:[%s6665_s0] sm:$0xff]  ;;  %v3525_v27 = vor.u32 %v4343_v10, %v3524_v9 }
  0x1a   :  { %734 = vmatpush.bf16.msra.mxu2 %v3593_v1 }
  0x1b   :  { %833 = vmatpush.bf16.msrb.mxu3 %v3853_v26 }
  0x1d   :  { %669 = vmatpush.bf16.msra.mxu0 %v3557_v11 }
  0x1e   :  { %14 = vsyncpa [#allocation7], 0  ;;  %735 = vmatpush.bf16.msra.mxu2 %v3561_v16  ;;  %v3529_v28 = vor.u32 %v4339_v12, %v3526_v13  ;;  %v48_v29 = vld [vmem:[%s6665_s0 + $0x28] sm:$0xff]  ;;  %v50_v30 = vld [vmem:[%s6665_s0 + $0x38] sm:$0xff]  ;;  %v3761_v31 = vor.u32 %v4396_v24, %v3758_v25  ;;  %796 = vmatpush.bf16.msrb.mxu1 %v3725_v18  ;;  %v3889_v32 = vor.u32 %v4428_v17, %v3886_v23  ;;  %vm1309_vm1 = vcmask 1046528   ;;  %s4573_s11 = smov [#allocation6]  }
  0x1f   :  { %v4388_v33 = vld [vmem:[%s6666_s1 + $0x18c] sm:$0xf]  ;;  %v4834_v35 = vpack.c.bf16 %v45_v22, %v43_v21  ;;  %v4842_v38 = vpack.c.bf16 %v50_v30, %v48_v29  ;;  %v3692_v43 = vld [vmem:[%s6666_s1 + $0x148] sm:$0xf]  ;;  %v47_v62 = vld [vmem:[%s6665_s0 + $0x20] sm:$0xff]  ;;  %vm1400_vm2 = vcmask 1042432  }
  0x20   :  { %v3726_v34 = vld [vmem:[%s6666_s1 + $0x1a8] sm:$0xf0]  ;;  %v4384_v44 = vld [vmem:[%s6666_s1 + $0x164] sm:$0xf0]  ;;  %v49_v63 = vld [vmem:[%s6665_s0 + $0x30] sm:$0xff]  ;;  %vm1491_vm3 = vcmask 1041408  }
  0x21   :  { %v4420_v36 = vld [vmem:[%s6666_s1 + $0x28c] sm:$0xf]  ;;  %670 = vmatpush.bf16.msra.mxu0 %v3525_v27  ;;  %v3729_v39 = vor.u32 %v4388_v33, %v3726_v34  ;;  %v3693_v46 = vor.u32 %v4384_v44, %v3692_v43  ;;  %v3660_v51 = vld [vmem:[%s6666_s1 + $0x108] sm:$0xf]  ;;  %v54_v1 = vld [vmem:[%s6665_s0 + $0x58] sm:$0xff]  ;;  %v4904_v3 = vpack.c.bf16 %v49_v63, %v47_v62  ;;  %vm40_vm4 = vcmask 261120  }
  0x22   :  { %v3854_v37 = vld [vmem:[%s6666_s1 + $0x2a8] sm:$0xf0]  ;;  %736 = vmatpush.bf16.msra.mxu2 %v3529_v28  ;;  %v4376_v55 = vld [vmem:[%s6666_s1 + $0x124] sm:$0xf0]  ;;  %v51_v22 = vld [vmem:[%s6665_s0 + $0x40] sm:$0xff]  ;;  %vm2869_vm5 = vcmask 1045504  }
  0x23   :  { %v3857_v40 = vor.u32 %v4420_v36, %v3854_v37  ;;  %v4380_v41 = vld [vmem:[%s6666_s1 + $0x14c] sm:$0xf]  ;;  %797 = vmatpush.bf16.msrb.mxu1 %v3693_v46  ;;  %v3820_v56 = vld [vmem:[%s6666_s1 + $0x248] sm:$0xf]  ;;  %v3661_v58 = vor.u32 %v4376_v55, %v3660_v51  ;;  %v53_v23 = vld [vmem:[%s6665_s0 + $0x50] sm:$0xff]  ;;  %vm3009_vm6 = vcmask 1040384  }
  0x24   :  { %v3694_v42 = vld [vmem:[%s6666_s1 + $0x168] sm:$0xf0]  ;;  %671 = vmatmul.bf16.vlgmr.msra.gmra.mxu0 %v4834_v35  ;;  %v4416_v57 = vld [vmem:[%s6666_s1 + $0x264] sm:$0xf0]  ;;  %v58_v26 = vld [vmem:[%s6665_s0 + $0x78] sm:$0xff]  ;;  %v4962_v27 = vpack.c.bf16 %v53_v23, %v51_v22  ;;  %vm3106_vm7 = vcmask 1044480  }
  0x25   :  { %861 = vmatpush.bf16.msrb.mxu0 %v3761_v31  ;;  %737 = vmatmul.bf16.vlgmr.msra.gmra.mxu2 %v4834_v35  ;;  %v3697_v45 = vor.u32 %v4380_v41, %v3694_v42  ;;  %v4372_v47 = vld [vmem:[%s6666_s1 + $0x10c] sm:$0xf]  ;;  %v3821_v59 = vor.u32 %v4416_v57, %v3820_v56  ;;  %v3628_v5 = vld [vmem:[%s6666_s1 + $0xc8] sm:$0xf]  ;;  %v57_v41 = vld [vmem:[%s6665_s0 + $0x70] sm:$0xff]  ;;  %vm3166_vm8 = vcmask 1043456  }
  0x26   :  { %898 = vmatpush.bf16.msrb.mxu2 %v3889_v32  ;;  %3912 = vmatmul.msk.bf16.gmra.mxu3 %vm647_vm0, %v4842_v38  ;;  %v3662_v48 = vld [vmem:[%s6666_s1 + $0x128] sm:$0xf0]  ;;  %v4368_v6 = vld [vmem:[%s6666_s1 + $0xe4] sm:$0xf0]  ;;  %v3894_v46 = vld [vmem:[%s6666_s1 + $0x2f0] sm:$0xf0] }
  0x27   :  { %v4412_v49 = vld [vmem:[%s6666_s1 + $0x24c] sm:$0xf]  ;;  %v3665_v52 = vor.u32 %v4372_v47, %v3662_v48  ;;  %798 = vmatpush.bf16.msrb.mxu1 %v3661_v58  ;;  %834 = vmatpush.bf16.msrb.mxu3 %v3821_v59  ;;  %v3629_v7 = vor.u32 %v4368_v6, %v3628_v5  ;;  %v3596_v10 = vld [vmem:[%s6666_s1 + $0x88] sm:$0xf]  ;;  %v3892_v48 = vld [vmem:[%s6666_s1 + $0x2d0] sm:$0xf] }
  0x28   :  { %3907 = vmatmul.msk.bf16.gmra.mxu1 %vm647_vm0, %v4842_v38  ;;  %v3822_v50 = vld [vmem:[%s6666_s1 + $0x268] sm:$0xf0]  ;;  %v4360_v12 = vld [vmem:[%s6666_s1 + $0xa4] sm:$0xf0]  ;;  %v4401_v55 = vld [vmem:[%s6666_s1 + $0x1ec] sm:$0xf0] }
  0x29   :  { %862 = vmatpush.bf16.msrb.mxu0 %v3729_v39  ;;  %v3825_v54 = vor.u32 %v4412_v49, %v3822_v50  ;;  %v4364_v60 = vld [vmem:[%s6666_s1 + $0xcc] sm:$0xf]  ;;  %v3597_v15 = vor.u32 %v4360_v12, %v3596_v10  ;;  %v3788_v17 = vld [vmem:[%s6666_s1 + $0x208] sm:$0xf]  ;;  %v4433_v49 = vld [vmem:[%s6666_s1 + $0x2ec] sm:$0xf0] }
  0x2a   :  { %899 = vmatpush.bf16.msrb.mxu2 %v3857_v40  ;;  %v3630_v61 = vld [vmem:[%s6666_s1 + $0xe8] sm:$0xf0]  ;;  %v4408_v18 = vld [vmem:[%s6666_s1 + $0x224] sm:$0xf0]  ;;  %v55_v40 = vld [vmem:[%s6665_s0 + $0x60] sm:$0xff]  ;;  %v3893_v51 = vor.u32 %v4433_v49, %v3892_v48  ;;  %vm3497_vm9 = vcmask 24576  }
  0x2b   :  { %v52_v0 = vld [vmem:[%s6665_s0 + $0x48] sm:$0xff]  ;;  %v3633_v2 = vor.u32 %v4364_v60, %v3630_v61  ;;  %799 = vmatpush.bf16.msrb.mxu1 %v3629_v7  ;;  %v3789_v20 = vor.u32 %v4408_v18, %v3788_v17  ;;  %v4999_v43 = vpack.c.bf16 %v57_v41, %v55_v40  ;;  %v4397_v50 = vld [vmem:[%s6666_s1 + $0x1d4] sm:$0xf]  ;;  %v59_v58 = vld [vmem:[%s6665_s0 + $0x80] sm:$0xff]  ;;  %s3511_s12 = sshll.u32 %s4573_s11, 4  ;;  %s3513_s15 = sshll.u32 %s6674_s9, 4  ;;  %s3512_s12 = int_to_ptr.vmem [resolvable:$true] %s3511_s12  ;;  %s3514_s15 = int_to_ptr.hbm [resolvable:$true] %s3513_s15 }
  0x2c   :  { %v4906_v4 = vpack.c.bf16 %v54_v1, %v52_v0  ;;  %v4356_v8 = vld [vmem:[%s6666_s1 + $0x8c] sm:$0xf]  ;;  %v3564_v19 = vld [vmem:[%s6666_s1 + $0x48] sm:$0xf]  ;;  %v5036_v59 = vpack.c.bf16 %v59_v58, %v59_v58  ;;  %v4389_v60 = vld [vmem:[%s6666_s1 + $0x194] sm:$0xf] }
  0x2d   :  { %863 = vmatpush.bf16.msrb.mxu0 %v3697_v45  ;;  %v3598_v9 = vld [vmem:[%s6666_s1 + $0xa8] sm:$0xf0]  ;;  %v4352_v21 = vld [vmem:[%s6666_s1 + $0x64] sm:$0xf0]  ;;  %835 = vmatpush.bf16.msrb.mxu3 %v3789_v20  ;;  %v4429_v45 = vld [vmem:[%s6666_s1 + $0x2d4] sm:$0xf] }
  0x2e   :  { %900 = vmatpush.bf16.msrb.mxu2 %v3825_v54  ;;  %v3601_v11 = vor.u32 %v4356_v8, %v3598_v9  ;;  %v4404_v13 = vld [vmem:[%s6666_s1 + $0x20c] sm:$0xf]  ;;  %v3565_v24 = vor.u32 %v4352_v21, %v3564_v19  ;;  %v3532_v31 = vld [vmem:[%s6666_s1 + $0x8] sm:$0xf]  ;;  %v3897_v47 = vor.u32 %v4429_v45, %v3894_v46  ;;  %v3764_v54 = vld [vmem:[%s6666_s1 + $0x1d0] sm:$0xf] }
  0x2f   :  { %v3790_v14 = vld [vmem:[%s6666_s1 + $0x228] sm:$0xf0]  ;;  %800 = vmatpush.bf16.msrb.mxu1 %v3597_v15  ;;  %v4344_v33 = vld [vmem:[%s6666_s1 + $0x24] sm:$0xf0]  ;;  %v3765_v57 = vor.u32 %v4401_v55, %v3764_v54  ;;  %v3734_v61 = vld [vmem:[%s6666_s1 + $0x1b0] sm:$0xf0] }
  0x30   :  { %v3793_v16 = vor.u32 %v4404_v13, %v3790_v14  ;;  %v56_v25 = vld [vmem:[%s6665_s0 + $0x68] sm:$0xff]  ;;  %v3533_v34 = vor.u32 %v4344_v33, %v3532_v31  ;;  %v4421_v62 = vld [vmem:[%s6666_s1 + $0x294] sm:$0xf]  ;;  %v3737_v63 = vor.u32 %v4389_v60, %v3734_v61  ;;  %v4393_v5 = vld [vmem:[%s6666_s1 + $0x1ac] sm:$0xf0]  ;;  %vm3504_vm10 = vcmask 25601  }
  0x31   :  { %864 = vmatpush.bf16.msrb.mxu0 %v3665_v52  ;;  %v4964_v28 = vpack.c.bf16 %v58_v26, %v56_v25  ;;  %v4348_v29 = vld [vmem:[%s6666_s1 + $0x4c] sm:$0xf]  ;;  %v3766_v52 = vld [vmem:[%s6666_s1 + $0x1f0] sm:$0xf0]  ;;  %964 = vmatpush.bf16.msra.mxu3 %v3893_v51  ;;  %v3860_v6 = vld [vmem:[%s6666_s1 + $0x290] sm:$0xf] }
  0x32   :  { %901 = vmatpush.bf16.msrb.mxu2 %v3793_v16  ;;  %v3566_v30 = vld [vmem:[%s6666_s1 + $0x68] sm:$0xf0]  ;;  %v3769_v56 = vor.u32 %v4397_v50, %v3766_v52  ;;  %v3862_v0 = vld [vmem:[%s6666_s1 + $0x2b0] sm:$0xf0]  ;;  %v4425_v8 = vld [vmem:[%s6666_s1 + $0x2ac] sm:$0xf0] }
  0x33   :  { %801 = vmatpush.bf16.msrb.mxu1 %v3565_v24  ;;  %v3569_v32 = vor.u32 %v4348_v29, %v3566_v30  ;;  %v4340_v36 = vld [vmem:[%s6666_s1 + $0xc] sm:$0xf]  ;;  %v3865_v1 = vor.u32 %v4421_v62, %v3862_v0  ;;  %v4381_v9 = vld [vmem:[%s6666_s1 + $0x154] sm:$0xf]  ;;  %v3700_v13 = vld [vmem:[%s6666_s1 + $0x150] sm:$0xf] }
  0x34   :  { %676 = vmatmul.bf16.gmra.mxu0 %v4904_v3  ;;  %v3534_v37 = vld [vmem:[%s6666_s1 + $0x28] sm:$0xf0]  ;;  %v3702_v10 = vld [vmem:[%s6666_s1 + $0x170] sm:$0xf0]  ;;  %v4385_v14 = vld [vmem:[%s6666_s1 + $0x16c] sm:$0xf0] }
  0x35   :  { %865 = vmatpush.bf16.msrb.mxu0 %v3633_v2  ;;  %742 = vmatmul.bf16.gmra.mxu2 %v4904_v3  ;;  %v3537_v39 = vor.u32 %v4340_v36, %v3534_v37  ;;  %v60_v42 = vld [vmem:[%s6665_s0 + $0x88] sm:$0xff]  ;;  %v3732_v2 = vld [vmem:[%s6666_s1 + $0x190] sm:$0xf]  ;;  %v3705_v12 = vor.u32 %v4381_v9, %v3702_v10  ;;  %v3701_v15 = vor.u32 %v4385_v14, %v3700_v13  ;;  %v4373_v16 = vld [vmem:[%s6666_s1 + $0x114] sm:$0xf] }
  0x36   :  { %3913 = vmatmul.msk.bf16.gmra.mxu3 %vm647_vm0, %v4906_v4  ;;  %v5001_v44 = vpack.c.bf16 %v60_v42, %v60_v42  ;;  %1030 = vmatpush.bf16.msra.mxu2 %v3897_v47  ;;  %v3733_v7 = vor.u32 %v4393_v5, %v3732_v2  ;;  %v3670_v17 = vld [vmem:[%s6666_s1 + $0x130] sm:$0xf0]  ;;  %v3668_v21 = vld [vmem:[%s6666_s1 + $0x110] sm:$0xf]  ;;  %v4430_v10 = vld [vmem:[%s6666_s1 + $0x2dc] sm:$0xf] }
  0x37   :  { %802 = vmatpush.bf16.msrb.mxu1 %v3533_v34  ;;  %v3673_v18 = vor.u32 %v4373_v16, %v3670_v17  ;;  %v4413_v19 = vld [vmem:[%s6666_s1 + $0x254] sm:$0xf]  ;;  %v4377_v23 = vld [vmem:[%s6666_s1 + $0x12c] sm:$0xf0] }
  0x38   :  { %3908 = vmatmul.msk.bf16.gmra.mxu1 %vm647_vm0, %v4906_v4  ;;  %v3830_v20 = vld [vmem:[%s6666_s1 + $0x270] sm:$0xf0]  ;;  %v3669_v24 = vor.u32 %v4377_v23, %v3668_v21  ;;  %v3828_v25 = vld [vmem:[%s6666_s1 + $0x250] sm:$0xf]  ;;  %v3774_v23 = vld [vmem:[%s6666_s1 + $0x1f8] sm:$0xf0] }
  0x39   :  { %866 = vmatpush.bf16.msrb.mxu0 %v3601_v11  ;;  %v3861_v11 = vor.u32 %v4425_v8, %v3860_v6  ;;  %v3833_v22 = vor.u32 %v4413_v19, %v3830_v20  ;;  %v4417_v26 = vld [vmem:[%s6666_s1 + $0x26c] sm:$0xf0]  ;;  %v4365_v29 = vld [vmem:[%s6666_s1 + $0xd4] sm:$0xf]  ;;  %v3900_v19 = vld [vmem:[%s6666_s1 + $0x2d8] sm:$0xf] }
  0x3a   :  { %1031 = vmatpush.bf16.msra.mxu2 %v3865_v1  ;;  %v3829_v30 = vor.u32 %v4417_v26, %v3828_v25  ;;  %v3638_v31 = vld [vmem:[%s6666_s1 + $0xf0] sm:$0xf0]  ;;  %v3636_v33 = vld [vmem:[%s6666_s1 + $0xd0] sm:$0xf]  ;;  %v4434_v20 = vld [vmem:[%s6666_s1 + $0x2f4] sm:$0xf0] }
  0x3b   :  { %927 = vmatpush.bf16.msra.mxu1 %v3765_v57  ;;  %965 = vmatpush.bf16.msra.mxu3 %v3861_v11  ;;  %v4369_v34 = vld [vmem:[%s6666_s1 + $0xec] sm:$0xf0]  ;;  %v4357_v37 = vld [vmem:[%s6666_s1 + $0x94] sm:$0xf]  ;;  %v3902_v11 = vld [vmem:[%s6666_s1 + $0x2f8] sm:$0xf0]  ;;  %v3901_v21 = vor.u32 %v4434_v20, %v3900_v19 }
  0x3c   :  { %v3637_v36 = vor.u32 %v4369_v34, %v3636_v33  ;;  %v3604_v41 = vld [vmem:[%s6666_s1 + $0x90] sm:$0xf]  ;;  %v4405_v52 = vld [vmem:[%s6666_s1 + $0x214] sm:$0xf]  ;;  %v3905_v13 = vor.u32 %v4430_v10, %v3902_v11  ;;  %v3772_v33 = vld [vmem:[%s6666_s1 + $0x1d8] sm:$0xf] }
  0x3d   :  { %867 = vmatpush.bf16.msrb.mxu0 %v3569_v32  ;;  %v3641_v32 = vor.u32 %v4365_v29, %v3638_v31  ;;  %v4361_v42 = vld [vmem:[%s6666_s1 + $0xac] sm:$0xf0]  ;;  %v3798_v54 = vld [vmem:[%s6666_s1 + $0x230] sm:$0xf0]  ;;  %v4402_v34 = vld [vmem:[%s6666_s1 + $0x1f4] sm:$0xf0] }
  0x3e   :  { %1032 = vmatpush.bf16.msra.mxu2 %v3833_v22  ;;  %v3605_v45 = vor.u32 %v4361_v42, %v3604_v41  ;;  %v3796_v46 = vld [vmem:[%s6666_s1 + $0x210] sm:$0xf]  ;;  %v3801_v55 = vor.u32 %v4405_v52, %v3798_v54  ;;  %v3574_v57 = vld [vmem:[%s6666_s1 + $0x70] sm:$0xf0]  ;;  %v4398_v22 = vld [vmem:[%s6666_s1 + $0x1dc] sm:$0xf] }
  0x3f   :  { %928 = vmatpush.bf16.msra.mxu1 %v3733_v7  ;;  %966 = vmatpush.bf16.msra.mxu3 %v3829_v30  ;;  %v4409_v47 = vld [vmem:[%s6666_s1 + $0x22c] sm:$0xf0]  ;;  %v4341_v2 = vld [vmem:[%s6666_s1 + $0x14] sm:$0xf]  ;;  %v3777_v25 = vor.u32 %v4398_v22, %v3774_v23  ;;  %v3740_v52 = vld [vmem:[%s6666_s1 + $0x198] sm:$0xf] }
  0x40   :  { %v3797_v48 = vor.u32 %v4409_v47, %v3796_v46  ;;  %v3572_v49 = vld [vmem:[%s6666_s1 + $0x50] sm:$0xf]  ;;  %v3542_v5 = vld [vmem:[%s6666_s1 + $0x30] sm:$0xf0]  ;;  %v4394_v54 = vld [vmem:[%s6666_s1 + $0x1b4] sm:$0xf0] }
  0x41   :  { %868 = vmatpush.bf16.msrb.mxu0 %v3537_v39  ;;  %v3606_v39 = vld [vmem:[%s6666_s1 + $0xb0] sm:$0xf0]  ;;  %v4353_v50 = vld [vmem:[%s6666_s1 + $0x6c] sm:$0xf0]  ;;  %v3545_v7 = vor.u32 %v4341_v2, %v3542_v5  ;;  %v4414_v19 = vld [vmem:[%s6666_s1 + $0x25c] sm:$0xf] }
  0x42   :  { %v3609_v40 = vor.u32 %v4357_v37, %v3606_v39  ;;  %v3573_v51 = vor.u32 %v4353_v50, %v3572_v49  ;;  %v3540_v58 = vld [vmem:[%s6666_s1 + $0x10] sm:$0xf]  ;;  %1033 = vmatpush.bf16.msra.mxu2 %v3801_v55  ;;  %v4390_v37 = vld [vmem:[%s6666_s1 + $0x19c] sm:$0xf]  ;;  %v3741_v55 = vor.u32 %v4394_v54, %v3740_v52  ;;  %v3676_v22 = vld [vmem:[%s6666_s1 + $0x118] sm:$0xf] }
  0x43   :  { %929 = vmatpush.bf16.msra.mxu1 %v3701_v15  ;;  %967 = vmatpush.bf16.msra.mxu3 %v3797_v48  ;;  %v4345_v62 = vld [vmem:[%s6666_s1 + $0x2c] sm:$0xf0]  ;;  %v3742_v39 = vld [vmem:[%s6666_s1 + $0x1b8] sm:$0xf0]  ;;  %v4378_v23 = vld [vmem:[%s6666_s1 + $0x134] sm:$0xf0] }
  0x44   :  { %681 = vmatmul.bf16.gmra.mxu0 %v4962_v27  ;;  %v3745_v41 = vor.u32 %v4390_v37, %v3742_v39  ;;  %v4422_v49 = vld [vmem:[%s6666_s1 + $0x29c] sm:$0xf] }
  0x45   :  { %747 = vmatmul.bf16.gmra.mxu2 %v4962_v27  ;;  %993 = vmatpush.bf16.msra.mxu0 %v3769_v56  ;;  %v4349_v56 = vld [vmem:[%s6666_s1 + $0x54] sm:$0xf]  ;;  %v3870_v50 = vld [vmem:[%s6666_s1 + $0x2b8] sm:$0xf0] }
  0x46   :  { %3914 = vmatmul.msk.bf16.gmra.mxu3 %vm647_vm0, %v4964_v28  ;;  %v3577_v61 = vor.u32 %v4349_v56, %v3574_v57  ;;  %v3868_v56 = vld [vmem:[%s6666_s1 + $0x298] sm:$0xf]  ;;  %v3838_v20 = vld [vmem:[%s6666_s1 + $0x278] sm:$0xf0] }
  0x47   :  { %930 = vmatpush.bf16.msra.mxu1 %v3669_v24  ;;  %v4426_v57 = vld [vmem:[%s6666_s1 + $0x2b4] sm:$0xf0]  ;;  %v3646_v39 = vld [vmem:[%s6666_s1 + $0xf8] sm:$0xf0] }
  0x48   :  { %3909 = vmatmul.msk.bf16.gmra.mxu1 %vm647_vm0, %v4964_v28  ;;  %v3614_v52 = vld [vmem:[%s6666_s1 + $0xb8] sm:$0xf0] }
  0x49   :  { %994 = vmatpush.bf16.msra.mxu0 %v3737_v63  ;;  %v3541_v63 = vor.u32 %v4345_v62, %v3540_v58  ;;  %v4382_v58 = vld [vmem:[%s6666_s1 + $0x15c] sm:$0xf] }
  0x4a   :  { %v3710_v62 = vld [vmem:[%s6666_s1 + $0x178] sm:$0xf0] }
  0x4b   :  { %931 = vmatpush.bf16.msra.mxu1 %v3637_v36  ;;  %v3773_v36 = vor.u32 %v4402_v34, %v3772_v33  ;;  %v4418_v33 = vld [vmem:[%s6666_s1 + $0x274] sm:$0xf0]  ;;  %v4366_v34 = vld [vmem:[%s6666_s1 + $0xdc] sm:$0xf] }
  0x4d   :  { %995 = vmatpush.bf16.msra.mxu0 %v3705_v12 }
  0x4f   :  { %932 = vmatpush.bf16.msra.mxu1 %v3605_v45 }
  0x51   :  { %996 = vmatpush.bf16.msra.mxu0 %v3673_v18 }
  0x53   :  { %933 = vmatpush.bf16.msra.mxu1 %v3573_v51  ;;  %v3873_v51 = vor.u32 %v4422_v49, %v3870_v50  ;;  %v4370_v49 = vld [vmem:[%s6666_s1 + $0xf4] sm:$0xf0] }
  0x54   :  { %686 = vmatmul.bf16.gmra.mxu0 %v4999_v43 }
  0x55   :  { %752 = vmatmul.bf16.gmra.mxu2 %v4999_v43  ;;  %997 = vmatpush.bf16.msra.mxu0 %v3641_v32 }
  0x56   :  { %3915 = vmatmul.msk.bf16.gmra.mxu3 %vm647_vm0, %v5001_v44 }
  0x57   :  { %934 = vmatpush.bf16.msra.mxu1 %v3541_v63  ;;  %v3713_v63 = vor.u32 %v4382_v58, %v3710_v62 }
  0x58   :  { %3910 = vmatmul.msk.bf16.gmra.mxu1 %vm647_vm0, %v5001_v44 }
  0x59   :  { %998 = vmatpush.bf16.msra.mxu0 %v3609_v40 }
  0x5d   :  { %999 = vmatpush.bf16.msra.mxu0 %v3577_v61  ;;  %v3869_v61 = vor.u32 %v4426_v57, %v3868_v56  ;;  %v4362_v56 = vld [vmem:[%s6666_s1 + $0xb4] sm:$0xf0] }
  0x61   :  { %1000 = vmatpush.bf16.msra.mxu0 %v3545_v7  ;;  %v3708_v7 = vld [vmem:[%s6666_s1 + $0x158] sm:$0xf] }
  0x64   :  { %691 = vmatmul.bf16.gmra.mxu0 %v5036_v59 }
  0x65   :  { %757 = vmatmul.bf16.gmra.mxu2 %v5036_v59 }
  0x66   :  { %3916 = vmatmul.msk.bf16.vlgmr.msrb.gmra.mxu3 %vm647_vm0, %v4738_v53 }
  0x67   :  { %1096 = vmatpush.bf16.msrb.mxu3 %v3901_v21  ;;  %v3841_v21 = vor.u32 %v4414_v19, %v3838_v20 }
  0x68   :  { %803 = vmatmul.bf16.vlgmr.msrb.gmra.mxu1 %v4834_v35 }
  0x69   :  { %1059 = vmatpush.bf16.msrb.mxu1 %v3773_v36 }
  0x6b   :  { %1097 = vmatpush.bf16.msrb.mxu3 %v3869_v61  ;;  %v4410_v61 = vld [vmem:[%s6666_s1 + $0x234] sm:$0xf0] }
  0x6d   :  { %1060 = vmatpush.bf16.msrb.mxu1 %v3741_v55  ;;  %v3612_v55 = vld [vmem:[%s6666_s1 + $0x98] sm:$0xf] }
  0x6e   :  { %v3613_v58 = vor.u32 %v4362_v56, %v3612_v55 }
  0x74   :  { %869 = vmatmul.bf16.vlgmr.msrb.gmra.mxu0 %v4834_v35 }
  0x75   :  { %3921 = vmatmul.msk.bf16.vlgmr.msrb.gmra.mxu2 %vm647_vm0, %v4738_v53  ;;  %1125 = vmatpush.bf16.msrb.mxu0 %v3777_v25  ;;  %v3677_v25 = vor.u32 %v4378_v23, %v3676_v22  ;;  %v4342_v22 = vld [vmem:[%s6666_s1 + $0x1c] sm:$0xf] }
  0x76   :  { %3917 = vmatmul.msk.bf16.gmra.mxu3 %vm647_vm0, %v4842_v38  ;;  %1162 = vmatpush.bf16.msrb.mxu2 %v3905_v13  ;;  %v3550_v23 = vld [vmem:[%s6666_s1 + $0x38] sm:$0xf0] }
  0x78   :  { %808 = vmatmul.bf16.gmra.mxu1 %v4904_v3 }
  0x79   :  { %1126 = vmatpush.bf16.msrb.mxu0 %v3745_v41 }
  0x7a   :  { %1163 = vmatpush.bf16.msrb.mxu2 %v3873_v51  ;;  %v4358_v51 = vld [vmem:[%s6666_s1 + $0x9c] sm:$0xf] }
  0x7b   :  { %v3617_v54 = vor.u32 %v4358_v51, %v3614_v52 }
  0x7d   :  { %1127 = vmatpush.bf16.msrb.mxu0 %v3713_v63 }
  0x7e   :  { %1164 = vmatpush.bf16.msrb.mxu2 %v3841_v21 }
  0x84   :  { %874 = vmatmul.bf16.gmra.mxu0 %v4904_v3 }
  0x85   :  { %3922 = vmatmul.msk.bf16.gmra.mxu2 %vm647_vm0, %v4842_v38 }
  0x86   :  { %3918 = vmatmul.msk.bf16.gmra.mxu3 %vm647_vm0, %v4906_v4 }
  0x88   :  { %813 = vmatmul.bf16.gmra.mxu1 %v4962_v27 }
  0x94   :  { %879 = vmatmul.bf16.gmra.mxu0 %v4962_v27 }
  0x95   :  { %3923 = vmatmul.msk.bf16.gmra.mxu2 %vm647_vm0, %v4906_v4  ;;  %v705_v60 = vpop.f32.mrf.mxu1 }
  0x96   :  { %3919 = vmatmul.msk.bf16.gmra.mxu3 %vm647_vm0, %v4964_v28 }
  0x98   :  { %818 = vmatmul.bf16.gmra.mxu1 %v4999_v43 }
  0x99   :  { %v771_v0 = vpop.f32.mrf.mxu3 }
  0x9d   :  { %v707_v1 = vpop.f32.mrf.mxu1 }
  0xa1   :  { %v773_v6 = vpop.f32.mrf.mxu3  ;;  %v672_v8 = vpop.f32.mrf.mxu0 }
  0xa2   :  { %v706_v9 = vadd.f32 %v705_v60, %v672_v8  ;;  %v4386_v8 = vld [vmem:[%s6666_s1 + $0x174] sm:$0xf0] }
  0xa3   :  { %v3709_v10 = vor.u32 %v4386_v8, %v3708_v7  ;;  %v4354_v8 = vld [vmem:[%s6666_s1 + $0x74] sm:$0xf0] }
  0xa4   :  { %1191 = vst [vmem:[#allocation2] sm:$0xff] %v706_v9  ;;  %884 = vmatmul.bf16.gmra.mxu0 %v4999_v43 }
  0xa5   :  { %3924 = vmatmul.msk.bf16.gmra.mxu2 %vm647_vm0, %v4964_v28  ;;  %v710_v12 = vpop.f32.mrf.mxu1  ;;  %1061 = vmatpush.bf16.msrb.mxu1 %v3709_v10  ;;  %v4350_v10 = vld [vmem:[%s6666_s1 + $0x5c] sm:$0xf] }
  0xa6   :  { %3920 = vmatmul.msk.bf16.gmra.mxu3 %vm647_vm0, %v5001_v44 }
  0xa8   :  { %v738_v14 = vpop.f32.mrf.mxu2  ;;  %823 = vmatmul.bf16.gmra.mxu1 %v5036_v59 }
  0xa9   :  { %v776_v15 = vpop.f32.mrf.mxu3  ;;  %v772_v16 = vadd.f32 %v771_v0, %v738_v14  ;;  %v674_v17 = vpop.f32.mrf.mxu0  ;;  %1062 = vmatpush.bf16.msrb.mxu1 %v3677_v25 }
  0xaa   :  { %v708_v18 = vadd.f32 %v707_v1, %v674_v17  ;;  %v3678_v17 = vld [vmem:[%s6666_s1 + $0x138] sm:$0xf0] }
  0xab   :  { %1192 = vst [vmem:[#allocation2 + $0x8] sm:$0xff] %v772_v16  ;;  %v4374_v16 = vld [vmem:[%s6666_s1 + $0x11c] sm:$0xf] }
  0xac   :  { %1199 = vst [vmem:[#allocation2 + $0x40] sm:$0xff] %v708_v18  ;;  %v3681_v18 = vor.u32 %v4374_v16, %v3678_v17 }
  0xad   :  { %v712_v24 = vpop.f32.mrf.mxu1 }
  0xae   :  { %1128 = vmatpush.bf16.msrb.mxu0 %v3681_v18 }
  0xb0   :  { %v740_v26 = vpop.f32.mrf.mxu2 }
  0xb1   :  { %v778_v29 = vpop.f32.mrf.mxu3  ;;  %v774_v30 = vadd.f32 %v773_v6, %v740_v26  ;;  %v677_v31 = vpop.f32.mrf.mxu0 }
  0xb2   :  { %v711_v32 = vadd.f32 %v710_v12, %v677_v31 }
  0xb3   :  { %1200 = vst [vmem:[#allocation2 + $0x48] sm:$0xff] %v774_v30 }
  0xb4   :  { %1207 = vst [vmem:[#allocation2 + $0x80] sm:$0xff] %v711_v32  ;;  %889 = vmatmul.bf16.gmra.mxu0 %v5036_v59  ;;  %v3836_v32 = vld [vmem:[%s6666_s1 + $0x258] sm:$0xf] }
  0xb5   :  { %3925 = vmatmul.msk.bf16.gmra.mxu2 %vm647_vm0, %v5001_v44  ;;  %v715_v40 = vpop.f32.mrf.mxu1  ;;  %v3837_v37 = vor.u32 %v4418_v33, %v3836_v32 }
  0xb6   :  { %3926 = vmatmul.msk.bf16.vlgmr.msra.gmra.mxu3 %vm647_vm0, %v4738_v53 }
  0xb7   :  { %1098 = vmatpush.bf16.msrb.mxu3 %v3837_v37 }
  0xb8   :  { %v743_v42 = vpop.f32.mrf.mxu2  ;;  %935 = vmatmul.bf16.vlgmr.msra.gmra.mxu1 %v4834_v35 }
  0xb9   :  { %v781_v45 = vpop.f32.mrf.mxu3  ;;  %v777_v46 = vadd.f32 %v776_v15, %v743_v42  ;;  %v679_v47 = vpop.f32.mrf.mxu0 }
  0xba   :  { %v713_v48 = vadd.f32 %v712_v24, %v679_v47 }
  0xbb   :  { %1208 = vst [vmem:[#allocation2 + $0x88] sm:$0xff] %v777_v46 }
  0xbc   :  { %1215 = vst [vmem:[#allocation2 + $0xc0] sm:$0xff] %v713_v48  ;;  %v3644_v48 = vld [vmem:[%s6666_s1 + $0xd8] sm:$0xf] }
  0xbd   :  { %v717_v60 = vpop.f32.mrf.mxu1  ;;  %v3645_v50 = vor.u32 %v4370_v49, %v3644_v48 }
  0xbf   :  { %1063 = vmatpush.bf16.msrb.mxu1 %v3645_v50 }
  0xc0   :  { %v745_v0 = vpop.f32.mrf.mxu2 }
  0xc1   :  { %v783_v1 = vpop.f32.mrf.mxu3  ;;  %v779_v2 = vadd.f32 %v778_v29, %v745_v0  ;;  %v682_v5 = vpop.f32.mrf.mxu0 }
  0xc2   :  { %v716_v6 = vadd.f32 %v715_v40, %v682_v5  ;;  %v3649_v40 = vor.u32 %v4366_v34, %v3646_v39  ;;  %v3806_v5 = vld [vmem:[%s6666_s1 + $0x238] sm:$0xf0] }
  0xc3   :  { %1216 = vst [vmem:[#allocation2 + $0xc8] sm:$0xff] %v779_v2  ;;  %1064 = vmatpush.bf16.msrb.mxu1 %v3613_v58  ;;  %v4406_v2 = vld [vmem:[%s6666_s1 + $0x21c] sm:$0xf] }
  0xc4   :  { %1223 = vst [vmem:[#allocation2 + $0x100] sm:$0xff] %v716_v6  ;;  %1001 = vmatmul.bf16.vlgmr.msra.gmra.mxu0 %v4834_v35  ;;  %v3580_v6 = vld [vmem:[%s6666_s1 + $0x58] sm:$0xf]  ;;  %v3809_v7 = vor.u32 %v4406_v2, %v3806_v5 }
  0xc5   :  { %3931 = vmatmul.msk.bf16.vlgmr.msra.gmra.mxu2 %vm647_vm0, %v4738_v53  ;;  %v720_v9 = vpop.f32.mrf.mxu1  ;;  %1129 = vmatpush.bf16.msrb.mxu0 %v3649_v40 }
  0xc6   :  { %3927 = vmatmul.msk.bf16.gmra.mxu3 %vm647_vm0, %v4842_v38  ;;  %1165 = vmatpush.bf16.msrb.mxu2 %v3809_v7 }
  0xc8   :  { %v748_v11 = vpop.f32.mrf.mxu2  ;;  %940 = vmatmul.bf16.gmra.mxu1 %v4904_v3 }
  0xc9   :  { %v786_v12 = vpop.f32.mrf.mxu3  ;;  %v782_v13 = vadd.f32 %v781_v45, %v748_v11  ;;  %v684_v14 = vpop.f32.mrf.mxu0  ;;  %1130 = vmatpush.bf16.msrb.mxu0 %v3617_v54  ;;  %v3582_v11 = vld [vmem:[%s6666_s1 + $0x78] sm:$0xf0] }
  0xca   :  { %v718_v15 = vadd.f32 %v717_v60, %v684_v14  ;;  %v3804_v60 = vld [vmem:[%s6666_s1 + $0x218] sm:$0xf]  ;;  %v3585_v14 = vor.u32 %v4350_v10, %v3582_v11 }
  0xcb   :  { %1224 = vst [vmem:[#allocation2 + $0x108] sm:$0xff] %v782_v13  ;;  %v3805_v0 = vor.u32 %v4410_v61, %v3804_v60 }
  0xcc   :  { %1231 = vst [vmem:[#allocation2 + $0x140] sm:$0xff] %v718_v15  ;;  %v4346_v15 = vld [vmem:[%s6666_s1 + $0x34] sm:$0xf0] }
  0xcd   :  { %v722_v24 = vpop.f32.mrf.mxu1  ;;  %1099 = vmatpush.bf16.msrb.mxu3 %v3805_v0  ;;  %1131 = vmatpush.bf16.msrb.mxu0 %v3585_v14 }
  0xd0   :  { %v750_v26 = vpop.f32.mrf.mxu2 }
  0xd1   :  { %v788_v29 = vpop.f32.mrf.mxu3  ;;  %v784_v30 = vadd.f32 %v783_v1, %v750_v26  ;;  %v687_v31 = vpop.f32.mrf.mxu0  ;;  %v3553_v26 = vor.u32 %v4342_v22, %v3550_v23 }
  0xd2   :  { %v721_v36 = vadd.f32 %v720_v9, %v687_v31  ;;  %v3581_v9 = vor.u32 %v4354_v8, %v3580_v6 }
  0xd3   :  { %1232 = vst [vmem:[#allocation2 + $0x148] sm:$0xff] %v784_v30  ;;  %1132 = vmatpush.bf16.msrb.mxu0 %v3553_v26 }
  0xd4   :  { %1239 = vst [vmem:[#allocation2 + $0x180] sm:$0xff] %v721_v36  ;;  %1006 = vmatmul.bf16.gmra.mxu0 %v4904_v3  ;;  %1065 = vmatpush.bf16.msrb.mxu1 %v3581_v9 }
  0xd5   :  { %3932 = vmatmul.msk.bf16.gmra.mxu2 %vm647_vm0, %v4842_v38  ;;  %v725_v41 = vpop.f32.mrf.mxu1 }
  0xd6   :  { %3928 = vmatmul.msk.bf16.gmra.mxu3 %vm647_vm0, %v4906_v4 }
  0xd8   :  { %v753_v42 = vpop.f32.mrf.mxu2  ;;  %945 = vmatmul.bf16.gmra.mxu1 %v4962_v27 }
  0xd9   :  { %v791_v45 = vpop.f32.mrf.mxu3  ;;  %v787_v46 = vadd.f32 %v786_v12, %v753_v42  ;;  %v689_v47 = vpop.f32.mrf.mxu0  ;;  %v3548_v12 = vld [vmem:[%s6666_s1 + $0x18] sm:$0xf]  ;;  %s4570_s1 = smov 64  }
  0xda   :  { %v3549_v16 = vor.u32 %v4346_v15, %v3548_v12 }
  0xdb   :  { %1240 = vst [vmem:[#allocation2 + $0x188] sm:$0xff] %v787_v46 }
  0xdc   :  { %1066 = vmatpush.bf16.msrb.mxu1 %v3549_v16 }
  0xdd   :  { %v727_v57 = vpop.f32.mrf.mxu1 }
  0xe0   :  { %v755_v62 = vpop.f32.mrf.mxu2 }
  0xe1   :  { %v793_v63 = vpop.f32.mrf.mxu3  ;;  %v692_v1 = vpop.f32.mrf.mxu0 }
  0xe4   :  { %1011 = vmatmul.bf16.gmra.mxu0 %v4962_v27 }
  0xe5   :  { %3933 = vmatmul.msk.bf16.gmra.mxu2 %vm647_vm0, %v4906_v4  ;;  %v804_v13 = vpop.f32.mrf.mxu1 }
  0xe6   :  { %3929 = vmatmul.msk.bf16.gmra.mxu3 %vm647_vm0, %v4964_v28 }
  0xe8   :  { %v758_v17 = vpop.f32.mrf.mxu2  ;;  %950 = vmatmul.bf16.gmra.mxu1 %v4999_v43 }
  0xe9   :  { %v837_v18 = vpop.f32.mrf.mxu3  ;;  %v694_v20 = vpop.f32.mrf.mxu0 }
  0xea   :  { %v838_v19 = vadd.f32 %v837_v18, %v804_v13 }
  0xec   :  { %1193 = vst [vmem:[#allocation2 + $0x10] sm:$0xff] %v838_v19 }
  0xed   :  { %v806_v21 = vpop.f32.mrf.mxu1 }
  0xf0   :  { %v760_v24 = vpop.f32.mrf.mxu2 }
  0xf1   :  { %v839_v25 = vpop.f32.mrf.mxu3  ;;  %v870_v30 = vpop.f32.mrf.mxu0 }
  0xf2   :  { %v5355_v29 = vadd.f32 %v839_v25, %v806_v21 }
  0xf4   :  { %1016 = vmatmul.bf16.gmra.mxu0 %v4999_v43  ;;  %v1311_v39 = vrot.slane %v5355_v29, 1 }
  0xf5   :  { %3934 = vmatmul.msk.bf16.gmra.mxu2 %vm647_vm0, %v4964_v28  ;;  %v809_v31 = vpop.f32.mrf.mxu1 }
  0xf6   :  { %3930 = vmatmul.msk.bf16.gmra.mxu3 %vm647_vm0, %v5001_v44 }
  0xf8   :  { %v903_v33 = vpop.f32.mrf.mxu2  ;;  %955 = vmatmul.bf16.gmra.mxu1 %v5036_v59 }
  0xf9   :  { %v842_v32 = vpop.f32.mrf.mxu3  ;;  %v904_v36 = vadd.f32 %v903_v33, %v870_v30  ;;  %v872_v37 = vpop.f32.mrf.mxu0 }
  0xfa   :  { %v843_v34 = vadd.f32 %v842_v32, %v809_v31 }
  0xfb   :  { %1194 = vst [vmem:[#allocation2 + $0x18] sm:$0xff] %v904_v36 }
  0xfc   :  { %v1316_v40 = vrot.slane %v843_v34, 1 }
  0xfd   :  { %v811_v42 = vpop.f32.mrf.mxu1 }
  0xfe   :  { %v5367_v41 = vsel %vm1309_vm1, %v1311_v39, %v1316_v40 }
 0x100   :  { %v905_v46 = vpop.f32.mrf.mxu2 }
 0x101   :  { %v844_v45 = vpop.f32.mrf.mxu3  ;;  %v5369_v48 = vadd.f32 %v905_v46, %v872_v37  ;;  %v875_v49 = vpop.f32.mrf.mxu0 }
 0x102   :  { %v845_v47 = vadd.f32 %v844_v45, %v811_v42  ;;  %v1277_v45 = vld [vmem:[#allocation2 + $0x10] sm:$0xfe] }
 0x103   :  { %v1314_v61 = vrot.slane %v5369_v48, 1  ;;  %v1310_v46 = vrot.slane %v1277_v45, 1 }
 0x104   :  { %v1320_v50 = vrot.slane %v845_v47, 1  ;;  %1021 = vmatmul.bf16.gmra.mxu0 %v5036_v59 }
 0x105   :  { %3935 = vmatmul.msk.bf16.gmra.mxu2 %vm647_vm0, %v5001_v44  ;;  %v814_v52 = vpop.f32.mrf.mxu1 }
 0x106   :  { %3936 = vmatmul.msk.bf16.vlgmr.msrb.gmra.mxu3 %vm647_vm0, %v4738_v53  ;;  %v5377_v51 = vsel %vm1309_vm1, %v1316_v40, %v1320_v50 }
 0x108   :  { %v908_v55 = vpop.f32.mrf.mxu2  ;;  %1067 = vmatmul.bf16.vlgmr.msrb.gmra.mxu1 %v4834_v35 }
 0x109   :  { %v847_v54 = vpop.f32.mrf.mxu3  ;;  %v5379_v57 = vadd.f32 %v908_v55, %v875_v49  ;;  %v877_v58 = vpop.f32.mrf.mxu0  ;;  %v1263_v55 = vld [vmem:[#allocation2] sm:$0xff] }
 0x10a   :  { %v848_v56 = vadd.f32 %v847_v54, %v814_v52  ;;  %v1312_v54 = vsel %vm1309_vm1, %v1310_v46, %v1311_v39 }
 0x10b   :  { %v1318_v62 = vrot.slane %v5379_v57, 1  ;;  %v4047_v57 = vld [vmem:[%s6668_s3 + $0xd0] sm:$0xf0] }
 0x10c   :  { %v1324_v60 = vrot.slane %v848_v56, 1 }
 0x10d   :  { %v5392_v0 = vsel %vm1309_vm1, %v1314_v61, %v1318_v62  ;;  %v816_v1 = vpop.f32.mrf.mxu1 }
 0x10e   :  { %v5385_v63 = vsel %vm1309_vm1, %v1320_v50, %v1324_v60 }
 0x110   :  { %v910_v5 = vpop.f32.mrf.mxu2 }
 0x111   :  { %v849_v2 = vpop.f32.mrf.mxu3  ;;  %v911_v7 = vadd.f32 %v910_v5, %v877_v58  ;;  %v880_v8 = vpop.f32.mrf.mxu0 }
 0x112   :  { %v850_v6 = vadd.f32 %v849_v2, %v816_v1 }
 0x113   :  { %1218 = vst [vmem:[#allocation2 + $0xd8] sm:$0xff] %v911_v7 }
 0x114   :  { %v1328_v9 = vrot.slane %v850_v6, 1  ;;  %1133 = vmatmul.bf16.vlgmr.msrb.gmra.mxu0 %v4834_v35 }
 0x115   :  { %3941 = vmatmul.msk.bf16.vlgmr.msrb.gmra.mxu2 %vm647_vm0, %v4738_v53  ;;  %v819_v11 = vpop.f32.mrf.mxu1 }
 0x116   :  { %3937 = vmatmul.msk.bf16.gmra.mxu3 %vm647_vm0, %v4842_v38  ;;  %v5400_v10 = vsel %vm1309_vm1, %v1324_v60, %v1328_v9  ;;  %v1354_v60 = vadd.f32 %v1312_v54, %v1263_v55  ;;  %v1269_v54 = vld [vmem:[#allocation2 + $0xc0] sm:$0xff]  ;;  %v1266_v55 = vld [vmem:[#allocation2 + $0x48] sm:$0xff] }
 0x118   :  { %v913_v13 = vpop.f32.mrf.mxu2  ;;  %1072 = vmatmul.bf16.gmra.mxu1 %v4904_v3 }
 0x119   :  { %v852_v12 = vpop.f32.mrf.mxu3  ;;  %v5404_v15 = vadd.f32 %v913_v13, %v880_v8  ;;  %v882_v16 = vpop.f32.mrf.mxu0 }
 0x11a   :  { %v5402_v14 = vadd.f32 %v852_v12, %v819_v11  ;;  %v1278_v11 = vld [vmem:[#allocation2 + $0x18] sm:$0xfe] }
 0x11c   :  { %v1332_v35 = vrot.slane %v5402_v14, 1  ;;  %v4481_v14 = vld [vmem:[%s6668_s3 + $0x16c] sm:$0xf0] }
 0x11d   :  { %v821_v53 = vpop.f32.mrf.mxu1 }
 0x11e   :  { %v5411_v17 = vsel %vm1309_vm1, %v1328_v9, %v1332_v35 }
 0x120   :  { %v915_v19 = vpop.f32.mrf.mxu2 }
 0x121   :  { %v854_v18 = vpop.f32.mrf.mxu3  ;;  %v916_v21 = vadd.f32 %v915_v19, %v882_v16  ;;  %v885_v22 = vpop.f32.mrf.mxu0 }
 0x122   :  { %v855_v20 = vadd.f32 %v854_v18, %v821_v53  ;;  %v1313_v53 = vrot.slane %v1278_v11, 1 }
 0x123   :  { %1234 = vst [vmem:[#allocation2 + $0x158] sm:$0xff] %v916_v21 }
 0x124   :  { %1249 = vst [vmem:[#allocation2 + $0x1d0] sm:$0xff] %v855_v20  ;;  %1138 = vmatmul.bf16.gmra.mxu0 %v4904_v3 }
 0x125   :  { %3942 = vmatmul.msk.bf16.gmra.mxu2 %vm647_vm0, %v4842_v38  ;;  %v824_v23 = vpop.f32.mrf.mxu1 }
 0x126   :  { %3938 = vmatmul.msk.bf16.gmra.mxu3 %vm647_vm0, %v4906_v4  ;;  %v1264_v23 = vld [vmem:[#allocation2 + $0x8] sm:$0xff] }
 0x128   :  { %v918_v25 = vpop.f32.mrf.mxu2  ;;  %1077 = vmatmul.bf16.gmra.mxu1 %v4962_v27 }
 0x129   :  { %v857_v24 = vpop.f32.mrf.mxu3  ;;  %v919_v26 = vadd.f32 %v918_v25, %v885_v22  ;;  %v887_v30 = vpop.f32.mrf.mxu0  ;;  %v1267_v25 = vld [vmem:[#allocation2 + $0x80] sm:$0xff] }
 0x12a   :  { %v1315_v24 = vsel %vm1309_vm1, %v1313_v53, %v1314_v61  ;;  %v4495_v61 = vld [vmem:[%s6668_s3 + $0x1e4] sm:$0xf] }
 0x12b   :  { %1242 = vst [vmem:[#allocation2 + $0x198] sm:$0xff] %v919_v26 }
 0x12d   :  { %v826_v31 = vpop.f32.mrf.mxu1 }
 0x12e   :  { %v4189_v31 = vld [vmem:[%s6668_s3 + $0x1e0] sm:$0xf] }
 0x130   :  { %v920_v33 = vpop.f32.mrf.mxu2 }
 0x131   :  { %v859_v32 = vpop.f32.mrf.mxu3  ;;  %v921_v34 = vadd.f32 %v920_v33, %v887_v30  ;;  %v890_v36 = vpop.f32.mrf.mxu0  ;;  %v1358_v33 = vadd.f32 %v5377_v51, %v1267_v25  ;;  %v1355_v51 = vadd.f32 %v1315_v24, %v1264_v23  ;;  %v1271_v23 = vld [vmem:[#allocation2 + $0x100] sm:$0xff]  ;;  %v1268_v24 = vld [vmem:[#allocation2 + $0x88] sm:$0xff] }
 0x132   :  { %v4497_v32 = vld [vmem:[%s6668_s3 + $0x1ec] sm:$0xf0]  ;;  %v4191_v36 = vld [vmem:[%s6668_s3 + $0x1f0] sm:$0xf0] }
 0x133   :  { %1250 = vst [vmem:[#allocation2 + $0x1d8] sm:$0xff] %v921_v34  ;;  %v4190_v48 = vor.u32 %v4497_v32, %v4189_v31 }
 0x134   :  { %1143 = vmatmul.bf16.gmra.mxu0 %v4962_v27 }
 0x135   :  { %3943 = vmatmul.msk.bf16.gmra.mxu2 %vm647_vm0, %v4906_v4  ;;  %v936_v38 = vpop.f32.mrf.mxu1  ;;  %2064 = vmatpush.bf16.msra.mxu3 %v4190_v48 }
 0x136   :  { %3939 = vmatmul.msk.bf16.gmra.mxu3 %vm647_vm0, %v4964_v28 }
 0x138   :  { %v923_v3 = vpop.f32.mrf.mxu2  ;;  %1082 = vmatmul.bf16.gmra.mxu1 %v4999_v43 }
 0x139   :  { %v969_v37 = vpop.f32.mrf.mxu3  ;;  %v892_v42 = vpop.f32.mrf.mxu0 }
 0x13a   :  { %v970_v40 = vadd.f32 %v969_v37, %v936_v38  ;;  %v4061_v38 = vld [vmem:[%s6668_s3 + $0xe0] sm:$0xf]  ;;  %v4194_v37 = vor.u32 %v4495_v61, %v4191_v36  ;;  %v4489_v36 = vld [vmem:[%s6668_s3 + $0x1ac] sm:$0xf0] }
 0x13b   :  { %v4157_v61 = vld [vmem:[%s6668_s3 + $0x1a0] sm:$0xf] }
 0x13c   :  { %1195 = vst [vmem:[#allocation2 + $0x20] sm:$0xff] %v970_v40  ;;  %v4465_v40 = vld [vmem:[%s6668_s3 + $0xec] sm:$0xf0]  ;;  %2130 = vmatpush.bf16.msra.mxu2 %v4194_v37  ;;  %v4159_v37 = vld [vmem:[%s6668_s3 + $0x1b0] sm:$0xf0] }
 0x13d   :  { %v938_v47 = vpop.f32.mrf.mxu1  ;;  %v4062_v46 = vor.u32 %v4465_v40, %v4061_v38  ;;  %v4487_v38 = vld [vmem:[%s6668_s3 + $0x1a4] sm:$0xf] }
 0x13f   :  { %2031 = vmatpush.bf16.msra.mxu1 %v4062_v46  ;;  %v4162_v46 = vor.u32 %v4487_v38, %v4159_v37  ;;  %v3997_v37 = vld [vmem:[%s6668_s3 + $0x60] sm:$0xf] }
 0x140   :  { %v925_v49 = vpop.f32.mrf.mxu2 }
 0x141   :  { %v971_v50 = vpop.f32.mrf.mxu3  ;;  %v1002_v52 = vpop.f32.mrf.mxu0 }
 0x142   :  { %v972_v27 = vadd.f32 %v971_v50, %v938_v47 }
 0x143   :  { %v1368_v4 = vld [vmem:[#allocation2 + $0x20] sm:$0xe0] }
 0x144   :  { %v1401_v56 = vrot.slane %v1368_v4, 5  ;;  %v1402_v58 = vrot.slane %v972_v27, 5  ;;  %1148 = vmatmul.bf16.gmra.mxu0 %v4999_v43  ;;  %v1265_v43 = vld [vmem:[#allocation2 + $0x40] sm:$0xff] }
 0x145   :  { %3944 = vmatmul.msk.bf16.gmra.mxu2 %vm647_vm0, %v4964_v28  ;;  %v941_v2 = vpop.f32.mrf.mxu1  ;;  %v1356_v28 = vadd.f32 %v5367_v41, %v1265_v43 }
 0x146   :  { %3940 = vmatmul.msk.bf16.gmra.mxu3 %vm647_vm0, %v5001_v44  ;;  %v1403_v1 = vsel %vm1400_vm2, %v1401_v56, %v1402_v58 }
 0x147   :  { %v5434_v29 = vadd.f32 %v1403_v1, %v1354_v60  ;;  %v4463_v60 = vld [vmem:[%s6668_s3 + $0xe4] sm:$0xf]  ;;  %v4063_v1 = vld [vmem:[%s6668_s3 + $0xf0] sm:$0xf0] }
 0x148   :  { %v1035_v5 = vpop.f32.mrf.mxu2  ;;  %1087 = vmatmul.bf16.gmra.mxu1 %v5036_v59 }
 0x149   :  { %v974_v39 = vpop.f32.mrf.mxu3  ;;  %v1036_v7 = vadd.f32 %v1035_v5, %v1002_v52  ;;  %v1004_v8 = vpop.f32.mrf.mxu0  ;;  %v4066_v5 = vor.u32 %v4463_v60, %v4063_v1  ;;  %v1270_v60 = vld [vmem:[#allocation2 + $0xc8] sm:$0xff] }
 0x14a   :  { %v975_v6 = vadd.f32 %v974_v39, %v941_v2  ;;  %v1360_v2 = vadd.f32 %v5385_v63, %v1269_v54  ;;  %v1357_v39 = vadd.f32 %v5392_v0, %v1266_v55  ;;  %v4175_v0 = vld [vmem:[%s6668_s3 + $0x1d0] sm:$0xf0]  ;;  %v5538_v55 = vld [vmem:[#allocation2 + $0x158] sm:$0xff] }
 0x14b   :  { %1196 = vst [vmem:[#allocation2 + $0x28] sm:$0xff] %v1036_v7  ;;  %v4493_v7 = vld [vmem:[%s6668_s3 + $0x1cc] sm:$0xf0]  ;;  %2097 = vmatpush.bf16.msra.mxu0 %v4066_v5 }
 0x14c   :  { %v1407_v9 = vrot.slane %v975_v6, 5  ;;  %v4173_v6 = vld [vmem:[%s6668_s3 + $0x1c0] sm:$0xf] }
 0x14d   :  { %v943_v13 = vpop.f32.mrf.mxu1  ;;  %v4174_v11 = vor.u32 %v4493_v7, %v4173_v6  ;;  %v1330_v7 = vrot.slane %v5538_v55, 1 }
 0x14e   :  { %v1408_v12 = vsel %vm1400_vm2, %v1402_v58, %v1407_v9  ;;  %v1284_v58 = vld [vmem:[#allocation2 + $0xd8] sm:$0xff] }
 0x14f   :  { %v5439_v16 = vadd.f32 %v1408_v12, %v1356_v28  ;;  %2065 = vmatpush.bf16.msra.mxu3 %v4174_v11 }
 0x150   :  { %v1037_v19 = vpop.f32.mrf.mxu2 }
 0x151   :  { %v976_v18 = vpop.f32.mrf.mxu3  ;;  %v1038_v21 = vadd.f32 %v1037_v19, %v1004_v8  ;;  %v1007_v22 = vpop.f32.mrf.mxu0  ;;  %v4491_v8 = vld [vmem:[%s6668_s3 + $0x1c4] sm:$0xf] }
 0x152   :  { %v977_v20 = vadd.f32 %v976_v18, %v943_v13  ;;  %v1369_v30 = vld [vmem:[#allocation2 + $0x28] sm:$0xe0]  ;;  %v1322_v13 = vrot.slane %v1284_v58, 1  ;;  %v4178_v53 = vor.u32 %v4491_v8, %v4175_v0  ;;  %v1273_v58 = vld [vmem:[#allocation2 + $0x140] sm:$0xff] }
 0x153   :  { %v1405_v41 = vrot.slane %v1038_v21, 5  ;;  %v1404_v34 = vrot.slane %v1369_v30, 5  ;;  %v4045_v30 = vld [vmem:[%s6668_s3 + $0xc0] sm:$0xf]  ;;  %v1364_v5 = vadd.f32 %v5411_v17, %v1273_v58 }
 0x154   :  { %v1411_v26 = vrot.slane %v977_v20, 5  ;;  %1153 = vmatmul.bf16.gmra.mxu0 %v5036_v59  ;;  %2131 = vmatpush.bf16.msra.mxu2 %v4178_v53  ;;  %v1323_v25 = vsel %vm1309_vm1, %v1318_v62, %v1322_v13  ;;  %v1362_v62 = vadd.f32 %v5400_v10, %v1271_v23  ;;  %v4158_v10 = vor.u32 %v4489_v36, %v4157_v61  ;;  %v4485_v53 = vld [vmem:[%s6668_s3 + $0x18c] sm:$0xf0]  ;;  %v4451_v61 = vld [vmem:[%s6668_s3 + $0x84] sm:$0xf] }
 0x155   :  { %3945 = vmatmul.msk.bf16.gmra.mxu2 %vm647_vm0, %v5001_v44  ;;  %v946_v3 = vpop.f32.mrf.mxu1  ;;  %v1406_v45 = vsel %vm1400_vm2, %v1404_v34, %v1405_v41  ;;  %v4015_v36 = vld [vmem:[%s6668_s3 + $0x90] sm:$0xf0] }
 0x156   :  { %v1412_v59 = vsel %vm1400_vm2, %v1407_v9, %v1411_v26  ;;  %v5470_v47 = vadd.f32 %v1406_v45, %v1355_v51  ;;  %v1359_v51 = vadd.f32 %v1323_v25, %v1268_v24  ;;  %2066 = vmatpush.bf16.msra.mxu3 %v4158_v10 }
 0x157   :  { %v5467_v42 = vadd.f32 %v1412_v59, %v1358_v33  ;;  %v4459_v33 = vld [vmem:[%s6668_s3 + $0xc4] sm:$0xf] }
 0x158   :  { %v1040_v50 = vpop.f32.mrf.mxu2  ;;  %v4050_v48 = vor.u32 %v4459_v33, %v4047_v57  ;;  %2132 = vmatpush.bf16.msra.mxu2 %v4162_v46  ;;  %v4143_v33 = vld [vmem:[%s6668_s3 + $0x190] sm:$0xf0]  ;;  %v4447_v46 = vld [vmem:[%s6668_s3 + $0x64] sm:$0xf] }
 0x159   :  { %v979_v49 = vpop.f32.mrf.mxu3  ;;  %v1041_v27 = vadd.f32 %v1040_v50, %v1007_v22  ;;  %v1009_v52 = vpop.f32.mrf.mxu0 }
 0x15a   :  { %v980_v44 = vadd.f32 %v979_v49, %v946_v3  ;;  %2098 = vmatpush.bf16.msra.mxu0 %v4050_v48 }
 0x15b   :  { %v1409_v56 = vrot.slane %v1041_v27, 5 }
 0x15c   :  { %v1415_v4 = vrot.slane %v980_v44, 5 }
 0x15d   :  { %v1410_v9 = vsel %vm1400_vm2, %v1405_v41, %v1409_v56  ;;  %v948_v63 = vpop.f32.mrf.mxu1  ;;  %v4461_v41 = vld [vmem:[%s6668_s3 + $0xcc] sm:$0xf0] }
 0x15e   :  { %v1416_v43 = vsel %vm1400_vm2, %v1411_v26, %v1415_v4  ;;  %v5496_v12 = vadd.f32 %v1410_v9, %v1357_v39  ;;  %v1326_v26 = vrot.slane %v5404_v15, 1  ;;  %v4046_v32 = vor.u32 %v4461_v41, %v4045_v30  ;;  %v4457_v39 = vld [vmem:[%s6668_s3 + $0xac] sm:$0xf0]  ;;  %v4031_v9 = vld [vmem:[%s6668_s3 + $0xb0] sm:$0xf0] }
 0x15f   :  { %v5494_v28 = vadd.f32 %v1416_v43, %v1360_v2  ;;  %v4029_v2 = vld [vmem:[%s6668_s3 + $0xa0] sm:$0xf]  ;;  %v4455_v43 = vld [vmem:[%s6668_s3 + $0xa4] sm:$0xf]  ;;  %v1291_v41 = vld [vmem:[#allocation2 + $0x1d0] sm:$0x1] }
 0x160   :  { %v1042_v19 = vpop.f32.mrf.mxu2  ;;  %2032 = vmatpush.bf16.msra.mxu1 %v4046_v32  ;;  %v4030_v8 = vor.u32 %v4457_v39, %v4029_v2  ;;  %v1331_v30 = vsel %vm1309_vm1, %v1326_v26, %v1330_v7  ;;  %v4483_v32 = vld [vmem:[%s6668_s3 + $0x184] sm:$0xf]  ;;  %v4453_v15 = vld [vmem:[%s6668_s3 + $0x8c] sm:$0xf0]  ;;  %v1336_v38 = vrot.slane %v1291_v41, 1 }
 0x161   :  { %v981_v18 = vpop.f32.mrf.mxu3  ;;  %v1043_v21 = vadd.f32 %v1042_v19, %v1009_v52  ;;  %v1012_v22 = vpop.f32.mrf.mxu0  ;;  %v1275_v2 = vld [vmem:[#allocation2 + $0x180] sm:$0xff] }
 0x162   :  { %v982_v20 = vadd.f32 %v981_v18, %v948_v63  ;;  %v4141_v63 = vld [vmem:[%s6668_s3 + $0x180] sm:$0xf] }
 0x163   :  { %v1413_v34 = vrot.slane %v1043_v21, 5 }
 0x164   :  { %v1419_v31 = vrot.slane %v982_v20, 5  ;;  %2033 = vmatpush.bf16.msra.mxu1 %v4030_v8  ;;  %v4142_v20 = vor.u32 %v4485_v53, %v4141_v63 }
 0x165   :  { %v951_v3 = vpop.f32.mrf.mxu1  ;;  %v1414_v45 = vsel %vm1400_vm2, %v1409_v56, %v1413_v34 }
 0x166   :  { %v1420_v59 = vsel %vm1400_vm2, %v1415_v4, %v1419_v31  ;;  %v5531_v49 = vadd.f32 %v1414_v45, %v1359_v51  ;;  %v1327_v4 = vsel %vm1309_vm1, %v1322_v13, %v1326_v26  ;;  %v4034_v13 = vor.u32 %v4455_v43, %v4031_v9  ;;  %2067 = vmatpush.bf16.msra.mxu3 %v4142_v20  ;;  %v4449_v45 = vld [vmem:[%s6668_s3 + $0x6c] sm:$0xf0]  ;;  %v4125_v43 = vld [vmem:[%s6668_s3 + $0x160] sm:$0xf] }
 0x167   :  { %v5528_v40 = vadd.f32 %v1420_v59, %v1362_v62  ;;  %v1361_v6 = vadd.f32 %v1327_v4, %v1270_v60  ;;  %v4146_v62 = vor.u32 %v4483_v32, %v4143_v33  ;;  %v3967_v33 = vld [vmem:[%s6668_s3 + $0x30] sm:$0xf0] }
 0x168   :  { %v1045_v44 = vpop.f32.mrf.mxu2  ;;  %2099 = vmatpush.bf16.msra.mxu0 %v4034_v13  ;;  %v4443_v13 = vld [vmem:[%s6668_s3 + $0x44] sm:$0xf] }
 0x169   :  { %v984_v50 = vpop.f32.mrf.mxu3  ;;  %v1046_v52 = vadd.f32 %v1045_v44, %v1012_v22  ;;  %v1014_v54 = vpop.f32.mrf.mxu0  ;;  %2133 = vmatpush.bf16.msra.mxu2 %v4146_v62 }
 0x16a   :  { %v5533_v27 = vadd.f32 %v984_v50, %v951_v3  ;;  %v4018_v3 = vor.u32 %v4451_v61, %v4015_v36  ;;  %v4477_v61 = vld [vmem:[%s6668_s3 + $0x14c] sm:$0xf0]  ;;  %v4475_v36 = vld [vmem:[%s6668_s3 + $0x144] sm:$0xf] }
 0x16b   :  { %v1417_v1 = vrot.slane %v1046_v52, 5  ;;  %v3998_v52 = vor.u32 %v4449_v45, %v3997_v37  ;;  %v3951_v37 = vld [vmem:[%s6668_s3 + $0x10] sm:$0xf0] }
 0x16c   :  { %v1423_v56 = vrot.slane %v5533_v27, 5  ;;  %2100 = vmatpush.bf16.msra.mxu0 %v4018_v3  ;;  %v3965_v27 = vld [vmem:[%s6668_s3 + $0x20] sm:$0xf]  ;;  %v4435_v3 = vld [vmem:[%s6668_s3 + $0x4] sm:$0xf] }
 0x16d   :  { %v1418_v11 = vsel %vm1400_vm2, %v1413_v34, %v1417_v1  ;;  %v953_v0 = vpop.f32.mrf.mxu1  ;;  %v4013_v34 = vld [vmem:[%s6668_s3 + $0x80] sm:$0xf] }
 0x16e   :  { %v1424_v17 = vsel %vm1400_vm2, %v1419_v31, %v1423_v56  ;;  %v5567_v19 = vadd.f32 %v1418_v11, %v1361_v6  ;;  %v1272_v31 = vld [vmem:[#allocation2 + $0x108] sm:$0xff]  ;;  %v4014_v48 = vor.u32 %v4453_v15, %v4013_v34  ;;  %v4445_v6 = vld [vmem:[%s6668_s3 + $0x4c] sm:$0xf0]  ;;  %v4479_v11 = vld [vmem:[%s6668_s3 + $0x164] sm:$0xf] }
 0x16f   :  { %v5565_v18 = vadd.f32 %v1424_v17, %v1364_v5  ;;  %v1363_v26 = vadd.f32 %v1331_v30, %v1272_v31  ;;  %v3981_v5 = vld [vmem:[%s6668_s3 + $0x40] sm:$0xf]  ;;  %v4126_v17 = vor.u32 %v4481_v14, %v4125_v43  ;;  %v4439_v30 = vld [vmem:[%s6668_s3 + $0x24] sm:$0xf] }
 0x170   :  { %v1047_v22 = vpop.f32.mrf.mxu2  ;;  %2034 = vmatpush.bf16.msra.mxu1 %v4014_v48  ;;  %v3970_v34 = vor.u32 %v4439_v30, %v3967_v33  ;;  %v3949_v15 = vld [vmem:[%s6668_s3] sm:$0xf] }
 0x171   :  { %v986_v21 = vpop.f32.mrf.mxu3  ;;  %v1048_v24 = vadd.f32 %v1047_v22, %v1014_v54  ;;  %v1017_v25 = vpop.f32.mrf.mxu0  ;;  %v3999_v54 = vld [vmem:[%s6668_s3 + $0x70] sm:$0xf0]  ;;  %2068 = vmatpush.bf16.msra.mxu3 %v4126_v17  ;;  %v4109_v48 = vld [vmem:[%s6668_s3 + $0x140] sm:$0xf] }
 0x172   :  { %v987_v23 = vadd.f32 %v986_v21, %v953_v0  ;;  %v4002_v60 = vor.u32 %v4447_v46, %v3999_v54  ;;  %v4127_v0 = vld [vmem:[%s6668_s3 + $0x170] sm:$0xf0] }
 0x173   :  { %v1421_v57 = vrot.slane %v1048_v24, 5  ;;  %v4130_v21 = vor.u32 %v4479_v11, %v4127_v0  ;;  %v3983_v22 = vld [vmem:[%s6668_s3 + $0x50] sm:$0xf0]  ;;  %v4077_v0 = vld [vmem:[%s6668_s3 + $0x100] sm:$0xf] }
 0x174   :  { %1251 = vst [vmem:[#allocation2 + $0x1e0] sm:$0xff] %v987_v23  ;;  %2035 = vmatpush.bf16.msra.mxu1 %v3998_v52  ;;  %2101 = vmatpush.bf16.msra.mxu0 %v4002_v60  ;;  %v4093_v60 = vld [vmem:[%s6668_s3 + $0x120] sm:$0xf] }
 0x175   :  { %v1422_v59 = vsel %vm1400_vm2, %v1417_v1, %v1421_v57  ;;  %v956_v51 = vpop.f32.mrf.mxu1  ;;  %v1337_v1 = vsel %vm1309_vm1, %v1332_v35, %v1336_v38  ;;  %v3982_v35 = vor.u32 %v4445_v6, %v3981_v5  ;;  %2134 = vmatpush.bf16.msra.mxu2 %v4130_v21  ;;  %v4095_v5 = vld [vmem:[%s6668_s3 + $0x130] sm:$0xf0]  ;;  %v1550_v21 = vld [vmem:[%s6667_s2] ss:$2 sm:$0x3] }
 0x176   :  { %v5593_v10 = vadd.f32 %v1422_v59, %v1363_v26  ;;  %v1366_v9 = vadd.f32 %v1337_v1, %v1275_v2  ;;  %v4437_v26 = vld [vmem:[%s6668_s3 + $0xc] sm:$0xf0]  ;;  %v4110_v59 = vor.u32 %v4477_v61, %v4109_v48  ;;  %v4111_v51 = vld [vmem:[%s6668_s3 + $0x150] sm:$0xf0]  ;;  %v5712_v33 = vperm.slane %v1550_v21, 0 }
 0x177   :  { %v3950_v38 = vor.u32 %v4437_v26, %v3949_v15  ;;  %v4114_v46 = vor.u32 %v4475_v36, %v4111_v51  ;;  %v4473_v1 = vld [vmem:[%s6668_s3 + $0x12c] sm:$0xf0]  ;;  %v3946_v15 = vld [vmem:[%s6667_s2 + $0x1] ss:$2 sm:$0x3] }
 0x178   :  { %v1050_v44 = vpop.f32.mrf.mxu2  ;;  %2036 = vmatpush.bf16.msra.mxu1 %v3982_v35  ;;  %2069 = vmatpush.bf16.msra.mxu3 %v4110_v59  ;;  %v4094_v2 = vor.u32 %v4473_v1, %v4093_v60  ;;  %v5718_v61 = vperm.slane %v3946_v15, 0 }
 0x179   :  { %v989_v50 = vpop.f32.mrf.mxu3  ;;  %v5607_v4 = vadd.f32 %v1050_v44, %v1017_v25  ;;  %v1019_v58 = vpop.f32.mrf.mxu0  ;;  %v3986_v25 = vor.u32 %v4443_v13, %v3983_v22  ;;  %2135 = vmatpush.bf16.msra.mxu2 %v4114_v46 }
 0x17a   :  { %v3954_v50 = vor.u32 %v4435_v3, %v3951_v37 }
 0x17b   :  { %v1382_v39 = vld [vmem:[#allocation2 + $0x1e0] sm:$0x1f]  ;;  %v1425_v63 = vrot.slane %v5607_v4, 5  ;;  %2102 = vmatpush.bf16.msra.mxu0 %v3986_v25  ;;  %v4079_v25 = vld [vmem:[%s6668_s3 + $0x110] sm:$0xf0] }
 0x17c   :  { %v1427_v8 = vrot.slane %v1382_v39, 5  ;;  %v4471_v39 = vld [vmem:[%s6668_s3 + $0x124] sm:$0xf]  ;;  %2070 = vmatpush.bf16.msra.mxu3 %v4094_v2  ;;  %v4087_v4 = vld [vmem:[%s6668_s3 + $0x118] sm:$0xf0] }
 0x17d   :  { %v958_v20 = vpop.f32.mrf.mxu1  ;;  %v5645_v24 = vsel %vm1400_vm2, %v1421_v57, %v1425_v63 }
 0x17e   :  { %v1428_v53 = vsel %vm1400_vm2, %v1423_v56, %v1427_v8  ;;  %v4441_v56 = vld [vmem:[%s6668_s3 + $0x2c] sm:$0xf0]  ;;  %v4098_v8 = vor.u32 %v4471_v39, %v4095_v5  ;;  %v4467_v20 = vld [vmem:[%s6668_s3 + $0x104] sm:$0xf]  ;;  %v4498_v5 = vld [vmem:[%s6668_s3 + $0x1f4] sm:$0xf0] }
 0x17f   :  { %v5640_v23 = vadd.f32 %v1428_v53, %v1366_v9  ;;  %v3966_v32 = vor.u32 %v4441_v56, %v3965_v27  ;;  %2103 = vmatpush.bf16.msra.mxu0 %v3970_v34  ;;  %v4469_v53 = vld [vmem:[%s6668_s3 + $0x10c] sm:$0xf0]  ;;  %v4082_v30 = vor.u32 %v4467_v20, %v4079_v25 }
 0x180   :  { %v1052_v31 = vpop.f32.mrf.mxu2  ;;  %2136 = vmatpush.bf16.msra.mxu2 %v4098_v8  ;;  %v4078_v22 = vor.u32 %v4469_v53, %v4077_v0  ;;  %v4199_v8 = vld [vmem:[%s6668_s3 + $0x1f8] sm:$0xf0] }
 0x181   :  { %v991_v41 = vpop.f32.mrf.mxu3  ;;  %v1053_v57 = vadd.f32 %v1052_v31, %v1019_v58  ;;  %v1022_v62 = vpop.f32.mrf.mxu0  ;;  %2037 = vmatpush.bf16.msra.mxu1 %v3966_v32 }
 0x182   :  { %2071 = vmatpush.bf16.msra.mxu3 %v4078_v22 }
 0x183   :  { %1252 = vst [vmem:[#allocation2 + $0x1e8] sm:$0xff] %v1053_v57  ;;  %2104 = vmatpush.bf16.msra.mxu0 %v3954_v50 }
 0x184   :  { %2137 = vmatpush.bf16.msra.mxu2 %v4082_v30 }
 0x185   :  { %v1068_v45 = vpop.f32.mrf.mxu1  ;;  %2038 = vmatpush.bf16.msra.mxu1 %v3950_v38 }
 0x188   :  { %v1055_v44 = vpop.f32.mrf.mxu2 }
 0x189   :  { %v1101_v52 = vpop.f32.mrf.mxu3  ;;  %v1024_v58 = vpop.f32.mrf.mxu0 }
 0x18a   :  { %v1102_v54 = vadd.f32 %v1101_v52, %v1068_v45 }
 0x18c   :  { %1197 = vst [vmem:[#allocation2 + $0x30] sm:$0xff] %v1102_v54 }
 0x18d   :  { %v1070_v6 = vpop.f32.mrf.mxu1 }
 0x190   :  { %v1057_v43 = vpop.f32.mrf.mxu2 }
 0x191   :  { %v1103_v14 = vpop.f32.mrf.mxu3  ;;  %v1134_v9 = vpop.f32.mrf.mxu0 }
 0x192   :  { %v1104_v35 = vadd.f32 %v1103_v14, %v1070_v6  ;;  %v4496_v6 = vld [vmem:[%s6668_s3 + $0x1ec] sm:$0xf] }
 0x193   :  { %v1459_v17 = vld [vmem:[#allocation2 + $0x30] sm:$0xc0] }
 0x194   :  { %v1493_v11 = vrot.slane %v1104_v35, 6  ;;  %v1492_v13 = vrot.slane %v1459_v17, 6  ;;  %v4069_v17 = vld [vmem:[%s6668_s3 + $0xe8] sm:$0xf] }
 0x195   :  { %v1073_v27 = vpop.f32.mrf.mxu1 }
 0x196   :  { %v1494_v56 = vsel %vm1491_vm3, %v1492_v13, %v1493_v11  ;;  %v4202_v13 = vor.u32 %v4496_v6, %v4199_v8  ;;  %v4053_v6 = vld [vmem:[%s6668_s3 + $0xc8] sm:$0xf] }
 0x197   :  { %v1536_v32 = vadd.f32 %v1494_v56, %v5434_v29 }
 0x198   :  { %v1167_v31 = vpop.f32.mrf.mxu2  ;;  %2262 = vmatpush.bf16.msrb.mxu2 %v4202_v13  ;;  %v4460_v13 = vld [vmem:[%s6668_s3 + $0xcc] sm:$0xf] }
 0x199   :  { %v1106_v41 = vpop.f32.mrf.mxu3  ;;  %v1168_v62 = vadd.f32 %v1167_v31, %v1134_v9  ;;  %v1136_v34 = vpop.f32.mrf.mxu0  ;;  %v1556_v48 = vmul.f32 %v5712_v33, %v1536_v32 }
 0x19a   :  { %v1107_v57 = vadd.f32 %v1106_v41, %v1073_v27  ;;  %v5751_v27 = vperm.slane %v1550_v21, 1  ;;  %v4181_v21 = vld [vmem:[%s6668_s3 + $0x1c8] sm:$0xf] }
 0x19b   :  { %1198 = vst [vmem:[#allocation2 + $0x38] sm:$0xff] %v1168_v62  ;;  %v1577_v37 = vadd.f32 %v5718_v61, %v1556_v48 }
 0x19c   :  { %v1498_v26 = vrot.slane %v1107_v57, 6  ;;  %v4464_v57 = vld [vmem:[%s6668_s3 + $0xec] sm:$0xf] }
 0x19d   :  { %v1075_v38 = vpop.f32.mrf.mxu1  ;;  %v1591_v60 = vmax.f32 %v1577_v37, 0.0  ;;  %v4183_v37 = vld [vmem:[%s6668_s3 + $0x1d8] sm:$0xf0] }
 0x19e   :  { %v1499_v36 = vsel %vm1491_vm3, %v1493_v11, %v1498_v26  ;;  %v4466_v11 = vld [vmem:[%s6668_s3 + $0xf4] sm:$0xf0] }
 0x19f   :  { %v1538_v29 = vadd.f32 %v1499_v36, %v5439_v16  ;;  %v4197_v16 = vld [vmem:[%s6668_s3 + $0x1e8] sm:$0xf]  ;;  %v4070_v53 = vor.u32 %v4466_v11, %v4069_v17 }
 0x1a0   :  { %v1169_v51 = vpop.f32.mrf.mxu2  ;;  %v4198_v9 = vor.u32 %v4498_v5, %v4197_v16 }
 0x1a1   :  { %v1108_v59 = vpop.f32.mrf.mxu3  ;;  %v1558_v3 = vmul.f32 %v5712_v33, %v1538_v29  ;;  %v1170_v46 = vadd.f32 %v1169_v51, %v1136_v34  ;;  %v1139_v50 = vpop.f32.mrf.mxu0  ;;  %2163 = vmatpush.bf16.msrb.mxu1 %v4070_v53  ;;  %v5758_v34 = vperm.slane %v3946_v15, 1  ;;  %v4492_v15 = vld [vmem:[%s6668_s3 + $0x1cc] sm:$0xf]  ;;  %v4055_v53 = vld [vmem:[%s6668_s3 + $0xd8] sm:$0xf0] }
 0x1a2   :  { %v1109_v45 = vadd.f32 %v1108_v59, %v1075_v38  ;;  %v1460_v54 = vld [vmem:[#allocation2 + $0x38] sm:$0xc0]  ;;  %2196 = vmatpush.bf16.msrb.mxu3 %v4198_v9  ;;  %v4494_v38 = vld [vmem:[%s6668_s3 + $0x1d4] sm:$0xf0] }
 0x1a3   :  { %v1579_v44 = vadd.f32 %v5718_v61, %v1558_v3  ;;  %v1496_v58 = vrot.slane %v1170_v46, 6  ;;  %v1495_v2 = vrot.slane %v1460_v54, 6  ;;  %v4182_v3 = vor.u32 %v4494_v38, %v4181_v21  ;;  %v4462_v9 = vld [vmem:[%s6668_s3 + $0xd4] sm:$0xf0]  ;;  %v4456_v21 = vld [vmem:[%s6668_s3 + $0xac] sm:$0xf] }
 0x1a4   :  { %v1502_v52 = vrot.slane %v1109_v45, 6  ;;  %v4186_v46 = vor.u32 %v4492_v15, %v4183_v37 }
 0x1a5   :  { %v1593_v1 = vmax.f32 %v1579_v44, 0.0  ;;  %v1078_v43 = vpop.f32.mrf.mxu1  ;;  %v1497_v35 = vsel %vm1491_vm3, %v1495_v2, %v1496_v58 }
 0x1a6   :  { %v1503_v39 = vsel %vm1491_vm3, %v1498_v26, %v1502_v52  ;;  %v1537_v25 = vadd.f32 %v1497_v35, %v5470_v47  ;;  %v4071_v47 = vld [vmem:[%s6668_s3 + $0xf8] sm:$0xf0]  ;;  %2197 = vmatpush.bf16.msrb.mxu3 %v4182_v3  ;;  %2263 = vmatpush.bf16.msrb.mxu2 %v4186_v46 }
 0x1a7   :  { %v5738_v14 = vpack.c.bf16 %v1593_v1, %v1591_v60  ;;  %v1540_v0 = vadd.f32 %v1503_v39, %v5467_v42  ;;  %v4074_v36 = vor.u32 %v4464_v57, %v4071_v47  ;;  %v4458_v47 = vld [vmem:[%s6668_s3 + $0xb4] sm:$0xf0] }
 0x1a8   :  { %v1172_v22 = vpop.f32.mrf.mxu2  ;;  %v1557_v62 = vmul.f32 %v5751_v27, %v1537_v25 }
 0x1a9   :  { %v1111_v20 = vpop.f32.mrf.mxu3  ;;  %2039 = vmatmul.bf16.vlgmr.msra.gmra.mxu1 %v5738_v14  ;;  %2105 = vmatmul.bf16.vlgmr.msra.gmra.mxu0 %v5738_v14  ;;  %v1173_v30 = vadd.f32 %v1172_v22, %v1139_v50  ;;  %v1141_v41 = vpop.f32.mrf.mxu0  ;;  %v1560_v42 = vmul.f32 %v5712_v33, %v1540_v0  ;;  %v4054_v0 = vor.u32 %v4462_v9, %v4053_v6 }
 0x1aa   :  { %v1112_v56 = vadd.f32 %v1111_v20, %v1078_v43  ;;  %2229 = vmatpush.bf16.msrb.mxu0 %v4074_v36  ;;  %v4165_v20 = vld [vmem:[%s6668_s3 + $0x1a8] sm:$0xf] }
 0x1ab   :  { %v1500_v32 = vrot.slane %v1173_v30, 6  ;;  %v1581_v45 = vadd.f32 %v5718_v61, %v1560_v42  ;;  %v4490_v30 = vld [vmem:[%s6668_s3 + $0x1b4] sm:$0xf0]  ;;  %2164 = vmatpush.bf16.msrb.mxu1 %v4054_v0  ;;  %v4058_v42 = vor.u32 %v4460_v13, %v4055_v53  ;;  %v4005_v0 = vld [vmem:[%s6668_s3 + $0x68] sm:$0xf] }
 0x1ac   :  { %v1506_v31 = vrot.slane %v1112_v56, 6 }
 0x1ad   :  { %v1501_v48 = vsel %vm1491_vm3, %v1496_v58, %v1500_v32  ;;  %v1080_v29 = vpop.f32.mrf.mxu1  ;;  %v1578_v58 = vadd.f32 %v5758_v34, %v1557_v62  ;;  %v1595_v16 = vmax.f32 %v1581_v45, 0.0  ;;  %v4037_v62 = vld [vmem:[%s6668_s3 + $0xa8] sm:$0xf] }
 0x1ae   :  { %v1507_v26 = vsel %vm1491_vm3, %v1502_v52, %v1506_v31  ;;  %v1539_v51 = vadd.f32 %v1501_v48, %v5496_v12  ;;  %v4038_v15 = vor.u32 %v4458_v47, %v4037_v62  ;;  %v4021_v45 = vld [vmem:[%s6668_s3 + $0x88] sm:$0xf]  ;;  %2230 = vmatpush.bf16.msrb.mxu0 %v4058_v42 }
 0x1af   :  { %v1542_v59 = vadd.f32 %v1507_v26, %v5494_v28  ;;  %v1592_v43 = vmax.f32 %v1578_v58, 0.0 }
 0x1b0   :  { %v1174_v44 = vpop.f32.mrf.mxu2  ;;  %v1559_v54 = vmul.f32 %v5751_v27, %v1539_v51  ;;  %v4486_v51 = vld [vmem:[%s6668_s3 + $0x194] sm:$0xf0]  ;;  %2165 = vmatpush.bf16.msrb.mxu1 %v4038_v15 }
 0x1b1   :  { %v1113_v50 = vpop.f32.mrf.mxu3  ;;  %v1562_v52 = vmul.f32 %v5712_v33, %v1542_v59  ;;  %v5785_v12 = vadd.f32 %v1174_v44, %v1141_v41  ;;  %v1144_v60 = vpop.f32.mrf.mxu0  ;;  %v4488_v41 = vld [vmem:[%s6668_s3 + $0x1ac] sm:$0xf]  ;;  %v4149_v59 = vld [vmem:[%s6668_s3 + $0x188] sm:$0xf]  ;;  %v4454_v44 = vld [vmem:[%s6668_s3 + $0x94] sm:$0xf0] }
 0x1b2   :  { %v5783_v28 = vadd.f32 %v1113_v50, %v1080_v29  ;;  %v1580_v2 = vadd.f32 %v5758_v34, %v1559_v54  ;;  %v4039_v29 = vld [vmem:[%s6668_s3 + $0xb8] sm:$0xf0]  ;;  %v4150_v50 = vor.u32 %v4486_v51, %v4149_v59 }
 0x1b3   :  { %v1583_v1 = vadd.f32 %v5718_v61, %v1562_v52  ;;  %v1504_v5 = vrot.slane %v5785_v12, 6  ;;  %v4042_v46 = vor.u32 %v4456_v21, %v4039_v29  ;;  %v4452_v52 = vld [vmem:[%s6668_s3 + $0x8c] sm:$0xf]  ;;  %v4023_v54 = vld [vmem:[%s6668_s3 + $0x98] sm:$0xf0] }
 0x1b4   :  { %v1510_v39 = vrot.slane %v5783_v28, 6  ;;  %v1594_v35 = vmax.f32 %v1580_v2, 0.0  ;;  %v4026_v9 = vor.u32 %v4452_v52, %v4023_v54  ;;  %v1274_v52 = vld [vmem:[#allocation2 + $0x148] sm:$0xff] }
 0x1b5   :  { %v1597_v8 = vmax.f32 %v1583_v1, 0.0  ;;  %v1505_v11 = vsel %vm1491_vm3, %v1500_v32, %v1504_v5  ;;  %v1083_v22 = vpop.f32.mrf.mxu1  ;;  %v4166_v32 = vor.u32 %v4490_v30, %v4165_v20  ;;  %v4133_v1 = vld [vmem:[%s6668_s3 + $0x168] sm:$0xf]  ;;  %2231 = vmatpush.bf16.msrb.mxu0 %v4042_v46  ;;  %v4450_v20 = vld [vmem:[%s6668_s3 + $0x74] sm:$0xf0] }
 0x1b6   :  { %v1511_v17 = vsel %vm1491_vm3, %v1506_v31, %v1510_v39  ;;  %v5810_v56 = vpack.c.bf16 %v1594_v35, %v1592_v43  ;;  %v4167_v31 = vld [vmem:[%s6668_s3 + $0x1b8] sm:$0xf0]  ;;  %v1541_v38 = vadd.f32 %v1505_v11, %v5531_v49  ;;  %v4006_v30 = vor.u32 %v4450_v20, %v4005_v0  ;;  %v4448_v46 = vld [vmem:[%s6668_s3 + $0x6c] sm:$0xf]  ;;  %v3973_v20 = vld [vmem:[%s6668_s3 + $0x28] sm:$0xf] }
 0x1b7   :  { %v5808_v25 = vpack.c.bf16 %v1597_v8, %v1595_v16  ;;  %v4170_v57 = vor.u32 %v4488_v41, %v4167_v31  ;;  %v1544_v36 = vadd.f32 %v1511_v17, %v5528_v40  ;;  %v4484_v40 = vld [vmem:[%s6668_s3 + $0x18c] sm:$0xf]  ;;  %v4151_v49 = vld [vmem:[%s6668_s3 + $0x198] sm:$0xf0]  ;;  %2198 = vmatpush.bf16.msrb.mxu3 %v4166_v32  ;;  %v4482_v8 = vld [vmem:[%s6668_s3 + $0x174] sm:$0xf0] }
 0x1b8   :  { %v1177_v48 = vpop.f32.mrf.mxu2  ;;  %2072 = vmatmul.bf16.vlgmr.msra.gmra.mxu3 %v5810_v56  ;;  %2138 = vmatmul.bf16.vlgmr.msra.gmra.mxu2 %v5810_v56  ;;  %v4154_v12 = vor.u32 %v4484_v40, %v4151_v49  ;;  %v1561_v6 = vmul.f32 %v5751_v27, %v1541_v38  ;;  %v4480_v17 = vld [vmem:[%s6668_s3 + $0x16c] sm:$0xf]  ;;  %v4135_v11 = vld [vmem:[%s6668_s3 + $0x178] sm:$0xf0] }
 0x1b9   :  { %v1116_v26 = vpop.f32.mrf.mxu3  ;;  %2044 = vmatmul.bf16.gmra.mxu1 %v5808_v25  ;;  %v5845_v37 = vadd.f32 %v1177_v48, %v1144_v60  ;;  %2110 = vmatmul.bf16.gmra.mxu0 %v5808_v25  ;;  %v4022_v60 = vor.u32 %v4454_v44, %v4021_v45  ;;  %v1146_v2 = vpop.f32.mrf.mxu0  ;;  %v1564_v16 = vmul.f32 %v5712_v33, %v1544_v36 }
 0x1ba   :  { %v5843_v3 = vadd.f32 %v1116_v26, %v1083_v22  ;;  %2264 = vmatpush.bf16.msrb.mxu2 %v4170_v57  ;;  %v4138_v22 = vor.u32 %v4480_v17, %v4135_v11  ;;  %v5899_v57 = vld [vmem:[#allocation2 + $0x198] sm:$0xff]  ;;  %2232 = vmatpush.bf16.msrb.mxu0 %v4026_v9 }
 0x1bb   :  { %v1508_v28 = vrot.slane %v5845_v37, 6  ;;  %2199 = vmatpush.bf16.msrb.mxu3 %v4150_v50  ;;  %2166 = vmatpush.bf16.msrb.mxu1 %v4022_v60  ;;  %v1585_v32 = vadd.f32 %v5718_v61, %v1564_v16  ;;  %v1334_v48 = vrot.slane %v5899_v57, 1  ;;  %v4007_v50 = vld [vmem:[%s6668_s3 + $0x78] sm:$0xf0]  ;;  %v4476_v60 = vld [vmem:[%s6668_s3 + $0x14c] sm:$0xf] }
 0x1bc   :  { %v1514_v58 = vrot.slane %v5843_v3, 6  ;;  %v4119_v16 = vld [vmem:[%s6668_s3 + $0x158] sm:$0xf0]  ;;  %v4446_v9 = vld [vmem:[%s6668_s3 + $0x54] sm:$0xf0] }
 0x1bd   :  { %v1509_v35 = vsel %vm1491_vm3, %v1504_v5, %v1508_v28  ;;  %v1085_v13 = vpop.f32.mrf.mxu1  ;;  %v4134_v5 = vor.u32 %v4482_v8, %v4133_v1  ;;  %v1599_v38 = vmax.f32 %v1585_v32, 0.0  ;;  %v1335_v45 = vsel %vm1309_vm1, %v1330_v7, %v1334_v48  ;;  %v4117_v7 = vld [vmem:[%s6668_s3 + $0x148] sm:$0xf]  ;;  %v4440_v3 = vld [vmem:[%s6668_s3 + $0x2c] sm:$0xf] }
 0x1be   :  { %v1515_v43 = vsel %vm1491_vm3, %v1510_v39, %v1514_v58  ;;  %v1543_v39 = vadd.f32 %v1509_v35, %v5567_v19  ;;  %2265 = vmatpush.bf16.msrb.mxu2 %v4154_v12  ;;  %v1582_v19 = vadd.f32 %v5758_v34, %v1561_v6  ;;  %v4478_v12 = vld [vmem:[%s6668_s3 + $0x154] sm:$0xf0]  ;;  %v1365_v1 = vadd.f32 %v1335_v45, %v1274_v52  ;;  %v3989_v6 = vld [vmem:[%s6668_s3 + $0x48] sm:$0xf] }
 0x1bf   :  { %v1546_v53 = vadd.f32 %v1515_v43, %v5565_v18  ;;  %2200 = vmatpush.bf16.msrb.mxu3 %v4134_v5  ;;  %2167 = vmatpush.bf16.msrb.mxu1 %v4006_v30  ;;  %v4122_v35 = vor.u32 %v4476_v60, %v4119_v16  ;;  %v3990_v0 = vor.u32 %v4446_v9, %v3989_v6  ;;  %v4101_v32 = vld [vmem:[%s6668_s3 + $0x128] sm:$0xf]  ;;  %v4470_v57 = vld [vmem:[%s6668_s3 + $0x114] sm:$0xf0] }
 0x1c0   :  { %v1179_v31 = vpop.f32.mrf.mxu2  ;;  %v1563_v18 = vmul.f32 %v5751_v27, %v1543_v39  ;;  %v1596_v29 = vmax.f32 %v1582_v19, 0.0  ;;  %v1456_v17 = vadd.f32 %v5645_v24, %v1365_v1  ;;  %v1276_v16 = vld [vmem:[#allocation2 + $0x188] sm:$0xff] }
 0x1c1   :  { %v1118_v41 = vpop.f32.mrf.mxu3  ;;  %v1566_v42 = vmul.f32 %v5712_v33, %v1546_v53  ;;  %v1180_v47 = vadd.f32 %v1179_v31, %v1146_v2  ;;  %v1149_v37 = vpop.f32.mrf.mxu0  ;;  %v4118_v2 = vor.u32 %v4478_v12, %v4117_v7  ;;  %v3991_v53 = vld [vmem:[%s6668_s3 + $0x58] sm:$0xf0] }
 0x1c2   :  { %v1119_v62 = vadd.f32 %v1118_v41, %v1085_v13  ;;  %v1584_v26 = vadd.f32 %v5758_v34, %v1563_v18  ;;  %2266 = vmatpush.bf16.msrb.mxu2 %v4138_v22  ;;  %v4444_v13 = vld [vmem:[%s6668_s3 + $0x4c] sm:$0xf]  ;;  %v4442_v22 = vld [vmem:[%s6668_s3 + $0x34] sm:$0xf0] }
 0x1c3   :  { %v1587_v21 = vadd.f32 %v5718_v61, %v1566_v42  ;;  %v1512_v36 = vrot.slane %v1180_v47, 6  ;;  %2201 = vmatpush.bf16.msrb.mxu3 %v4118_v2  ;;  %v3994_v5 = vor.u32 %v4444_v13, %v3991_v53  ;;  %v1292_v41 = vld [vmem:[#allocation2 + $0x1d8] sm:$0x1]  ;;  %2168 = vmatpush.bf16.msrb.mxu1 %v3990_v0  ;;  %v3974_v31 = vor.u32 %v4442_v22, %v3973_v20  ;;  %v3975_v42 = vld [vmem:[%s6668_s3 + $0x38] sm:$0xf0] }
 0x1c4   :  { %1253 = vst [vmem:[#allocation2 + $0x1f0] sm:$0xff] %v1119_v62  ;;  %v1598_v59 = vmax.f32 %v1584_v26, 0.0  ;;  %v4474_v18 = vld [vmem:[%s6668_s3 + $0x134] sm:$0xf0]  ;;  %v3978_v19 = vor.u32 %v4440_v3, %v3975_v42  ;;  %v4568_v22 = vmov 0.0|0.0  }
 0x1c5   :  { %v1601_v15 = vmax.f32 %v1587_v21, 0.0  ;;  %v1513_v51 = vsel %vm1491_vm3, %v1508_v28, %v1512_v36  ;;  %v4010_v28 = vor.u32 %v4448_v46, %v4007_v50  ;;  %v4102_v62 = vor.u32 %v4474_v18, %v4101_v32  ;;  %v4438_v47 = vld [vmem:[%s6668_s3 + $0x14] sm:$0xf0]  ;;  %v4436_v21 = vld [vmem:[%s6668_s3 + $0xc] sm:$0xf]  ;;  %v1088_v3 = vpop.f32.mrf.mxu1 }
 0x1c6   :  { %v5907_v49 = vpack.c.bf16 %v1598_v59, %v1596_v29  ;;  %v1545_v54 = vadd.f32 %v1513_v51, %v5593_v10  ;;  %2267 = vmatpush.bf16.msrb.mxu2 %v4122_v35  ;;  %v3959_v59 = vld [vmem:[%s6668_s3 + $0x18] sm:$0xf0]  ;;  %v4472_v51 = vld [vmem:[%s6668_s3 + $0x12c] sm:$0xf] }
 0x1c7   :  { %v5905_v40 = vpack.c.bf16 %v1601_v15, %v1599_v38  ;;  %2233 = vmatpush.bf16.msrb.mxu0 %v4010_v28  ;;  %2202 = vmatpush.bf16.msrb.mxu3 %v4102_v62  ;;  %v3962_v28 = vor.u32 %v4436_v21, %v3959_v59 }
 0x1c8   :  { %v1182_v44 = vpop.f32.mrf.mxu2  ;;  %2077 = vmatmul.bf16.gmra.mxu3 %v5907_v49  ;;  %2143 = vmatmul.bf16.gmra.mxu2 %v5907_v49  ;;  %v1565_v11 = vmul.f32 %v5751_v27, %v1545_v54  ;;  %v1338_v54 = vrot.slane %v1292_v41, 1 }
 0x1c9   :  { %2049 = vmatmul.bf16.gmra.mxu1 %v5905_v40  ;;  %v5923_v55 = vadd.f32 %v1182_v44, %v1149_v37  ;;  %2115 = vmatmul.bf16.gmra.mxu0 %v5905_v40  ;;  %v1151_v26 = vpop.f32.mrf.mxu0  ;;  %v4103_v37 = vld [vmem:[%s6668_s3 + $0x138] sm:$0xf0]  ;;  %v1383_v44 = vld [vmem:[#allocation2 + $0x1e8] sm:$0x1f] }
 0x1ca   :  { %v1586_v29 = vadd.f32 %v5758_v34, %v1565_v11  ;;  %v4106_v46 = vor.u32 %v4472_v51, %v4103_v37  ;;  %2169 = vmatpush.bf16.msrb.mxu1 %v3974_v31  ;;  %v4291_v51 = vld [vmem:[%s6670_s5 + $0xb4] sm:$0xf0] }
 0x1cb   :  { %v1473_v10 = vld [vmem:[#allocation2 + $0x1f0] sm:$0x3f]  ;;  %v1516_v43 = vrot.slane %v5923_v55, 6  ;;  %2234 = vmatpush.bf16.msrb.mxu0 %v3994_v5 }
 0x1cc   :  { %v1518_v8 = vrot.slane %v1473_v10, 6  ;;  %2268 = vmatpush.bf16.msrb.mxu2 %v4106_v46  ;;  %v1600_v12 = vmax.f32 %v1586_v29, 0.0  ;;  %v1429_v10 = vrot.slane %v1383_v44, 5  ;;  %v4520_v29 = vld [vmem:[%s6670_s5 + $0xac] sm:$0xf] }
 0x1cd   :  { %v1517_v24 = vsel %vm1491_vm3, %v1512_v36, %v1516_v43  ;;  %v1090_v55 = vpop.f32.mrf.mxu1  ;;  %v4294_v37 = vor.u32 %v4520_v29, %v4291_v51  ;;  %v4241_v51 = vld [vmem:[%s6670_s5 + $0x48] sm:$0xf] }
 0x1ce   :  { %v1519_v39 = vsel %vm1491_vm3, %v1514_v58, %v1518_v8  ;;  %v1547_v30 = vadd.f32 %v1517_v24, %v1456_v17  ;;  %v1430_v6 = vsel %vm1400_vm2, %v1425_v63, %v1429_v10  ;;  %v4085_v8 = vld [vmem:[%s6668_s3 + $0x108] sm:$0xf]  ;;  %v4253_v55 = vld [vmem:[%s6670_s5 + $0x60] sm:$0xf] }
 0x1cf   :  { %v1548_v58 = vadd.f32 %v1519_v39, %v5640_v23  ;;  %v3957_v23 = vld [vmem:[%s6668_s3 + $0x8] sm:$0xf]  ;;  %2235 = vmatpush.bf16.msrb.mxu0 %v3978_v19  ;;  %v4086_v17 = vor.u32 %v4470_v57, %v4085_v8  ;;  %v4515_v57 = vld [vmem:[%s6670_s5 + $0x80] sm:$0xf0] }
 0x1d0   :  { %v1184_v36 = vpop.f32.mrf.mxu2  ;;  %v1567_v15 = vmul.f32 %v5751_v27, %v1547_v30  ;;  %v3958_v52 = vor.u32 %v4438_v47, %v3957_v23 }
 0x1d1   :  { %v1568_v38 = vmul.f32 %v5712_v33, %v1548_v58  ;;  %v1185_v45 = vadd.f32 %v1184_v36, %v1151_v26  ;;  %2203 = vmatpush.bf16.msrb.mxu3 %v4086_v17  ;;  %v1154_v58 = vpop.f32.mrf.mxu0 }
 0x1d2   :  { %v1588_v50 = vadd.f32 %v5758_v34, %v1567_v15  ;;  %2170 = vmatpush.bf16.msrb.mxu1 %v3958_v52  ;;  %v4521_v15 = vld [vmem:[%s6670_s5 + $0xb0] sm:$0xf0]  ;;  %v4277_v52 = vld [vmem:[%s6670_s5 + $0x90] sm:$0xf] }
 0x1d3   :  { %v1589_v33 = vadd.f32 %v5718_v61, %v1568_v38  ;;  %1254 = vst [vmem:[#allocation2 + $0x1f8] sm:$0xff] %v1185_v45  ;;  %v1339_v61 = vsel %vm1309_vm1, %v1334_v48, %v1338_v54  ;;  %2236 = vmatpush.bf16.msrb.mxu0 %v3962_v28  ;;  %v4468_v48 = vld [vmem:[%s6668_s3 + $0x10c] sm:$0xf]  ;;  %v4289_v38 = vld [vmem:[%s6670_s5 + $0xa8] sm:$0xf]  ;;  %s4571_s3 = smov 96  }
 0x1d4   :  { %v1602_v60 = vmax.f32 %v1588_v50, 0.0  ;;  %v1367_v35 = vadd.f32 %v1339_v61, %v1276_v16  ;;  %v4090_v11 = vor.u32 %v4468_v48, %v4087_v4  ;;  %v4290_v59 = vor.u32 %v4521_v15, %v4289_v38  ;;  %v4518_v54 = vld [vmem:[%s6670_s5 + $0x98] sm:$0xf0]  ;;  %v4517_v61 = vld [vmem:[%s6670_s5 + $0x94] sm:$0xf] }
 0x1d5   :  { %v1603_v7 = vmax.f32 %v1589_v33, 0.0  ;;  %2712 = vmatpush.bf16.msra.mxu3 %v4294_v37  ;;  %v4278_v28 = vor.u32 %v4518_v54, %v4277_v52  ;;  %v4279_v16 = vld [vmem:[%s6670_s5 + $0x9c] sm:$0xf0]  ;;  %v4522_v38 = vld [vmem:[%s6670_s5 + $0xb8] sm:$0xf0] }
 0x1d6   :  { %v1642_v2 = vpack.c.bf16 %v1602_v60, %v1600_v12  ;;  %v1458_v0 = vadd.f32 %v1430_v6, %v1367_v35  ;;  %2269 = vmatpush.bf16.msrb.mxu2 %v4090_v11  ;;  %2679 = vmatpush.bf16.msra.mxu1 %v4290_v59  ;;  %v4265_v6 = vld [vmem:[%s6670_s5 + $0x78] sm:$0xf]  ;;  %v4282_v8 = vor.u32 %v4517_v61, %v4279_v16  ;;  %v4509_v37 = vld [vmem:[%s6670_s5 + $0x50] sm:$0xf0]  ;;  %v4519_v52 = vld [vmem:[%s6670_s5 + $0xa0] sm:$0xf0] }
 0x1d7   :  { %v1643_v1 = vpack.c.bf16 0.0, %v1603_v7  ;;  %v4273_v16 = vld [vmem:[%s6670_s5 + $0x80] sm:$0xf] }
 0x1d8   :  { %2082 = vmatmul.bf16.gmra.mxu3 %v1642_v2  ;;  %2148 = vmatmul.bf16.gmra.mxu2 %v1642_v2 }
 0x1d9   :  { %2054 = vmatmul.bf16.gmra.mxu1 %v1643_v1  ;;  %2120 = vmatmul.bf16.gmra.mxu0 %v1643_v1  ;;  %v1156_v30 = vpop.f32.mrf.mxu0 }
 0x1da   :  { %v1474_v9 = vld [vmem:[#allocation2 + $0x1f8] sm:$0x3f]  ;;  %2680 = vmatpush.bf16.msra.mxu1 %v4278_v28  ;;  %2713 = vmatpush.bf16.msra.mxu3 %v4282_v8  ;;  %v4512_v30 = vld [vmem:[%s6670_s5 + $0x68] sm:$0xf0] }
 0x1db   :  { %v1520_v63 = vrot.slane %v1474_v9, 6  ;;  %v4266_v9 = vor.u32 %v4515_v57, %v4265_v6  ;;  %v4516_v6 = vld [vmem:[%s6670_s5 + $0x88] sm:$0xf0] }
 0x1dc   :  { %v4274_v57 = vor.u32 %v4516_v6, %v4273_v16  ;;  %v4207_v16 = vld [vmem:[%s6670_s5 + $0xc] sm:$0xf0]  ;;  %v4213_v6 = vld [vmem:[%s6670_s5 + $0x8] sm:$0xf] }
 0x1dd   :  { %v1521_v13 = vsel %vm1491_vm3, %v1516_v43, %v1520_v63 }
 0x1de   :  { %v1549_v53 = vadd.f32 %v1521_v13, %v1458_v0  ;;  %2681 = vmatpush.bf16.msra.mxu1 %v4266_v9  ;;  %v4229_v9 = vld [vmem:[%s6670_s5 + $0x30] sm:$0xf] }
 0x1e0   :  { %v1569_v39 = vmul.f32 %v5751_v27, %v1549_v53  ;;  %v1121_v27 = vpop.f32.mrf.mxu3 }
 0x1e2   :  { %v1590_v24 = vadd.f32 %v5758_v34, %v1569_v39  ;;  %v1187_v34 = vpop.f32.mrf.mxu2  ;;  %v4514_v39 = vld [vmem:[%s6670_s5 + $0x7c] sm:$0xf] }
 0x1e4   :  { %v1604_v5 = vmax.f32 %v1590_v24, 0.0  ;;  %v4267_v24 = vld [vmem:[%s6670_s5 + $0x84] sm:$0xf0] }
 0x1e6   :  { %v1644_v20 = vpack.c.bf16 0.0, %v1604_v5  ;;  %v4270_v5 = vor.u32 %v4514_v39, %v4267_v24  ;;  %v4249_v24 = vld [vmem:[%s6670_s5 + $0x50] sm:$0xf] }
 0x1e8   :  { %2087 = vmatmul.bf16.gmra.mxu3 %v1644_v20  ;;  %2153 = vmatmul.bf16.gmra.mxu2 %v1644_v20  ;;  %v1123_v43 = vpop.f32.mrf.mxu3 }
 0x1e9   :  { %2059 = vmatmul.bf16.gmra.mxu1 %v4568_v22  ;;  %2125 = vmatmul.bf16.gmra.mxu0 %v4568_v22  ;;  %v4254_v43 = vor.u32 %v4512_v30, %v4253_v55 }
 0x1ea   :  { %v1189_v41 = vpop.f32.mrf.mxu2  ;;  %2714 = vmatpush.bf16.msra.mxu3 %v4270_v5  ;;  %v4510_v5 = vld [vmem:[%s6670_s5 + $0x58] sm:$0xf0] }
 0x1eb   :  { %2682 = vmatpush.bf16.msra.mxu1 %v4254_v43  ;;  %v4250_v55 = vor.u32 %v4510_v5, %v4249_v24  ;;  %v4231_v43 = vld [vmem:[%s6670_s5 + $0x3c] sm:$0xf0] }
 0x1f8   :  { %2092 = vmatmul.bf16.gmra.mxu3 %v4568_v22  ;;  %2158 = vmatmul.bf16.gmra.mxu2 %v4568_v22 }
 0x1f9   :  { %2171 = vmatmul.bf16.vlgmr.msrb.gmra.mxu1 %v5738_v14  ;;  %2237 = vmatmul.bf16.vlgmr.msrb.gmra.mxu0 %v5738_v14 }
 0x208   :  { %2204 = vmatmul.bf16.vlgmr.msrb.gmra.mxu3 %v5810_v56  ;;  %2270 = vmatmul.bf16.vlgmr.msrb.gmra.mxu2 %v5810_v56 }
 0x209   :  { %2176 = vmatmul.bf16.gmra.mxu1 %v5808_v25  ;;  %2242 = vmatmul.bf16.gmra.mxu0 %v5808_v25 }
 0x218   :  { %2209 = vmatmul.bf16.gmra.mxu3 %v5907_v49  ;;  %2275 = vmatmul.bf16.gmra.mxu2 %v5907_v49 }
 0x219   :  { %2181 = vmatmul.bf16.gmra.mxu1 %v5905_v40  ;;  %2247 = vmatmul.bf16.gmra.mxu0 %v5905_v40 }
 0x226   :  { %v2040_v14 = vpop.f32.mrf.mxu1  ;;  %v2106_v31 = vpop.f32.mrf.mxu0 }
 0x228   :  { %2214 = vmatmul.bf16.gmra.mxu3 %v1642_v2  ;;  %2280 = vmatmul.bf16.gmra.mxu2 %v1642_v2 }
 0x229   :  { %2186 = vmatmul.bf16.gmra.mxu1 %v1643_v1  ;;  %2252 = vmatmul.bf16.gmra.mxu0 %v1643_v1 }
 0x22e   :  { %v6039_v42 = vpop.f32.mrf.mxu1  ;;  %v6041_v32 = vpop.f32.mrf.mxu0 }
 0x236   :  { %v2045_v25 = vpop.f32.mrf.mxu1  ;;  %v2111_v56 = vpop.f32.mrf.mxu0 }
 0x238   :  { %2219 = vmatmul.bf16.gmra.mxu3 %v1644_v20  ;;  %2285 = vmatmul.bf16.gmra.mxu2 %v1644_v20 }
 0x239   :  { %2191 = vmatmul.bf16.gmra.mxu1 %v4568_v22  ;;  %2257 = vmatmul.bf16.gmra.mxu0 %v4568_v22 }
 0x23b   :  { %v2073_v40 = vpop.f32.mrf.mxu3  ;;  %v2139_v18 = vpop.f32.mrf.mxu2 }
 0x23c   :  { %v6045_v49 = vadd.f32 %v2073_v40, %v2040_v14  ;;  %v2140_v19 = vadd.f32 %v2139_v18, %v2106_v31  ;;  %v4511_v14 = vld [vmem:[%s6670_s5 + $0x64] sm:$0xf]  ;;  %v4255_v31 = vld [vmem:[%s6670_s5 + $0x6c] sm:$0xf0] }
 0x23e   :  { %v6047_v62 = vpop.f32.mrf.mxu1  ;;  %v2113_v23 = vpop.f32.mrf.mxu0  ;;  %2296 = vst [vmem:[#allocation2 + $0x8] sm:$0xff] %v2140_v19 }
 0x243   :  { %v6049_v47 = vpop.f32.mrf.mxu3  ;;  %v6051_v21 = vpop.f32.mrf.mxu2 }
 0x246   :  { %v2050_v26 = vpop.f32.mrf.mxu1  ;;  %v2116_v36 = vpop.f32.mrf.mxu0 }
 0x248   :  { %2224 = vmatmul.bf16.gmra.mxu3 %v4568_v22  ;;  %2290 = vmatmul.bf16.gmra.mxu2 %v4568_v22 }
 0x24b   :  { %v2078_v45 = vpop.f32.mrf.mxu3  ;;  %v2144_v33 = vpop.f32.mrf.mxu2 }
 0x24c   :  { %v2079_v46 = vadd.f32 %v2078_v45, %v2045_v25  ;;  %v6077_v12 = vadd.f32 %v2144_v33, %v2111_v56  ;;  %v4258_v25 = vor.u32 %v4511_v14, %v4255_v31  ;;  %v4508_v45 = vld [vmem:[%s6670_s5 + $0x4c] sm:$0xf]  ;;  %v4243_v33 = vld [vmem:[%s6670_s5 + $0x54] sm:$0xf0]  ;;  %v4503_v31 = vld [vmem:[%s6670_s5 + $0x20] sm:$0xf0] }
 0x24d   :  { %v4246_v54 = vor.u32 %v4508_v45, %v4243_v33 }
 0x24e   :  { %v6067_v50 = vpop.f32.mrf.mxu1  ;;  %v2118_v44 = vpop.f32.mrf.mxu0  ;;  %v2357_v48 = vrot.slane %v6077_v12, 1  ;;  %2715 = vmatpush.bf16.msra.mxu3 %v4258_v25  ;;  %v4237_v25 = vld [vmem:[%s6670_s5 + $0x38] sm:$0xf] }
 0x252   :  { %2716 = vmatpush.bf16.msra.mxu3 %v4246_v54  ;;  %v4205_v54 = vld [vmem:[%s6670_s5] sm:$0xf] }
 0x253   :  { %v6075_v7 = vpop.f32.mrf.mxu3  ;;  %v2146_v60 = vpop.f32.mrf.mxu2 }
 0x254   :  { %v6079_v10 = vadd.f32 %v2146_v60, %v2113_v23 }
 0x256   :  { %v6081_v1 = vpop.f32.mrf.mxu1  ;;  %v6083_v2 = vpop.f32.mrf.mxu0  ;;  %v2359_v35 = vrot.slane %v6079_v10, 1 }
 0x258   :  { %v2360_v17 = vsel %vm1309_vm1, %v2357_v48, %v2359_v35 }
 0x259   :  { %v6104_v63 = vadd.f32 %v2360_v17, %v2079_v46  ;;  %v4242_v46 = vor.u32 %v4509_v37, %v4241_v51  ;;  %v4506_v17 = vld [vmem:[%s6670_s5 + $0x38] sm:$0xf0]  ;;  %v4219_v51 = vld [vmem:[%s6670_s5 + $0x24] sm:$0xf0]  ;;  %v4225_v37 = vld [vmem:[%s6670_s5 + $0x20] sm:$0xf] }
 0x25b   :  { %v2083_v4 = vpop.f32.mrf.mxu3  ;;  %v2149_v0 = vpop.f32.mrf.mxu2  ;;  %2683 = vmatpush.bf16.msra.mxu1 %v4242_v46  ;;  %v4504_v46 = vld [vmem:[%s6670_s5 + $0x28] sm:$0xf0] }
 0x25c   :  { %v2084_v11 = vadd.f32 %v2083_v4, %v2050_v26  ;;  %v6112_v20 = vadd.f32 %v2149_v0, %v2116_v36  ;;  %v4297_v36 = vld [vmem:[%s6670_s5 + $0xb0] sm:$0xf]  ;;  %v4230_v4 = vor.u32 %v4506_v17, %v4229_v9  ;;  %v4513_v0 = vld [vmem:[%s6670_s5 + $0x70] sm:$0xf0]  ;;  %v4226_v33 = vor.u32 %v4504_v46, %v4225_v37 }
 0x25d   :  { %v4298_v29 = vor.u32 %v4522_v38, %v4297_v36 }
 0x25e   :  { %v2057_v13 = vpop.f32.mrf.mxu1  ;;  %v2123_v53 = vpop.f32.mrf.mxu0  ;;  %v2361_v56 = vrot.slane %v6112_v20, 1 }
 0x25f   :  { %2745 = vmatpush.bf16.msra.mxu0 %v4298_v29  ;;  %2684 = vmatpush.bf16.msra.mxu1 %v4230_v4  ;;  %v2142_v4 = vadd.f32 %v6051_v21, %v6041_v32 }
 0x261   :  { %v2355_v24 = vrot.slane %v2142_v4, 1 }
 0x263   :  { %v6114_v3 = vpop.f32.mrf.mxu3  ;;  %v2151_v58 = vpop.f32.mrf.mxu2  ;;  %v2358_v46 = vsel %vm1309_vm1, %v2355_v24, %v2357_v48 }
 0x264   :  { %v6122_v27 = vadd.f32 %v2151_v58, %v2118_v44  ;;  %v4285_v44 = vld [vmem:[%s6670_s5 + $0x98] sm:$0xf] }
 0x265   :  { %v4286_v28 = vor.u32 %v4519_v52, %v4285_v44 }
 0x266   :  { %v2060_v34 = vpop.f32.mrf.mxu1  ;;  %v2126_v41 = vpop.f32.mrf.mxu0  ;;  %v2363_v40 = vrot.slane %v6122_v27, 1 }
 0x267   :  { %2746 = vmatpush.bf16.msra.mxu0 %v4286_v28  ;;  %v4505_v34 = vld [vmem:[%s6670_s5 + $0x34] sm:$0xf]  ;;  %v4217_v41 = vld [vmem:[%s6670_s5 + $0x18] sm:$0xf]  ;;  %v4500_v28 = vld [vmem:[%s6670_s5 + $0x8] sm:$0xf0] }
 0x268   :  { %v2364_v18 = vsel %vm1309_vm1, %v2361_v56, %v2363_v40  ;;  %v4234_v14 = vor.u32 %v4505_v34, %v4231_v43  ;;  %v4218_v36 = vor.u32 %v4503_v31, %v4217_v41 }
 0x269   :  { %v6137_v19 = vadd.f32 %v2364_v18, %v2084_v11  ;;  %v4261_v11 = vld [vmem:[%s6670_s5 + $0x68] sm:$0xf]  ;;  %v4507_v18 = vld [vmem:[%s6670_s5 + $0x40] sm:$0xf0] }
 0x26a   :  { %v4262_v13 = vor.u32 %v4513_v0, %v4261_v11  ;;  %v4238_v38 = vor.u32 %v4507_v18, %v4237_v25  ;;  %2717 = vmatpush.bf16.msra.mxu3 %v4234_v14  ;;  %2685 = vmatpush.bf16.msra.mxu1 %v4218_v36 }
 0x26b   :  { %v6139_v23 = vpop.f32.mrf.mxu3  ;;  %v6141_v26 = vpop.f32.mrf.mxu2  ;;  %2747 = vmatpush.bf16.msra.mxu0 %v4274_v57 }
 0x26e   :  { %v2062_v15 = vpop.f32.mrf.mxu1  ;;  %v2128_v59 = vpop.f32.mrf.mxu0 }
 0x26f   :  { %2748 = vmatpush.bf16.msra.mxu0 %v4262_v13  ;;  %v4502_v59 = vld [vmem:[%s6670_s5 + $0x1c] sm:$0xf] }
 0x270   :  { %v4222_v45 = vor.u32 %v4502_v59, %v4219_v51 }
 0x272   :  { %2718 = vmatpush.bf16.msra.mxu3 %v4222_v45 }
 0x273   :  { %v2090_v60 = vpop.f32.mrf.mxu3  ;;  %v2156_v61 = vpop.f32.mrf.mxu2  ;;  %2749 = vmatpush.bf16.msra.mxu0 %v4250_v55 }
 0x274   :  { %v2157_v8 = vadd.f32 %v2156_v61, %v2123_v53  ;;  %v4499_v60 = vld [vmem:[%s6670_s5 + $0x4] sm:$0xf]  ;;  %v4206_v61 = vor.u32 %v4500_v28, %v4205_v54  ;;  %v6253_v54 = vld [vmem:[%s6669_s4] ss:$0 sm:$0xff] }
 0x275   :  { %v4210_v57 = vor.u32 %v4499_v60, %v4207_v16 }
 0x276   :  { %2324 = vst [vmem:[#allocation2 + $0x1c8] sm:$0xff] %v2157_v8  ;;  %v2172_v58 = vpop.f32.mrf.mxu1  ;;  %v2238_v30 = vpop.f32.mrf.mxu0  ;;  %v4501_v8 = vld [vmem:[%s6670_s5 + $0x10] sm:$0xf0]  ;;  %2686 = vmatpush.bf16.msra.mxu1 %v4206_v61 }
 0x277   :  { %2750 = vmatpush.bf16.msra.mxu0 %v4238_v38  ;;  %v4214_v9 = vor.u32 %v4501_v8, %v4213_v6  ;;  %2719 = vmatpush.bf16.msra.mxu3 %v4210_v57 }
 0x27b   :  { %v2093_v53 = vpop.f32.mrf.mxu3  ;;  %v2159_v39 = vpop.f32.mrf.mxu2  ;;  %2751 = vmatpush.bf16.msra.mxu0 %v4226_v33 }
 0x27c   :  { %v2338_v53 = vld [vmem:[#allocation2 + $0x8] sm:$0xfe] }
 0x27d   :  { %v2354_v39 = vrot.slane %v2338_v53, 1 }
 0x27e   :  { %v2174_v44 = vpop.f32.mrf.mxu1  ;;  %v2240_v52 = vpop.f32.mrf.mxu0 }
 0x27f   :  { %2752 = vmatpush.bf16.msra.mxu0 %v4214_v9  ;;  %v2356_v14 = vsel %vm1309_vm1, %v2354_v39, %v2355_v24 }
 0x283   :  { %v2095_v15 = vpop.f32.mrf.mxu3  ;;  %v2161_v29 = vpop.f32.mrf.mxu2 }
 0x286   :  { %v2177_v5 = vpop.f32.mrf.mxu1  ;;  %v2243_v55 = vpop.f32.mrf.mxu0 }
 0x28b   :  { %v2205_v17 = vpop.f32.mrf.mxu3  ;;  %v2271_v0 = vpop.f32.mrf.mxu2 }
 0x28c   :  { %v2206_v11 = vadd.f32 %v2205_v17, %v2172_v58  ;;  %v2272_v13 = vadd.f32 %v2271_v0, %v2238_v30  ;;  %v2376_v30 = vadd.f32 %v2356_v14, %v6045_v49 }
 0x28e   :  { %2297 = vst [vmem:[#allocation2 + $0x10] sm:$0xff] %v2206_v11  ;;  %v2179_v29 = vpop.f32.mrf.mxu1  ;;  %v2245_v51 = vpop.f32.mrf.mxu0 }
 0x28f   :  { %2298 = vst [vmem:[#allocation2 + $0x18] sm:$0xff] %v2272_v13 }
 0x293   :  { %v2207_v34 = vpop.f32.mrf.mxu3  ;;  %v2273_v41 = vpop.f32.mrf.mxu2 }
 0x294   :  { %v2208_v43 = vadd.f32 %v2207_v34, %v2174_v44  ;;  %v2274_v31 = vadd.f32 %v2273_v41, %v2240_v52  ;;  %v2076_v44 = vadd.f32 %v6049_v47, %v6039_v42  ;;  %v6260_v42 = vld [vmem:[%s6669_s4 + $0x1] ss:$0 sm:$0xff]  ;;  %s4569_s4 = smov 32  }
 0x295   :  { %v2383_v25 = vld [vmem:[#allocation2 + $0x10] sm:$0xe0] }
 0x296   :  { %2301 = vst [vmem:[#allocation2 + $0x50] sm:$0xff] %v2208_v43  ;;  %v2399_v32 = vrot.slane %v2383_v25, 5  ;;  %v2400_v21 = vrot.slane %v2208_v43, 5  ;;  %v2428_v58 = vld [vmem:[#allocation2 + $0x18] sm:$0xc0]  ;;  %v2445_v38 = vrot.slane %v2274_v31, 6  ;;  %v2377_v60 = vadd.f32 %v2358_v46, %v2076_v44  ;;  %v2182_v17 = vpop.f32.mrf.mxu1  ;;  %v2248_v13 = vpop.f32.mrf.mxu0 }
 0x297   :  { %v2444_v36 = vrot.slane %v2428_v58, 6  ;;  %v2081_v58 = vadd.f32 %v6075_v7, %v6047_v62  ;;  %v2155_v7 = vadd.f32 %v6141_v26, %v6083_v2 }
 0x298   :  { %v2401_v18 = vsel %vm1400_vm2, %v2399_v32, %v2400_v21  ;;  %v2362_v32 = vsel %vm1309_vm1, %v2359_v35, %v2361_v56 }
 0x299   :  { %v2421_v15 = vadd.f32 %v2401_v18, %v2376_v30  ;;  %v2446_v33 = vsel %vm1491_vm3, %v2444_v36, %v2445_v38 }
 0x29b   :  { %v2210_v59 = vpop.f32.mrf.mxu3  ;;  %v2276_v45 = vpop.f32.mrf.mxu2  ;;  %v2466_v52 = vadd.f32 %v2446_v33, %v2421_v15 }
 0x29c   :  { %v2211_v37 = vadd.f32 %v2210_v59, %v2177_v5  ;;  %v2277_v49 = vadd.f32 %v2276_v45, %v2243_v55 }
 0x29d   :  { %v2475_v48 = vmul.f32 %v6253_v54, %v2466_v52  ;;  %v2365_v52 = vrot.slane %v2155_v7, 1 }
 0x29e   :  { %2305 = vst [vmem:[#allocation2 + $0x90] sm:$0xff] %v2211_v37  ;;  %v2402_v28 = vrot.slane %v2211_v37, 5  ;;  %v2447_v61 = vrot.slane %v2277_v49, 6  ;;  %v2184_v36 = vpop.f32.mrf.mxu1  ;;  %v2250_v20 = vpop.f32.mrf.mxu0 }
 0x29f   :  { %v2484_v0 = vadd.f32 %v6260_v42, %v2475_v48 }
 0x2a0   :  { %v2403_v12 = vsel %vm1400_vm2, %v2400_v21, %v2402_v28  ;;  %v2448_v47 = vsel %vm1491_vm3, %v2445_v38, %v2447_v61  ;;  %v2379_v38 = vadd.f32 %v2362_v32, %v2081_v58 }
 0x2a1   :  { %v2422_v16 = vadd.f32 %v2403_v12, %v2377_v60  ;;  %v2491_v55 = vmax.f32 %v2484_v0, 0.0 }
 0x2a3   :  { %v2212_v6 = vpop.f32.mrf.mxu3  ;;  %v2467_v8 = vadd.f32 %v2448_v47, %v2422_v16  ;;  %v2278_v9 = vpop.f32.mrf.mxu2 }
 0x2a4   :  { %v2213_v57 = vadd.f32 %v2212_v6, %v2179_v29  ;;  %v2279_v4 = vadd.f32 %v2278_v9, %v2245_v51 }
 0x2a5   :  { %v2476_v11 = vmul.f32 %v6253_v54, %v2467_v8 }
 0x2a6   :  { %2309 = vst [vmem:[#allocation2 + $0xd0] sm:$0xff] %v2213_v57  ;;  %v2404_v53 = vrot.slane %v2213_v57, 5  ;;  %v2449_v5 = vrot.slane %v2279_v4, 6  ;;  %v2253_v26 = vpop.f32.mrf.mxu0  ;;  %v2366_v57 = vsel %vm1309_vm1, %v2363_v40, %v2365_v52 }
 0x2a7   :  { %2310 = vst [vmem:[#allocation2 + $0xd8] sm:$0xff] %v2279_v4  ;;  %v2485_v39 = vadd.f32 %v6260_v42, %v2476_v11 }
 0x2a8   :  { %v2405_v24 = vsel %vm1400_vm2, %v2402_v28, %v2404_v53  ;;  %v2450_v21 = vsel %vm1491_vm3, %v2447_v61, %v2449_v5  ;;  %v2187_v61 = vpop.f32.mrf.mxu1 }
 0x2a9   :  { %v2492_v34 = vmax.f32 %v2485_v39, 0.0  ;;  %v2423_v43 = vadd.f32 %v2405_v24, %v6104_v63 }
 0x2ab   :  { %v2215_v41 = vpop.f32.mrf.mxu3  ;;  %v2514_v14 = vpack.c.bf16 %v2492_v34, %v2491_v55  ;;  %v2281_v25 = vpop.f32.mrf.mxu2  ;;  %v2468_v18 = vadd.f32 %v2450_v21, %v2423_v43 }
 0x2ac   :  { %v2216_v31 = vadd.f32 %v2215_v41, %v2182_v17  ;;  %v2282_v30 = vadd.f32 %v2281_v25, %v2248_v13  ;;  %v2086_v17 = vadd.f32 %v6114_v3, %v6067_v50 }
 0x2ad   :  { %2687 = vmatmul.bf16.vlgmr.msra.gmra.mxu1 %v2514_v14  ;;  %2720 = vmatmul.bf16.vlgmr.msra.gmra.mxu3 %v2514_v14  ;;  %v2477_v35 = vmul.f32 %v6253_v54, %v2468_v18 }
 0x2ae   :  { %2313 = vst [vmem:[#allocation2 + $0x110] sm:$0xff] %v2216_v31  ;;  %2753 = vmatmul.bf16.vlgmr.msra.gmra.mxu0 %v2514_v14  ;;  %v2406_v63 = vrot.slane %v2216_v31, 5  ;;  %v2451_v15 = vrot.slane %v2282_v30, 6  ;;  %v2381_v0 = vadd.f32 %v2366_v57, %v2086_v17  ;;  %v2255_v3 = vpop.f32.mrf.mxu0  ;;  %v2345_v31 = vld [vmem:[#allocation2 + $0x1c8] sm:$0x1] }
 0x2af   :  { %v2486_v33 = vadd.f32 %v6260_v42, %v2477_v35  ;;  %v2367_v32 = vrot.slane %v2345_v31, 1 }
 0x2b0   :  { %v2407_v10 = vsel %vm1400_vm2, %v2404_v53, %v2406_v63  ;;  %v2452_v56 = vsel %vm1491_vm3, %v2449_v5, %v2451_v15  ;;  %v2189_v24 = vpop.f32.mrf.mxu1 }
 0x2b1   :  { %v2424_v29 = vadd.f32 %v2407_v10, %v2379_v38  ;;  %v2493_v12 = vmax.f32 %v2486_v33, 0.0  ;;  %v2368_v18 = vsel %vm1309_vm1, %v2365_v52, %v2367_v32 }
 0x2b3   :  { %v2217_v59 = vpop.f32.mrf.mxu3  ;;  %v2469_v62 = vadd.f32 %v2452_v56, %v2424_v29  ;;  %v2283_v37 = vpop.f32.mrf.mxu2 }
 0x2b4   :  { %v2218_v51 = vadd.f32 %v2217_v59, %v2184_v36  ;;  %v2284_v45 = vadd.f32 %v2283_v37, %v2250_v20 }
 0x2b5   :  { %v2478_v46 = vmul.f32 %v6253_v54, %v2469_v62 }
 0x2b6   :  { %2317 = vst [vmem:[#allocation2 + $0x150] sm:$0xff] %v2218_v51  ;;  %v2408_v44 = vrot.slane %v2218_v51, 5  ;;  %v2453_v60 = vrot.slane %v2284_v45, 6  ;;  %v2258_v59 = vpop.f32.mrf.mxu0 }
 0x2b7   :  { %2318 = vst [vmem:[#allocation2 + $0x158] sm:$0xff] %v2284_v45  ;;  %v2487_v49 = vadd.f32 %v6260_v42, %v2478_v46 }
 0x2b8   :  { %v2409_v28 = vsel %vm1400_vm2, %v2406_v63, %v2408_v44  ;;  %v2454_v9 = vsel %vm1491_vm3, %v2451_v15, %v2453_v60  ;;  %v2089_v63 = vadd.f32 %v6139_v23, %v6081_v1  ;;  %v2192_v20 = vpop.f32.mrf.mxu1 }
 0x2b9   :  { %v2494_v16 = vmax.f32 %v2487_v49, 0.0  ;;  %v2425_v2 = vadd.f32 %v2409_v28, %v6137_v19 }
 0x2ba   :  { %v2382_v29 = vadd.f32 %v2368_v18, %v2089_v63 }
 0x2bb   :  { %v2220_v48 = vpop.f32.mrf.mxu3  ;;  %v2515_v47 = vpack.c.bf16 %v2494_v16, %v2493_v12  ;;  %v2286_v8 = vpop.f32.mrf.mxu2  ;;  %v2470_v11 = vadd.f32 %v2454_v9, %v2425_v2 }
 0x2bc   :  { %v2221_v6 = vadd.f32 %v2220_v48, %v2187_v61  ;;  %v2287_v4 = vadd.f32 %v2286_v8, %v2253_v26 }
 0x2bd   :  { %2692 = vmatmul.bf16.gmra.mxu1 %v2515_v47  ;;  %2725 = vmatmul.bf16.gmra.mxu3 %v2515_v47  ;;  %v2479_v40 = vmul.f32 %v6253_v54, %v2470_v11 }
 0x2be   :  { %2321 = vst [vmem:[#allocation2 + $0x190] sm:$0xff] %v2221_v6  ;;  %2758 = vmatmul.bf16.gmra.mxu0 %v2515_v47  ;;  %v2410_v19 = vrot.slane %v2221_v6, 5  ;;  %v2455_v13 = vrot.slane %v2287_v4, 6  ;;  %v2260_v33 = vpop.f32.mrf.mxu0 }
 0x2bf   :  { %2322 = vst [vmem:[#allocation2 + $0x198] sm:$0xff] %v2287_v4  ;;  %v2488_v14 = vadd.f32 %v6260_v42, %v2479_v40 }
 0x2c0   :  { %v2411_v53 = vsel %vm1400_vm2, %v2408_v44, %v2410_v19  ;;  %v2456_v39 = vsel %vm1491_vm3, %v2453_v60, %v2455_v13  ;;  %v2194_v23 = vpop.f32.mrf.mxu1 }
 0x2c1   :  { %v2426_v27 = vadd.f32 %v2411_v53, %v2381_v0  ;;  %v2495_v21 = vmax.f32 %v2488_v14, 0.0 }
 0x2c3   :  { %v2222_v5 = vpop.f32.mrf.mxu3  ;;  %v2471_v50 = vadd.f32 %v2456_v39, %v2426_v27  ;;  %v2288_v34 = vpop.f32.mrf.mxu2 }
 0x2c4   :  { %v2223_v55 = vadd.f32 %v2222_v5, %v2189_v24  ;;  %v2289_v43 = vadd.f32 %v2288_v34, %v2255_v3 }
 0x2c5   :  { %v2480_v41 = vmul.f32 %v6253_v54, %v2471_v50 }
 0x2c6   :  { %2325 = vst [vmem:[#allocation2 + $0x1d0] sm:$0xff] %v2223_v55 }
 0x2c7   :  { %2326 = vst [vmem:[#allocation2 + $0x1d8] sm:$0xff] %v2289_v43  ;;  %v2489_v25 = vadd.f32 %v6260_v42, %v2480_v41 }
 0x2c9   :  { %v2496_v58 = vmax.f32 %v2489_v25, 0.0 }
 0x2cb   :  { %v2516_v30 = vpack.c.bf16 %v2496_v58, %v2495_v21  ;;  %v2225_v10 = vpop.f32.mrf.mxu3 }
 0x2cc   :  { %v2226_v56 = vadd.f32 %v2225_v10, %v2192_v20 }
 0x2cd   :  { %2697 = vmatmul.bf16.gmra.mxu1 %v2516_v30  ;;  %2730 = vmatmul.bf16.gmra.mxu3 %v2516_v30  ;;  %v2390_v36 = vld [vmem:[#allocation2 + $0x1d0] sm:$0x1f] }
 0x2ce   :  { %2763 = vmatmul.bf16.gmra.mxu0 %v2516_v30  ;;  %v2412_v38 = vrot.slane %v2390_v36, 5  ;;  %v2435_v15 = vld [vmem:[#allocation2 + $0x1d8] sm:$0x3f]  ;;  %2329 = vst [vmem:[#allocation2 + $0x210] sm:$0xff] %v2226_v56 }
 0x2cf   :  { %v2457_v35 = vrot.slane %v2435_v15, 6 }
 0x2d0   :  { %v2413_v62 = vsel %vm1400_vm2, %v2410_v19, %v2412_v38 }
 0x2d1   :  { %v2427_v7 = vadd.f32 %v2413_v62, %v2382_v29  ;;  %v2458_v51 = vsel %vm1491_vm3, %v2455_v13, %v2457_v35 }
 0x2d3   :  { %v2472_v37 = vadd.f32 %v2458_v51, %v2427_v7  ;;  %v2227_v45 = vpop.f32.mrf.mxu3 }
 0x2d5   :  { %v2481_v1 = vmul.f32 %v6253_v54, %v2472_v37 }
 0x2d7   :  { %v2490_v46 = vadd.f32 %v6260_v42, %v2481_v1 }
 0x2d9   :  { %v2497_v44 = vmax.f32 %v2490_v46, 0.0 }
 0x2db   :  { %v2517_v49 = vpack.c.bf16 0.0, %v2497_v44 }
 0x2dd   :  { %2702 = vmatmul.bf16.gmra.mxu1 %v2517_v49  ;;  %2735 = vmatmul.bf16.gmra.mxu3 %v2517_v49 }
 0x2de   :  { %2768 = vmatmul.bf16.gmra.mxu0 %v2517_v49 }
 0x2ed   :  { %2740 = vmatmul.bf16.gmra.mxu3 %v4568_v22  ;;  %2707 = vmatmul.bf16.gmra.mxu1 %v4568_v22 }
 0x2ee   :  { %2773 = vmatmul.bf16.gmra.mxu0 %v4568_v22 }
 0x32a   :  { %v6308_v52 = vpop.f32.mrf.mxu1 }
 0x32b   :  { %2778 = vst [vmem:[#allocation2] sm:$0xff] %v6308_v52  ;;  %v2754_v54 = vpop.f32.mrf.mxu0 }
 0x32c   :  { %2780 = vst.msk [vmem:[#allocation2 + $0x10] sm:$0xff] %vm40_vm4, %v2754_v54 }
 0x330   :  { %v2721_v42 = vpop.f32.mrf.mxu3 }
 0x331   :  { %2779 = vst [vmem:[#allocation2 + $0x8] sm:$0xff] %v2721_v42 }
 0x332   :  { %v6312_v28 = vpop.f32.mrf.mxu1  ;;  %v2913_v60 = vld [vmem:[#allocation2] sm:$0xe0] }
 0x333   :  { %v2865_v61 = vld [vmem:[#allocation2] sm:$0xfc]  ;;  %2781 = vst [vmem:[#allocation2 + $0x40] sm:$0xff] %v6312_v28  ;;  %v2756_v16 = vpop.f32.mrf.mxu0  ;;  %v2917_v22 = vrot.slane %v2913_v60, 5  ;;  %v2918_v2 = vrot.slane %v6312_v28, 5  ;;  %v2871_v48 = vrot.slane %v6312_v28, 2 }
 0x334   :  { %v2812_v12 = vld [vmem:[#allocation2] sm:$0xfe]  ;;  %v2870_v26 = vrot.slane %v2865_v61, 2  ;;  %2783 = vst.msk [vmem:[#allocation2 + $0x50] sm:$0xff] %vm40_vm4, %v2756_v16  ;;  %v2823_v6 = vrot.slane %v6312_v28, 1 }
 0x335   :  { %v2822_v47 = vrot.slane %v2812_v12, 1  ;;  %v2919_v8 = vsel %vm1400_vm2, %v2917_v22, %v2918_v2 }
 0x336   :  { %v2872_v57 = vsel %vm2869_vm5, %v2870_v26, %v2871_v48  ;;  %2932 = vrot.lane.b32.xlu2 %v2919_v8, %s4569_s4 }
 0x337   :  { %2885 = vrot.lane.b32.xlu1 %v2872_v57, %s4570_s1  ;;  %v2824_v9 = vsel %vm1309_vm1, %v2822_v47, %v2823_v6 }
 0x338   :  { %2837 = vrot.lane.b32.xlu0 %v2824_v9, %s4571_s3  ;;  %v6325_v17 = vpop.f32.mrf.mxu3  ;;  %v3005_v4 = vld [vmem:[#allocation2 + $0x8] sm:$0x80] }
 0x339   :  { %2782 = vst [vmem:[#allocation2 + $0x48] sm:$0xff] %v6325_v17  ;;  %v3010_v11 = vrot.slane %v3005_v4, 7  ;;  %v3011_v19 = vrot.slane %v6325_v17, 7  ;;  %v2977_v34 = vrot.slane %v6325_v17, 6 }
 0x33a   :  { %v6329_v0 = vpop.f32.mrf.mxu1 }
 0x33b   :  { %2784 = vst [vmem:[#allocation2 + $0x80] sm:$0xff] %v6329_v0  ;;  %v2759_v13 = vpop.f32.mrf.mxu0  ;;  %v2920_v53 = vrot.slane %v6329_v0, 5  ;;  %v2825_v27 = vrot.slane %v6329_v0, 1  ;;  %v3012_v40 = vsel %vm3009_vm6, %v3010_v11, %v3011_v19  ;;  %v2873_v3 = vrot.slane %v6329_v0, 2 }
 0x33c   :  { %2786 = vst.msk [vmem:[#allocation2 + $0x90] sm:$0xff] %vm40_vm4, %v2759_v13 }
 0x33d   :  { %v2921_v39 = vsel %vm1400_vm2, %v2918_v2, %v2920_v53  ;;  %v2826_v24 = vsel %vm1309_vm1, %v2823_v6, %v2825_v27  ;;  %v2874_v32 = vsel %vm2869_vm5, %v2871_v48, %v2873_v3 }
 0x33e   :  { %2934 = vrot.lane.b32.xlu2 %v2921_v39, %s4569_s4 }
 0x33f   :  { %3025 = vrot.lane.b32.xlu1 %v3012_v40, %s4571_s3 }
 0x340   :  { %2839 = vrot.lane.b32.xlu0 %v2826_v24, %s4571_s3  ;;  %v6343_v5 = vpop.f32.mrf.mxu3  ;;  %v3053_v58 = vld [vmem:[#allocation2 + $0x48] sm:$0xfc] }
 0x341   :  { %2785 = vst [vmem:[#allocation2 + $0x88] sm:$0xff] %v6343_v5  ;;  %v3013_v50 = vrot.slane %v6343_v5, 7  ;;  %v2979_v43 = vrot.slane %v6343_v5, 6  ;;  %v3060_v18 = vrot.slane %v6343_v5, 2  ;;  %v3059_v36 = vrot.slane %v3053_v58, 2 }
 0x342   :  { %v6348_v55 = vpop.f32.mrf.mxu1  ;;  %v3102_v62 = vld [vmem:[#allocation2 + $0x48] sm:$0xf8]  ;;  %v3108_v51 = vrot.slane %v6343_v5, 3 }
 0x343   :  { %2787 = vst [vmem:[#allocation2 + $0xc0] sm:$0xff] %v6348_v55  ;;  %v2761_v41 = vpop.f32.mrf.mxu0  ;;  %v2827_v14 = vrot.slane %v6348_v55, 1  ;;  %v6358_v31 = vsel %vm1491_vm3, %v2977_v34, %v2979_v43  ;;  %v3014_v25 = vsel %vm3009_vm6, %v3011_v19, %v3013_v50  ;;  %v2875_v20 = vrot.slane %v6348_v55, 2 }
 0x344   :  { %2789 = vst.msk [vmem:[#allocation2 + $0xd0] sm:$0xff] %vm40_vm4, %v2761_v41  ;;  %v3061_v56 = vsel %vm2869_vm5, %v3059_v36, %v3060_v18  ;;  %v3107_v1 = vrot.slane %v3102_v62, 3  ;;  %v2922_v46 = vrot.slane %v6348_v55, 5 }
 0x345   :  { %v2828_v21 = vsel %vm1309_vm1, %v2825_v27, %v2827_v14  ;;  %v2876_v59 = vsel %vm2869_vm5, %v2873_v3, %v2875_v20 }
 0x346   :  { %3027 = vrot.lane.b32.xlu2 %v3014_v25, %s4571_s3  ;;  %v3109_v54 = vsel %vm3106_vm7, %v3107_v1, %v3108_v51  ;;  %v2923_v42 = vsel %vm1400_vm2, %v2920_v53, %v2922_v46 }
 0x347   :  { %2887 = vrot.lane.b32.xlu1 %v2874_v32, %s4570_s1 }
 0x348   :  { %2841 = vrot.lane.b32.xlu0 %v2828_v21, %s4571_s3  ;;  %v6370_v30 = vpop.f32.mrf.mxu3 }
 0x349   :  { %2788 = vst [vmem:[#allocation2 + $0xc8] sm:$0xff] %v6370_v30  ;;  %v3062_v63 = vrot.slane %v6370_v30, 2  ;;  %v2981_v38 = vrot.slane %v6370_v30, 6  ;;  %v3110_v37 = vrot.slane %v6370_v30, 3  ;;  %v3015_v61 = vrot.slane %v6370_v30, 7 }
 0x34a   :  { %v6376_v15 = vpop.f32.mrf.mxu1 }
 0x34b   :  { %2790 = vst [vmem:[#allocation2 + $0x100] sm:$0xff] %v6376_v15  ;;  %v2764_v10 = vpop.f32.mrf.mxu0  ;;  %v6382_v29 = vsel %vm1491_vm3, %v2979_v43, %v2981_v38  ;;  %v3063_v35 = vsel %vm2869_vm5, %v3060_v18, %v3062_v63  ;;  %v3111_v49 = vsel %vm3106_vm7, %v3108_v51, %v3110_v37  ;;  %v2877_v12 = vrot.slane %v6376_v15, 2 }
 0x34c   :  { %2792 = vst.msk [vmem:[#allocation2 + $0x110] sm:$0xff] %vm40_vm4, %v2764_v10  ;;  %v2829_v2 = vrot.slane %v6376_v15, 1  ;;  %v3016_v47 = vsel %vm3009_vm6, %v3013_v50, %v3015_v61  ;;  %v2924_v9 = vrot.slane %v6376_v15, 5 }
 0x34d   :  { %v2878_v6 = vsel %vm2869_vm5, %v2875_v20, %v2877_v12 }
 0x34e   :  { %3076 = vrot.lane.b32.xlu2 %v3063_v35, %s4570_s1  ;;  %v2830_v8 = vsel %vm1309_vm1, %v2827_v14, %v2829_v2  ;;  %v2925_v40 = vsel %vm1400_vm2, %v2922_v46, %v2924_v9 }
 0x34f   :  { %3074 = vrot.lane.b32.xlu1 %v3061_v56, %s4570_s1 }
 0x350   :  { %2889 = vrot.lane.b32.xlu0 %v2876_v59, %s4570_s1  ;;  %v6392_v7 = vpop.f32.mrf.mxu3 }
 0x351   :  { %2791 = vst [vmem:[#allocation2 + $0x108] sm:$0xff] %v6392_v7  ;;  %v2983_v23 = vrot.slane %v6392_v7, 6  ;;  %v3112_v4 = vrot.slane %v6392_v7, 3  ;;  %v3064_v13 = vrot.slane %v6392_v7, 2  ;;  %v3017_v50 = vrot.slane %v6392_v7, 7 }
 0x352   :  { %v6398_v45 = vpop.f32.mrf.mxu1 }
 0x353   :  { %2793 = vst [vmem:[#allocation2 + $0x140] sm:$0xff] %v6398_v45  ;;  %v2766_v33 = vpop.f32.mrf.mxu0  ;;  %v6404_v44 = vsel %vm1491_vm3, %v2981_v38, %v2983_v23  ;;  %v3113_v39 = vsel %vm3106_vm7, %v3110_v37, %v3112_v4  ;;  %v3065_v24 = vsel %vm2869_vm5, %v3062_v63, %v3064_v13  ;;  %v2879_v3 = vrot.slane %v6398_v45, 2 }
 0x354   :  { %2795 = vst.msk [vmem:[#allocation2 + $0x150] sm:$0xff] %vm40_vm4, %v2766_v33  ;;  %v2831_v43 = vrot.slane %v6398_v45, 1  ;;  %v3018_v14 = vsel %vm3009_vm6, %v3015_v61, %v3017_v50  ;;  %v2926_v58 = vrot.slane %v6398_v45, 5 }
 0x355   :  { %v2880_v25 = vsel %vm2869_vm5, %v2877_v12, %v2879_v3 }
 0x356   :  { %3124 = vrot.lane.b32.xlu2 %v3111_v49, %s4569_s4  ;;  %v2832_v32 = vsel %vm1309_vm1, %v2829_v2, %v2831_v43  ;;  %v2927_v36 = vsel %vm1400_vm2, %v2924_v9, %v2926_v58 }
 0x357   :  { %3122 = vrot.lane.b32.xlu1 %v3109_v54, %s4569_s4 }
 0x358   :  { %2936 = vrot.lane.b32.xlu0 %v2923_v42, %s4569_s4  ;;  %v6414_v60 = vpop.f32.mrf.mxu3 }
 0x359   :  { %2794 = vst [vmem:[#allocation2 + $0x148] sm:$0xff] %v6414_v60  ;;  %v2985_v16 = vrot.slane %v6414_v60, 6  ;;  %v3114_v30 = vrot.slane %v6414_v60, 3  ;;  %v3066_v18 = vrot.slane %v6414_v60, 2  ;;  %v3019_v35 = vrot.slane %v6414_v60, 7 }
 0x35a   :  { %v6420_v22 = vpop.f32.mrf.mxu1 }
 0x35b   :  { %2796 = vst [vmem:[#allocation2 + $0x180] sm:$0xff] %v6420_v22  ;;  %v2769_v26 = vpop.f32.mrf.mxu0  ;;  %v6426_v48 = vsel %vm1491_vm3, %v2983_v23, %v2985_v16  ;;  %v3115_v38 = vsel %vm3106_vm7, %v3112_v4, %v3114_v30  ;;  %v3067_v20 = vsel %vm2869_vm5, %v3064_v13, %v3066_v18  ;;  %v2881_v56 = vrot.slane %v6420_v22, 2 }
 0x35c   :  { %2798 = vst.msk [vmem:[#allocation2 + $0x190] sm:$0xff] %vm40_vm4, %v2769_v26  ;;  %v2833_v59 = vrot.slane %v6420_v22, 1  ;;  %v3020_v62 = vsel %vm3009_vm6, %v3017_v50, %v3019_v35  ;;  %v2928_v37 = vrot.slane %v6420_v22, 5 }
 0x35d   :  { %v2882_v7 = vsel %vm2869_vm5, %v2879_v3, %v2881_v56 }
 0x35e   :  { %2891 = vrot.lane.b32.xlu2 %v2878_v6, %s4570_s1  ;;  %v2834_v51 = vsel %vm1309_vm1, %v2831_v43, %v2833_v59  ;;  %v2929_v46 = vsel %vm1400_vm2, %v2926_v58, %v2928_v37  ;;  %v4301_v58 = vld [vmem:[%s6672_s7 + $0x30] sm:$0xff] }
 0x35f   :  { %3029 = vrot.lane.b32.xlu1 %v3016_v47, %s4571_s3 }
 0x360   :  { %2843 = vrot.lane.b32.xlu0 %v2830_v8, %s4571_s3  ;;  %v6438_v57 = vpop.f32.mrf.mxu3 }
 0x361   :  { %2797 = vst [vmem:[#allocation2 + $0x188] sm:$0xff] %v6438_v57  ;;  %v2987_v11 = vrot.slane %v6438_v57, 6  ;;  %v3116_v1 = vrot.slane %v6438_v57, 3  ;;  %v3068_v23 = vrot.slane %v6438_v57, 2  ;;  %v3021_v60 = vrot.slane %v6438_v57, 7 }
 0x362   :  { %v2705_v19 = vpop.f32.mrf.mxu1 }
 0x363   :  { %2799 = vst [vmem:[#allocation2 + $0x1c0] sm:$0xff] %v2705_v19  ;;  %v2771_v53 = vpop.f32.mrf.mxu0  ;;  %v6448_v27 = vsel %vm1491_vm3, %v2985_v16, %v2987_v11  ;;  %v3117_v33 = vsel %vm3106_vm7, %v3114_v30, %v3116_v1  ;;  %v3069_v49 = vsel %vm2869_vm5, %v3066_v18, %v3068_v23  ;;  %v4302_v16 = vld [vmem:[%s6672_s7 + $0x38] sm:$0xff]  ;;  %v3022_v2 = vsel %vm3009_vm6, %v3019_v35, %v3021_v60 }
 0x364   :  { %2801 = vst.msk [vmem:[#allocation2 + $0x1d0] sm:$0xff] %vm40_vm4, %v2771_v53  ;;  %3284 = vmatpush.msra.mxu2 %v4302_v16  ;;  %v4320_v35 = vld [vmem:[%s6672_s7 + $0x58] sm:$0xff] }
 0x365   :  { %3404 = vmatpush.msrb.mxu0 %v4320_v35  ;;  %4523 = vmatpush.msrb.mxu1 %v4320_v35  ;;  %v4331_v16 = vld [vmem:[%s6672_s7 + $0x78] sm:$0xff] }
 0x366   :  { %3126 = vrot.lane.b32.xlu2 %v3113_v39, %s4569_s4  ;;  %3285 = vmatpush.msra.mxu2 %v4301_v58 }
 0x367   :  { %2938 = vrot.lane.b32.xlu1 %v2925_v40, %s4569_s4  ;;  %4527 = vmatpush.msrb.mxu3 %v4331_v16 }
 0x368   :  { %3078 = vrot.lane.b32.xlu0 %v3065_v24, %s4570_s1  ;;  %v6459_v5 = vpop.f32.mrf.mxu3 }
 0x369   :  { %2800 = vst [vmem:[#allocation2 + $0x1c8] sm:$0xff] %v6459_v5  ;;  %v3118_v9 = vrot.slane %v6459_v5, 3  ;;  %v3070_v4 = vrot.slane %v6459_v5, 2 }
 0x36a   :  { %v2866_v54 = vld [vmem:[#allocation2 + $0x1c0] sm:$0x3] }
 0x36b   :  { %v2774_v41 = vpop.f32.mrf.mxu0  ;;  %v2813_v42 = vld [vmem:[#allocation2 + $0x1c0] sm:$0x1]  ;;  %v2883_v61 = vrot.slane %v2866_v54, 2  ;;  %v3119_v53 = vsel %vm3106_vm7, %v3116_v1, %v3118_v9  ;;  %v3071_v40 = vsel %vm2869_vm5, %v3068_v23, %v3070_v4  ;;  %v2960_v23 = vld [vmem:[#allocation2 + $0x8] sm:$0xc0] }
 0x36c   :  { %2804 = vst.msk [vmem:[#allocation2 + $0x210] sm:$0xff] %vm40_vm4, %v2774_v41  ;;  %v2835_v12 = vrot.slane %v2813_v42, 1  ;;  %v2914_v6 = vld [vmem:[#allocation2 + $0x1c0] sm:$0x1f]  ;;  %v2976_v42 = vrot.slane %v2960_v23, 6 }
 0x36d   :  { %v2884_v26 = vsel %vm2869_vm5, %v2881_v56, %v2883_v61  ;;  %v2930_v8 = vrot.slane %v2914_v6, 5  ;;  %v4319_v56 = vld [vmem:[%s6672_s7 + $0x50] sm:$0xff] }
 0x36e   :  { %2893 = vrot.lane.b32.xlu2 %v2880_v25, %s4570_s1  ;;  %v2836_v47 = vsel %vm1309_vm1, %v2833_v59, %v2835_v12  ;;  %v4300_v59 = vld [vmem:[%s6672_s7 + $0x28] sm:$0xff]  ;;  %3405 = vmatpush.msrb.mxu0 %v4319_v56  ;;  %v6547_v12 = vld [vmem:[#allocation2 + $0xd0] sm:$0xff] }
 0x36f   :  { %3031 = vrot.lane.b32.xlu1 %v3018_v14, %s4571_s3  ;;  %v2931_v13 = vsel %vm1400_vm2, %v2928_v37, %v2930_v8  ;;  %3286 = vmatpush.msra.mxu2 %v4300_v59  ;;  %v4330_v8 = vld [vmem:[%s6672_s7 + $0x70] sm:$0xff] }
 0x370   :  { %2845 = vrot.lane.b32.xlu0 %v2832_v32, %s4571_s3  ;;  %v2741_v21 = vpop.f32.mrf.mxu3  ;;  %v3006_v50 = vld [vmem:[#allocation2 + $0x1c8] sm:$0x7f]  ;;  %4524 = vmatpush.msrb.mxu1 %v4319_v56 }
 0x371   :  { %2803 = vst [vmem:[#allocation2 + $0x208] sm:$0xff] %v2741_v21  ;;  %v3023_v41 = vrot.slane %v3006_v50, 7  ;;  %v2291_v21 = vpop.f32.mrf.mxu2  ;;  %4528 = vmatpush.msrb.mxu3 %v4330_v8 }
 0x373   :  { %v2776_v63 = vpop.f32.mrf.mxu0  ;;  %v3024_v32 = vsel %vm3009_vm6, %v3021_v60, %v3023_v41  ;;  %v4317_v60 = vld [vmem:[%s6672_s7 + $0x40] sm:$0xff] }
 0x376   :  { %3128 = vrot.lane.b32.xlu2 %v3115_v38, %s4569_s4 }
 0x377   :  { %2940 = vrot.lane.b32.xlu1 %v2927_v36, %s4569_s4 }
 0x378   :  { %3080 = vrot.lane.b32.xlu0 %v3067_v20, %s4570_s1  ;;  %v2743_v10 = vpop.f32.mrf.mxu3  ;;  %v3055_v39 = vld [vmem:[#allocation2 + $0x208] sm:$0x3] }
 0x379   :  { %v3103_v24 = vld [vmem:[#allocation2 + $0x208] sm:$0x7]  ;;  %v3072_v3 = vrot.slane %v3055_v39, 2  ;;  %v2293_v30 = vpop.f32.mrf.mxu2  ;;  %v4328_v39 = vld [vmem:[%s6672_s7 + $0x60] sm:$0xff] }
 0x37a   :  { %v3120_v43 = vrot.slane %v3103_v24, 3 }
 0x37b   :  { %v3073_v14 = vsel %vm2869_vm5, %v3070_v4, %v3072_v3  ;;  %v6574_v3 = vld [vmem:[%s6671_s6 + $0x1] ss:$0 sm:$0xff] }
 0x37c   :  { %v3121_v25 = vsel %vm3106_vm7, %v3118_v9, %v3120_v43  ;;  %v3150_v43 = vld [vmem:[#allocation2 + $0x50] sm:$0xf0] }
 0x37e   :  { %2895 = vrot.lane.b32.xlu2 %v2882_v7, %s4570_s1  ;;  %v4318_v7 = vld [vmem:[%s6672_s7 + $0x48] sm:$0xff] }
 0x37f   :  { %3033 = vrot.lane.b32.xlu1 %v3020_v62, %s4571_s3  ;;  %3406 = vmatpush.msrb.mxu0 %v4318_v7 }
 0x380   :  { %2847 = vrot.lane.b32.xlu0 %v2834_v51, %s4571_s3  ;;  %4525 = vmatpush.msrb.mxu1 %v4318_v7 }
 0x381   :  { %3407 = vmatpush.msrb.mxu0 %v4317_v60 }
 0x382   :  { %4526 = vmatpush.msrb.mxu1 %v4317_v60 }
 0x383   :  { %3472 = vmatpush.msra.mxu0 %v4331_v16 }
 0x385   :  { %3473 = vmatpush.msra.mxu0 %v4330_v8 }
 0x386   :  { %3130 = vrot.lane.b32.xlu2 %v3117_v33, %s4569_s4 }
 0x387   :  { %2942 = vrot.lane.b32.xlu1 %v2929_v46, %s4569_s4 }
 0x388   :  { %3082 = vrot.lane.b32.xlu0 %v3069_v49, %s4570_s1 }
 0x38e   :  { %2897 = vrot.lane.b32.xlu2 %v2884_v26, %s4570_s1  ;;  %v3151_v26 = vld [vmem:[#allocation2 + $0x90] sm:$0xff] }
 0x38f   :  { %3035 = vrot.lane.b32.xlu1 %v3022_v2, %s4571_s3 }
 0x390   :  { %2849 = vrot.lane.b32.xlu0 %v2836_v47, %s4571_s3  ;;  %v2933_v19 = vpop.permute.xlu2 %2932  ;;  %v2978_v47 = vsel %vm1491_vm3, %v2976_v42, %v2977_v34  ;;  %v6565_v34 = vld [vmem:[%s6671_s6] ss:$0 sm:$0xff] }
 0x396   :  { %3132 = vrot.lane.b32.xlu2 %v3119_v53, %s4569_s4  ;;  %v4329_v53 = vld [vmem:[%s6672_s7 + $0x68] sm:$0xff] }
 0x397   :  { %2944 = vrot.lane.b32.xlu1 %v2931_v13, %s4569_s4  ;;  %v3168_v13 = vrot.slane %v3151_v26, 4  ;;  %3474 = vmatpush.msra.mxu0 %v4329_v53 }
 0x398   :  { %3084 = vrot.lane.b32.xlu0 %v3071_v40, %s4570_s1  ;;  %v2935_v5 = vpop.permute.xlu2 %2934  ;;  %4529 = vmatpush.msrb.mxu3 %v4329_v53 }
 0x399   :  { %3475 = vmatpush.msra.mxu0 %v4328_v39 }
 0x39a   :  { %4530 = vmatpush.msrb.mxu3 %v4328_v39 }
 0x39e   :  { %3134 = vrot.lane.b32.xlu2 %v3121_v25, %s4569_s4 }
 0x39f   :  { %3086 = vrot.lane.b32.xlu1 %v3073_v14, %s4570_s1 }
 0x3a0   :  { %3037 = vrot.lane.b32.xlu0 %v3024_v32, %s4571_s3  ;;  %v3028_v18 = vpop.permute.xlu2 %3027  ;;  %v3167_v32 = vrot.slane %v3150_v43, 4 }
 0x3a8   :  { %v3077_v20 = vpop.permute.xlu2 %3076 }
 0x3a9   :  { %v2886_v63 = vpop.permute.xlu1 %2885 }
 0x3aa   :  { %v2838_v36 = vpop.permute.xlu0 %2837 }
 0x3ab   :  { %v2858_v62 = vadd.f32 %v2838_v36, %v6308_v52  ;;  %v4299_v52 = vld [vmem:[%s6672_s7 + $0x20] sm:$0xff] }
 0x3ac   :  { %3287 = vmatpush.msra.mxu2 %v4299_v52 }
 0x3ad   :  { %v2906_v1 = vadd.f32 %v2886_v63, %v2858_v62 }
 0x3b0   :  { %v3125_v49 = vpop.permute.xlu2 %3124 }
 0x3b1   :  { %v3026_v38 = vpop.permute.xlu1 %3025 }
 0x3b2   :  { %v2840_v10 = vpop.permute.xlu0 %2839 }
 0x3b3   :  { %v2859_v51 = vadd.f32 %v2840_v10, %v6312_v28  ;;  %v2953_v28 = vadd.f32 %v2933_v19, %v2906_v1  ;;  %v3153_v1 = vld [vmem:[#allocation2 + $0x110] sm:$0xff] }
 0x3b4   :  { %v3172_v42 = vrot.slane %v3153_v1, 4 }
 0x3b5   :  { %v2998_v9 = vadd.f32 %v2978_v47, %v2953_v28 }
 0x3b7   :  { %v3046_v24 = vadd.f32 %v3026_v38, %v2998_v9 }
 0x3b8   :  { %v2892_v50 = vpop.permute.xlu2 %2891 }
 0x3b9   :  { %v2888_v37 = vpop.permute.xlu1 %2887 }
 0x3ba   :  { %v2907_v46 = vadd.f32 %v2888_v37, %v2859_v51  ;;  %v2842_v33 = vpop.permute.xlu0 %2841 }
 0x3bc   :  { %v2954_v54 = vadd.f32 %v2935_v5, %v2907_v46 }
 0x3be   :  { %v2999_v61 = vadd.f32 %v6358_v31, %v2954_v54  ;;  %v3170_v31 = vrot.slane %v6547_v12, 4 }
 0x3c0   :  { %v3047_v2 = vadd.f32 %v3028_v18, %v2999_v61  ;;  %v3171_v40 = vsel %vm3166_vm8, %v3168_v13, %v3170_v31  ;;  %v3169_v18 = vsel %vm3166_vm8, %v3167_v32, %v3168_v13  ;;  %v3127_v10 = vpop.permute.xlu2 %3126  ;;  %v3173_v61 = vsel %vm3166_vm8, %v3170_v31, %v3172_v42  ;;  %v3238_v31 = vld [vmem:[%s6672_s7 + $0x18] sm:$0xff] }
 0x3c1   :  { %v3075_v6 = vpop.permute.xlu1 %3074  ;;  %3338 = vmatpush.msrb.mxu2 %v3238_v31 }
 0x3c2   :  { %v3096_v4 = vadd.f32 %v3077_v20, %v3047_v2  ;;  %v2890_v19 = vpop.permute.xlu0 %2889  ;;  %v3095_v5 = vadd.f32 %v3075_v6, %v3046_v24  ;;  %v2860_v20 = vadd.f32 %v2842_v33, %v6329_v0 }
 0x3c4   :  { %v3144_v17 = vadd.f32 %v3125_v49, %v3096_v4  ;;  %v2908_v56 = vadd.f32 %v2890_v19, %v2860_v20  ;;  %v3154_v19 = vld [vmem:[#allocation2 + $0x150] sm:$0xff] }
 0x3c5   :  { %v3237_v20 = vld [vmem:[%s6672_s7 + $0x10] sm:$0xff] }
 0x3c6   :  { %v3190_v41 = vadd.f32 %v3171_v40, %v3144_v17  ;;  %v3174_v40 = vrot.slane %v3154_v19, 4  ;;  %3339 = vmatpush.msrb.mxu2 %v3237_v20 }
 0x3c8   :  { %v3199_v14 = vmul.f32 %v6565_v34, %v3190_v41  ;;  %v2894_v49 = vpop.permute.xlu2 %2893  ;;  %v3175_v41 = vsel %vm3166_vm8, %v3172_v42, %v3174_v40 }
 0x3c9   :  { %v3123_v25 = vpop.permute.xlu1 %3122 }
 0x3ca   :  { %v3143_v21 = vadd.f32 %v3123_v25, %v3095_v5  ;;  %v2937_v58 = vpop.permute.xlu0 %2936  ;;  %v3208_v30 = vadd.f32 %v6574_v3, %v3199_v14 }
 0x3cb   :  { %v2955_v51 = vadd.f32 %v2937_v58, %v2908_v56 }
 0x3cc   :  { %v3189_v63 = vadd.f32 %v3169_v18, %v3143_v21  ;;  %v3215_v36 = vmax.f32 %v3208_v30, 0.0 }
 0x3cd   :  { %v3000_v37 = vadd.f32 %v6382_v29, %v2955_v51 }
 0x3ce   :  { %v3198_v38 = vmul.f32 %v6565_v34, %v3189_v63  ;;  %3222 = vst.msk [vmem:[#allocation5 + $0x8] sm:$0xff] %vm40_vm4, %v3215_v36 }
 0x3d0   :  { %v3207_v35 = vadd.f32 %v6574_v3, %v3198_v38  ;;  %v3129_v9 = vpop.permute.xlu2 %3128  ;;  %v3155_v38 = vld [vmem:[#allocation2 + $0x190] sm:$0xff] }
 0x3d1   :  { %v3030_v59 = vpop.permute.xlu1 %3029 }
 0x3d2   :  { %v3214_v62 = vmax.f32 %v3207_v35, 0.0  ;;  %v2844_v7 = vpop.permute.xlu0 %2843  ;;  %v3048_v23 = vadd.f32 %v3030_v59, %v3000_v37 }
 0x3d3   :  { %v2861_v60 = vadd.f32 %v2844_v7, %v6348_v55 }
 0x3d4   :  { %3221 = vst.msk [vmem:[#allocation5] sm:$0xff] %vm40_vm4, %v3214_v62  ;;  %v3176_v62 = vrot.slane %v3155_v38, 4 }
 0x3d5   :  { %v2909_v29 = vadd.f32 %v2892_v50, %v2861_v60 }
 0x3d6   :  { %v3177_v1 = vsel %vm3166_vm8, %v3174_v40, %v3176_v62 }
 0x3d8   :  { %v2896_v43 = vpop.permute.xlu2 %2895 }
 0x3d9   :  { %v2939_v46 = vpop.permute.xlu1 %2938 }
 0x3da   :  { %v3079_v54 = vpop.permute.xlu0 %3078  ;;  %v2956_v47 = vadd.f32 %v2939_v46, %v2909_v29 }
 0x3db   :  { %v3097_v52 = vadd.f32 %v3079_v54, %v3048_v23  ;;  %v3239_v0 = vld [vmem:[#allocation5 + $0x1] sm:$0xff] }
 0x3dc   :  { %v3359_v33 = vld [vmem:[#allocation5 + $0x5] sm:$0xff]  ;;  %4303 = vmatmul.msk.f32.vlgmr.msra.gmra.mxu2 %vm40_vm4, %v3239_v0  ;;  %v3001_v55 = vadd.f32 %v6404_v44, %v2956_v47 }
 0x3dd   :  { %4321 = vmatmul.msk.f32.vlgmr.msrb.gmra.mxu0 %vm40_vm4, %v3359_v33  ;;  %v3145_v28 = vadd.f32 %v3127_v10, %v3097_v52  ;;  %v3427_v8 = vld [vmem:[#allocation5 + $0x6] sm:$0xff] }
 0x3de   :  { %v2967_v47 = vld [vmem:[#allocation2 + $0x1c8] sm:$0x3f] }
 0x3df   :  { %v3191_v12 = vadd.f32 %v3173_v61, %v3145_v28  ;;  %v4572_v61 = vmov 0.0  }
 0x3e0   :  { %v3131_v10 = vpop.permute.xlu2 %3130  ;;  %41 = vst.msk [vmem:[#allocation5 + $0x38] sm:$0xff] %vm40_vm4, %v4572_v61 }
 0x3e1   :  { %v3200_v16 = vmul.f32 %v6565_v34, %v3191_v12  ;;  %v3032_v2 = vpop.permute.xlu1 %3031 }
 0x3e2   :  { %v2846_v26 = vpop.permute.xlu0 %2845  ;;  %v3049_v13 = vadd.f32 %v3032_v2, %v3001_v55  ;;  %v3156_v2 = vld [vmem:[#allocation2 + $0x1d0] sm:$0xff] }
 0x3e3   :  { %v3209_v6 = vadd.f32 %v6574_v3, %v3200_v16  ;;  %v2862_v24 = vadd.f32 %v2846_v26, %v6376_v15 }
 0x3e5   :  { %4332 = vmatmul.msk.f32.vlgmr.msra.gmra.mxu0 %vm40_vm4, %v3427_v8  ;;  %v3216_v4 = vmax.f32 %v3209_v6, 0.0  ;;  %v2910_v32 = vadd.f32 %v2894_v49, %v2862_v24 }
 0x3e7   :  { %3223 = vst.msk [vmem:[#allocation5 + $0x10] sm:$0xff] %vm40_vm4, %v3216_v4  ;;  %v3235_v4 = vld [vmem:[%s6672_s7] sm:$0xff] }
 0x3e8   :  { %v2898_v0 = vpop.permute.xlu2 %2897 }
 0x3e9   :  { %v2941_v53 = vpop.permute.xlu1 %2940 }
 0x3ea   :  { %v3081_v17 = vpop.permute.xlu0 %3080  ;;  %v2957_v15 = vadd.f32 %v2941_v53, %v2910_v32 }
 0x3eb   :  { %v3098_v39 = vadd.f32 %v3081_v17, %v3049_v13  ;;  %v2989_v13 = vrot.slane %v2967_v47, 6 }
 0x3ec   :  { %v3002_v36 = vadd.f32 %v6426_v48, %v2957_v15 }
 0x3ed   :  { %v3146_v50 = vadd.f32 %v3129_v9, %v3098_v39  ;;  %v3178_v9 = vrot.slane %v3156_v2, 4 }
 0x3ee   :  { %v3240_v5 = vld [vmem:[#allocation5 + $0x9] sm:$0xff] }
 0x3ef   :  { %v3360_v14 = vld [vmem:[#allocation5 + $0xd] sm:$0xff]  ;;  %v3192_v25 = vadd.f32 %v3175_v41, %v3146_v50  ;;  %4304 = vmatmul.msk.f32.gmra.mxu2 %vm40_vm4, %v3240_v5  ;;  %v2990_v50 = vsel %vm1491_vm3, %v2987_v11, %v2989_v13 }
 0x3f0   :  { %v3428_v44 = vld [vmem:[#allocation5 + $0xe] sm:$0xff]  ;;  %4322 = vmatmul.msk.f32.vlgmr.msrb.gmra.mxu1 %vm40_vm4, %v3360_v14  ;;  %v3133_v31 = vpop.permute.xlu2 %3132 }
 0x3f1   :  { %4333 = vmatmul.msk.f32.vlgmr.msrb.gmra.mxu3 %vm40_vm4, %v3428_v44  ;;  %v3201_v21 = vmul.f32 %v6565_v34, %v3192_v25  ;;  %v3034_v58 = vpop.permute.xlu1 %3033  ;;  %v3157_v5 = vld [vmem:[#allocation2 + $0x210] sm:$0xf] }
 0x3f2   :  { %v2848_v30 = vpop.permute.xlu0 %2847  ;;  %v3050_v35 = vadd.f32 %v3034_v58, %v3002_v36 }
 0x3f3   :  { %v3210_v18 = vadd.f32 %v6574_v3, %v3201_v21  ;;  %v2863_v51 = vadd.f32 %v2848_v30, %v6398_v45  ;;  %v3236_v45 = vld [vmem:[%s6672_s7 + $0x8] sm:$0xff]  ;;  %v3180_v21 = vrot.slane %v3157_v5, 4 }
 0x3f4   :  { %3340 = vmatpush.msrb.mxu2 %v3236_v45 }
 0x3f5   :  { %v3217_v63 = vmax.f32 %v3210_v18, 0.0  ;;  %v2911_v54 = vadd.f32 %v2896_v43, %v2863_v51  ;;  %v3181_v57 = vsel %vm3166_vm8, %v3178_v9, %v3180_v21  ;;  %v3228_v51 = vld [vmem:[#allocation5] sm:$0xff] }
 0x3f6   :  { %3341 = vmatpush.msrb.mxu2 %v3235_v4 }
 0x3f7   :  { %3224 = vst.msk [vmem:[#allocation5 + $0x18] sm:$0xff] %vm40_vm4, %v3217_v63 }
 0x3f8   :  { %v3135_v15 = vpop.permute.xlu2 %3134 }
 0x3f9   :  { %v2943_v56 = vpop.permute.xlu1 %2942 }
 0x3fa   :  { %v3083_v59 = vpop.permute.xlu0 %3082  ;;  %v2958_v60 = vadd.f32 %v2943_v56, %v2911_v54 }
 0x3fb   :  { %v3099_v7 = vadd.f32 %v3083_v59, %v3050_v35 }
 0x3fc   :  { %v3003_v29 = vadd.f32 %v6448_v27, %v2958_v60  ;;  %v3179_v27 = vsel %vm3166_vm8, %v3176_v62, %v3178_v9 }
 0x3fd   :  { %v3147_v37 = vadd.f32 %v3131_v10, %v3099_v7 }
 0x3fe   :  { %v3241_v23 = vld [vmem:[#allocation5 + $0x11] sm:$0xff] }
 0x3ff   :  { %v3361_v46 = vld [vmem:[#allocation5 + $0x15] sm:$0xff]  ;;  %v3193_v49 = vadd.f32 %v3177_v1, %v3147_v37  ;;  %4305 = vmatmul.msk.f32.gmra.mxu2 %vm40_vm4, %v3241_v23  ;;  %v2708_v37 = vpop.f32.mrf.mxu1  ;;  %v3229_v1 = vld [vmem:[#allocation5 + $0x8] sm:$0xff] }
 0x400   :  { %v3429_v48 = vld [vmem:[#allocation5 + $0x16] sm:$0xff]  ;;  %4323 = vmatmul.msk.f32.gmra.mxu1 %vm40_vm4, %v3361_v46 }
 0x401   :  { %4334 = vmatmul.msk.f32.gmra.mxu3 %vm40_vm4, %v3429_v48  ;;  %v3202_v42 = vmul.f32 %v6565_v34, %v3193_v49  ;;  %v3036_v52 = vpop.permute.xlu1 %3035  ;;  %v3230_v46 = vld [vmem:[#allocation5 + $0x10] sm:$0xff]  ;;  %v3231_v48 = vld [vmem:[#allocation5 + $0x18] sm:$0xff] }
 0x402   :  { %v2850_v33 = vpop.permute.xlu0 %2849  ;;  %v3051_v26 = vadd.f32 %v3036_v52, %v3003_v29 }
 0x403   :  { %v3211_v28 = vadd.f32 %v6574_v3, %v3202_v42  ;;  %v2864_v16 = vadd.f32 %v2850_v33, %v6420_v22 }
 0x405   :  { %v3218_v12 = vmax.f32 %v3211_v28, 0.0  ;;  %v2912_v55 = vadd.f32 %v2898_v0, %v2864_v16 }
 0x407   :  { %3225 = vst.msk [vmem:[#allocation5 + $0x20] sm:$0xff] %vm40_vm4, %v3218_v12  ;;  %v2710_v23 = vpop.f32.mrf.mxu1 }
 0x409   :  { %v2945_v6 = vpop.permute.xlu1 %2944 }
 0x40a   :  { %v3085_v8 = vpop.permute.xlu0 %3084  ;;  %v2959_v53 = vadd.f32 %v2945_v6, %v2912_v55 }
 0x40b   :  { %v3100_v19 = vadd.f32 %v3085_v8, %v3051_v26 }
 0x40c   :  { %v3004_v41 = vadd.f32 %v2990_v50, %v2959_v53 }
 0x40d   :  { %v3148_v17 = vadd.f32 %v3133_v31, %v3100_v19 }
 0x40e   :  { %v3242_v22 = vld [vmem:[#allocation5 + $0x19] sm:$0xff] }
 0x40f   :  { %v3362_v40 = vld [vmem:[#allocation5 + $0x1d] sm:$0xff]  ;;  %v3194_v24 = vadd.f32 %v3179_v27, %v3148_v17  ;;  %4306 = vmatmul.msk.f32.gmra.mxu2 %vm40_vm4, %v3242_v22 }
 0x410   :  { %v3430_v39 = vld [vmem:[#allocation5 + $0x1e] sm:$0xff]  ;;  %4324 = vmatmul.msk.f32.gmra.mxu1 %vm40_vm4, %v3362_v40 }
 0x411   :  { %4335 = vmatmul.msk.f32.gmra.mxu3 %vm40_vm4, %v3430_v39  ;;  %v3203_v43 = vmul.f32 %v6565_v34, %v3194_v24  ;;  %v3087_v32 = vpop.permute.xlu1 %3086  ;;  %v3232_v49 = vld [vmem:[#allocation5 + $0x20] sm:$0xff] }
 0x412   :  { %v3038_v14 = vpop.permute.xlu0 %3037  ;;  %v3495_v22 = vld [vmem:[%s6673_s8] sm:$0x1] }
 0x413   :  { %v3212_v44 = vadd.f32 %v6574_v3, %v3203_v43  ;;  %v3052_v25 = vadd.f32 %v3038_v14, %v3004_v41  ;;  %v4541_v14 = vld [vmem:[%s6673_s8] ss:$0 sm:$0xff] }
 0x415   :  { %v3219_v58 = vmax.f32 %v3212_v44, 0.0  ;;  %v3101_v30 = vadd.f32 %v3087_v32, %v3052_v25 }
 0x417   :  { %3226 = vst.msk [vmem:[#allocation5 + $0x28] sm:$0xff] %vm40_vm4, %v3219_v58  ;;  %v3149_v18 = vadd.f32 %v3135_v15, %v3101_v30 }
 0x419   :  { %v3195_v63 = vadd.f32 %v3181_v57, %v3149_v18 }
 0x41b   :  { %v3204_v11 = vmul.f32 %v6565_v34, %v3195_v63 }
 0x41d   :  { %v3213_v36 = vadd.f32 %v6574_v3, %v3204_v11 }
 0x41e   :  { %v3243_v38 = vld [vmem:[#allocation5 + $0x21] sm:$0xff] }
 0x41f   :  { %v3363_v20 = vld [vmem:[#allocation5 + $0x25] sm:$0xff]  ;;  %v3220_v35 = vmax.f32 %v3213_v36, 0.0  ;;  %4307 = vmatmul.msk.f32.gmra.mxu2 %vm40_vm4, %v3243_v38 }
 0x420   :  { %v3431_v10 = vld [vmem:[#allocation5 + $0x26] sm:$0xff]  ;;  %4325 = vmatmul.msk.f32.gmra.mxu1 %vm40_vm4, %v3363_v20 }
 0x421   :  { %4336 = vmatmul.msk.f32.gmra.mxu3 %vm40_vm4, %v3431_v10  ;;  %3227 = vst.msk [vmem:[#allocation5 + $0x30] sm:$0xff] %vm40_vm4, %v3220_v35  ;;  %v3233_v54 = vld [vmem:[#allocation5 + $0x28] sm:$0xff] }
 0x428   :  { %v3244_v56 = vld [vmem:[#allocation5 + $0x29] sm:$0xff]  ;;  %v3245_v34 = vld [vmem:[#allocation5 + $0x31] sm:$0xff] }
 0x429   :  { %v3364_v59 = vld [vmem:[#allocation5 + $0x2d] sm:$0xff]  ;;  %4308 = vmatmul.msk.f32.gmra.mxu2 %vm40_vm4, %v3244_v56  ;;  %v3365_v3 = vld [vmem:[#allocation5 + $0x35] sm:$0xff] }
 0x42a   :  { %v3432_v62 = vld [vmem:[#allocation5 + $0x2e] sm:$0xff]  ;;  %4326 = vmatmul.msk.f32.gmra.mxu1 %vm40_vm4, %v3364_v59  ;;  %v3433_v7 = vld [vmem:[#allocation5 + $0x36] sm:$0xff] }
 0x42b   :  { %4337 = vmatmul.msk.f32.gmra.mxu3 %vm40_vm4, %v3432_v62  ;;  %v3234_v42 = vld [vmem:[#allocation5 + $0x30] sm:$0xff] }
 0x431   :  { %4309 = vmatmul.msk.f32.gmra.mxu2 %vm40_vm4, %v3245_v34 }
 0x432   :  { %4327 = vmatmul.msk.f32.gmra.mxu1 %vm40_vm4, %v3365_v3 }
 0x433   :  { %4338 = vmatmul.msk.f32.gmra.mxu3 %vm40_vm4, %v3433_v7 }
 0x439   :  { %4310 = vmatmul.msk.f32.vlgmr.msrb.gmra.mxu2 %vm40_vm4, %v3228_v51 }
 0x441   :  { %4311 = vmatmul.msk.f32.gmra.mxu2 %vm40_vm4, %v3229_v1 }
 0x449   :  { %4312 = vmatmul.msk.f32.gmra.mxu2 %vm40_vm4, %v3230_v46 }
 0x451   :  { %4313 = vmatmul.msk.f32.gmra.mxu2 %vm40_vm4, %v3231_v48 }
 0x459   :  { %4314 = vmatmul.msk.f32.gmra.mxu2 %vm40_vm4, %v3232_v49 }
 0x45a   :  { %v3409_v31 = vpop.f32.mrf.mxu0 }
 0x45f   :  { %v3289_v52 = vpop.f32.mrf.mxu2 }
 0x461   :  { %4315 = vmatmul.msk.f32.gmra.mxu2 %vm40_vm4, %v3233_v54 }
 0x462   :  { %v3477_v27 = vpop.f32.mrf.mxu0 }
 0x469   :  { %4316 = vmatmul.msk.f32.gmra.mxu2 %vm40_vm4, %v3234_v42 }
 0x46d   :  { %v3412_v45 = vpop.f32.mrf.mxu1 }
 0x472   :  { %v3292_v0 = vpop.f32.mrf.mxu2 }
 0x474   :  { %v3480_v33 = vpop.f32.mrf.mxu3 }
 0x47d   :  { %v3414_v60 = vpop.f32.mrf.mxu1 }
 0x482   :  { %v3294_v28 = vpop.f32.mrf.mxu2 }
 0x484   :  { %v3482_v61 = vpop.f32.mrf.mxu3 }
 0x48d   :  { %v3416_v12 = vpop.f32.mrf.mxu1 }
 0x492   :  { %v3296_v29 = vpop.f32.mrf.mxu2 }
 0x494   :  { %v3484_v16 = vpop.f32.mrf.mxu3 }
 0x49d   :  { %v3419_v2 = vpop.f32.mrf.mxu1 }
 0x4a2   :  { %v3299_v26 = vpop.f32.mrf.mxu2 }
 0x4a4   :  { %v3487_v47 = vpop.f32.mrf.mxu3 }
 0x4a7   :  { %v3421_v6 = vpop.f32.mrf.mxu1 }
 0x4ac   :  { %v3301_v8 = vpop.f32.mrf.mxu2 }
 0x4ae   :  { %v3489_v9 = vpop.f32.mrf.mxu3 }
 0x4af   :  { %v3423_v4 = vpop.f32.mrf.mxu1 }
 0x4b4   :  { %v3303_v55 = vpop.f32.mrf.mxu2 }
 0x4b6   :  { %v3491_v19 = vpop.f32.mrf.mxu3 }
 0x4bc   :  { %v3343_v13 = vpop.f32.mrf.mxu2 }
 0x4bd   :  { %v3344_v53 = vadd.f32 %v3343_v13, %v3289_v52 }
 0x4bf   :  { %v3425_v17 = vadd.f32 %v3409_v31, %v3344_v53 }
 0x4c1   :  { %v3493_v40 = vadd.f32 %v3477_v27, %v3425_v17 }
 0x4c3   :  { %v3496_v39 = vadd.f32 %v3495_v22, %v3493_v40 }
 0x4c4   :  { %v3346_v24 = vpop.f32.mrf.mxu2 }
 0x4c5   :  { %3498 = vst.msk [vmem:[#allocation6] sm:$0x1] %vm3497_vm9, %v3496_v39 }
 0x4cc   :  { %v3348_v50 = vpop.f32.mrf.mxu2 }
 0x4d4   :  { %v3350_v43 = vpop.f32.mrf.mxu2 }
 0x4d5   :  { %v3351_v41 = vadd.f32 %v3350_v43, %v3296_v29 }
 0x4d7   :  { %v3426_v5 = vadd.f32 %v3416_v12, %v3351_v41 }
 0x4d9   :  { %v3494_v44 = vadd.f32 %v3484_v16, %v3426_v5 }
 0x4db   :  { %v3503_v25 = vadd.f32 %v4541_v14, %v3494_v44 }
 0x4dc   :  { %v3353_v32 = vpop.f32.mrf.mxu2 }
 0x4dd   :  { %3505 = vst.msk [vmem:[#allocation6] sm:$0x2] %vm3504_vm10, %v3503_v25 }
 0x4de   :  { %3516 = dma.vmem_to_hbm [thread:$0]  %s3512_s12, 32, %s3514_s15, [#allocation7]  }
 0x4e4   :  { %v3355_v21 = vpop.f32.mrf.mxu2 }
 0x4ec   :  { %v3357_v58 = vpop.f32.mrf.mxu2 }
 0x4ed   :  { %4566 = dma.done.wait [#allocation7], 32  }
 0x4ee   :  { %4567 = vsyncadd [#allocation7], 4294967264 }
 0x4ef   :  { %3521 = vsyncpa [#allocation7], 1 }

</bundles_post_ra>
